<compile_context>
chip_gen: v6e
topology: v6e:2x2x1
jax: 0.10.0
libtpu: 0.0.40
codegen_flags: <defaults>
</compile_context>

<pallas_src>
import functools

import numpy as np
import jax
import jax.numpy as jnp
from jax import lax
from jax.experimental import pallas as pl
from jax.experimental.pallas import tpu as pltpu

BN_EPS = 1e-5


def _dot(a, b):
    # bf16 operands, f32 accumulation on the MXU.
    return jnp.dot(a, b, preferred_element_type=jnp.float32)


def _pick_tile(n, candidates):
    for c in candidates:
        if c <= n and n % c == 0:
            return c
    return n


def _const_spec(arr, index_map):
    """Full-array replicated input; single-buffered when supported."""
    try:
        return pl.BlockSpec(arr.shape, index_map, pipeline_mode=pl.Buffered(1))
    except TypeError:  # jax build without BlockSpec.pipeline_mode
        return pl.BlockSpec(arr.shape, index_map)


# --------------------------- pass 1 kernel ---------------------------------
def _attn_conv1_kernel(xq_ref, xk_ref, wq_ref, bq_ref, wk_ref, bk_ref,
                       wv_ref, bv_ref, wm_ref, bm_ref, w1a_ref, w1b_ref,
                       b1_ref, h1_ref, sum_ref, sq_ref,
                       q_scr, m_scr, l_scr, acc_scr, *, n_heads, head_dim):
    """One (batch, q-tile, k-tile) step of flash attention + merge + conv1."""
    bf16 = jnp.bfloat16
    D = head_dim
    ki = pl.program_id(2)
    nk = pl.num_programs(2)

    @pl.when(ki == 0)
    def _init():
        xq = xq_ref[0]                                           # (tq, C) bf16
        # fused head-major Q projection; 1/sqrt(dim) already folded into Wq/bq
        q_scr[...] = (_dot(xq, wq_ref[...]) + bq_ref[...]).astype(bf16)
        m_scr[...] = jnp.full(m_scr.shape, -jnp.inf, jnp.float32)
        l_scr[...] = jnp.zeros_like(l_scr)
        acc_scr[...] = jnp.zeros_like(acc_scr)

    # fused head-major K / V projections for this key tile
    xk = xk_ref[0]                                               # (tk, C) bf16
    k_all = (_dot(xk, wk_ref[...]) + bk_ref[...]).astype(bf16)   # (tk, C)
    v_all = (_dot(xk, wv_ref[...]) + bv_ref[...]).astype(bf16)   # (tk, C)

    # Online-softmax update, one head at a time (static lane slices).
    for h in range(n_heads):
        sl = slice(h * D, (h + 1) * D)
        q_h = q_scr[:, sl]                                       # (tq, D) bf16
        k_h = k_all[:, sl]                                       # (tk, D) bf16
        v_h = v_all[:, sl]                                       # (tk, D) bf16

        # scores = q @ k^T without materializing a transpose (NT dot_general)
        s = lax.dot_general(q_h, k_h, (((1,), (1,)), ((), ())),
                            preferred_element_type=jnp.float32)  # (tq, tk)

        m_prev = m_scr[:, h:h + 1]
        l_prev = l_scr[:, h:h + 1]
        m_new = jnp.maximum(m_prev, jnp.max(s, axis=-1, keepdims=True))
        alpha = jnp.exp(m_prev - m_new)
        p = jnp.exp(s - m_new)          # f32 exp (correct on v5e/v6e/v7x)
        l_scr[:, h:h + 1] = alpha * l_prev + jnp.sum(p, axis=-1, keepdims=True)
        # un-normalized PV accumulate into the head-major (tq, C) slab
        acc_scr[:, sl] = alpha * acc_scr[:, sl] + _dot(p.astype(bf16), v_h)
        m_scr[:, h:h + 1] = m_new

    @pl.when(ki == nk - 1)
    def _finish():
        # post-PV normalization (per head, per row) — no N^2 multiply
        inv_l = pl.reciprocal(l_scr[...], approx=True)           # (tq, H)
        for h in range(n_heads):
            sl = slice(h * D, (h + 1) * D)
            acc_scr[:, sl] = acc_scr[:, sl] * inv_l[:, h:h + 1]

        # fused merge conv: one (tq, C) @ (C, C) matmul on head-major channels
        msg = _dot(acc_scr[...].astype(bf16), wm_ref[...]) + bm_ref[...]

        # h1 = conv1(cat([x, message])) = x @ W1[:C] + message @ W1[C:] + b1
        xq = xq_ref[0]
        h1 = (_dot(xq, w1a_ref[...])
              + _dot(msg.astype(bf16), w1b_ref[...])
              + b1_ref[...])                                     # (tq, 2C) f32

        h1_ref[0] = h1.astype(h1_ref.dtype)                      # bf16 store
        sum_ref[0] = jnp.sum(h1, axis=0, keepdims=True)          # BN partials
        sq_ref[0] = jnp.sum(h1 * h1, axis=0, keepdims=True)      # (f32)


# --------------------------- pass 2 kernel ---------------------------------
def _bn_relu_conv2_kernel(h1_ref, scale_ref, shift_ref, w2_ref, b2_ref, o_ref):
    """Row tile of (B*N): BN affine + ReLU + final 1x1 conv as one matmul."""
    h1 = h1_ref[...].astype(jnp.float32)
    act = jnp.maximum(h1 * scale_ref[...] + shift_ref[...], 0.0)
    out = _dot(act.astype(jnp.bfloat16), w2_ref[...]) + b2_ref[...]
    o_ref[...] = out.astype(o_ref.dtype)


# --------------------------- wrapper ----------------------------------------
def attentional_propagation(x_ncl, params, n_heads):
    """x_ncl: [B, C, N] float32 (PyTorch NCL layout). Returns [B, C, N]."""
    B, C, N = x_ncl.shape
    dim = C // n_heads
    C2 = 2 * C
    f32, bf16 = jnp.float32, jnp.bfloat16

    # ---- one-time parameter prep: head-major re-layout, scale folding, bf16 --
    # Conv1d weight layout is (Cout, Cin); the view(b, dim, heads, -1) split
    # means output channel c = d*n_heads + h (heads innermost).  We reorder
    # output columns head-major (j = h*dim + d) so per-head data is a
    # contiguous lane slice of the fused projection output.
    def headmajor_proj(w, b, s=1.0):
        w_hm = jnp.transpose(w.reshape(dim, n_heads, C), (2, 1, 0)).reshape(C, C) * s
        b_hm = (jnp.transpose(b.reshape(dim, n_heads), (1, 0)).reshape(C) * s)[None, :]
        return w_hm.astype(bf16), b_hm.astype(f32)

    inv_sqrt_dim = 1.0 / float(dim) ** 0.5
    wq, bq = headmajor_proj(params["wq"], params["bq"], inv_sqrt_dim)  # scale folded
    wk, bk = headmajor_proj(params["wk"], params["bk"])
    wv, bv = headmajor_proj(params["wv"], params["bv"])

    # merge conv consumes head-major input channels: row j = h*dim + d
    wm_hm = jnp.transpose(params["wm"].reshape(C, dim, n_heads),
                          (2, 1, 0)).reshape(C, C).astype(bf16)        # (C, C)
    bm = params["bm"][None, :].astype(f32)

    w1 = params["w1"]                              # (2C, 2C) = (Cout, Cin)
    w1a = w1[:, :C].T.astype(bf16)                 # x part        (C, 2C)
    w1b = w1[:, C:].T.astype(bf16)                 # message part  (C, 2C)
    b1 = params["b1"][None, :].astype(f32)

    w2 = params["w2"].T.astype(bf16)               # (2C, C)
    b2 = params["b2"][None, :].astype(f32)

    x = jnp.transpose(x_ncl, (0, 2, 1)).astype(bf16)   # (B, N, C) channels-last

    # ---- tiling: q-tiles and k-tiles (full N at small shapes) --------------
    tq = _pick_tile(N, (512, 256, 128, 64, 32, 16, 8))
    tk = _pick_tile(N, (512, 256, 128, 64, 32, 16, 8))
    nq, nk = N // tq, N // tk

    weight_args = (wq, bq, wk, bk, wv, bv, wm_hm, bm, w1a, w1b, b1)

    # ---------------- pass 1: flash attention + conv1 + BN partial stats ----
    h1, ssum, ssq = pl.pallas_call(
        functools.partial(_attn_conv1_kernel, n_heads=n_heads, head_dim=dim),
        grid=(B, nq, nk),
        in_specs=[
            pl.BlockSpec((1, tq, C), lambda b, q, k: (b, q, 0)),   # query rows
            pl.BlockSpec((1, tk, C), lambda b, q, k: (b, k, 0)),   # key rows
        ] + [_const_spec(a, lambda b, q, k, _nd=a.ndim: (0,) * _nd)
             for a in weight_args],
        out_specs=[
            pl.BlockSpec((1, tq, C2), lambda b, q, k: (b, q, 0)),
            pl.BlockSpec((1, 1, C2), lambda b, q, k: (b, q, 0)),
            pl.BlockSpec((1, 1, C2), lambda b, q, k: (b, q, 0)),
        ],
        out_shape=[
            jax.ShapeDtypeStruct((B, N, C2), bf16),     # h1 in bf16
            jax.ShapeDtypeStruct((B, nq, C2), f32),     # per-(b,q-tile) sum
            jax.ShapeDtypeStruct((B, nq, C2), f32),     # per-(b,q-tile) sum sq
        ],
        scratch_shapes=[
            pltpu.VMEM((tq, C), bf16),            # q (head-major), per q-tile
            pltpu.VMEM((tq, n_heads), f32),       # running max  m
            pltpu.VMEM((tq, n_heads), f32),       # running sum  l
            pltpu.VMEM((tq, C), f32),             # PV accumulator (head-major)
        ],
        compiler_params=pltpu.CompilerParams(
            dimension_semantics=("parallel", "parallel", "arbitrary"),
            vmem_limit_bytes=48 * 1024 * 1024),   # fits v7x 64 MiB budget
    )(x, x, *weight_args)

    # ---------------- BatchNorm1d training-mode statistics (tiny glue) ------
    # TODO(synk): E[x^2]-E[x]^2 in f32 can cancel for very large B*N; switch to
    # a shifted/compensated accumulation if production batch sizes demand it.
    cnt = float(B * N)
    mean = jnp.sum(ssum, axis=(0, 1)) / cnt                         # (2C,)
    var = jnp.maximum(jnp.sum(ssq, axis=(0, 1)) / cnt - mean * mean, 0.0)
    inv_std = lax.rsqrt(var + BN_EPS)
    bn_scale = (params["gamma"] * inv_std)[None, :].astype(f32)     # (1, 2C)
    bn_shift = (params["beta"] - mean * params["gamma"] * inv_std)[None, :].astype(f32)

    # ---------------- pass 2: BN apply + ReLU + final conv (flattened) ------
    M = B * N
    h1_flat = h1.reshape(M, C2)                                     # bf16
    tm = _pick_tile(M, (2048, 1024, 512, 256, 128, 64, 32, 16, 8))

    p2_consts = (bn_scale, bn_shift, w2, b2)
    out_flat = pl.pallas_call(
        _bn_relu_conv2_kernel,
        grid=(M // tm,),
        in_specs=[pl.BlockSpec((tm, C2), lambda i: (i, 0))]
                 + [_const_spec(a, lambda i, _nd=a.ndim: (0,) * _nd)
                    for a in p2_consts],
        out_specs=pl.BlockSpec((tm, C), lambda i: (i, 0)),
        out_shape=jax.ShapeDtypeStruct((M, C), f32),
        compiler_params=pltpu.CompilerParams(
            dimension_semantics=("parallel",),
            vmem_limit_bytes=32 * 1024 * 1024),
    )(h1_flat, *p2_consts)

    return jnp.transpose(out_flat.reshape(B, N, C), (0, 2, 1))   # back to [B, C, N]


# --------------------------- pure-JAX reference ------------------------------
def reference_forward(x_ncl, params, n_heads):
    """Pure-JAX mirror of the PyTorch module (NCL layout), full f32 precision."""
    B, C, N = x_ncl.shape
    dim = C // n_heads
    ein = functools.partial(jnp.einsum, precision=lax.Precision.HIGHEST)

    def conv1d(x, w, b):  # x: (B, Cin, N), w: (Cout, Cin), b: (Cout,)
        return ein("oc,bcn->bon", w, x) + b[None, :, None]

    q = conv1d(x_ncl, params["wq"], params["bq"])
    k = conv1d(x_ncl, params["wk"], params["bk"])
    v = conv1d(x_ncl, params["wv"], params["bv"])
    qv = q.reshape(B, dim, n_heads, N)
    kv = k.reshape(B, dim, n_heads, N)
    vv = v.reshape(B, dim, n_heads, N)
    scores = ein("bdhn,bdhm->bhnm", qv, kv) / dim ** 0.5
    p = jax.nn.softmax(scores, axis=-1)
    attn = ein("bhnm,bdhm->bdhn", p, vv)
    msg = conv1d(attn.reshape(B, C, N), params["wm"], params["bm"])

    cat = jnp.concatenate([x_ncl, msg], axis=1)              # (B, 2C, N)
    h1 = conv1d(cat, params["w1"], params["b1"])
    mean = jnp.mean(h1, axis=(0, 2), keepdims=True)
    var = jnp.mean((h1 - mean) ** 2, axis=(0, 2), keepdims=True)
    bn = (params["gamma"][None, :, None] * (h1 - mean)
          / jnp.sqrt(var + BN_EPS) + params["beta"][None, :, None])
    act = jnp.maximum(bn, 0.0)
    return conv1d(act, params["w2"], params["b2"])


if __name__ == "__main__":
    # Small test shapes (production SuperGlue is C=256, N>=1024; the tiling
    # code above adapts automatically — at these toy shapes every tile is the
    # full extent and the grid collapses to (B, 1, 1)).
    B, F_DIM, H, N = 2, 32, 4, 64          # feature_dim=32, n_heads=4, 64 points

    key = jax.random.PRNGKey(0)
    ks = jax.random.split(key, 16)

    def rnd(k, shape, s=0.1):
        return jax.random.normal(k, shape, dtype=jnp.float32) * s

    params = {
        "wq": rnd(ks[0], (F_DIM, F_DIM)), "bq": rnd(ks[1], (F_DIM,)),
        "wk": rnd(ks[2], (F_DIM, F_DIM)), "bk": rnd(ks[3], (F_DIM,)),
        "wv": rnd(ks[4], (F_DIM, F_DIM)), "bv": rnd(ks[5], (F_DIM,)),
        "wm": rnd(ks[6], (F_DIM, F_DIM)), "bm": rnd(ks[7], (F_DIM,)),
        "w1": rnd(ks[8], (2 * F_DIM, 2 * F_DIM)), "b1": rnd(ks[9], (2 * F_DIM,)),
        "gamma": jnp.ones((2 * F_DIM,), jnp.float32),   # BatchNorm1d defaults
        "beta": jnp.zeros((2 * F_DIM,), jnp.float32),
        "w2": rnd(ks[10], (F_DIM, 2 * F_DIM)),
        "b2": jnp.zeros((F_DIM,), jnp.float32),         # nn.init.constant_(bias, 0)
    }
    x = rnd(ks[11], (B, F_DIM, N), s=1.0)               # PyTorch-style [B, C, N]

    out = attentional_propagation(x, params, H)
    out = jax.block_until_ready(out)

    ref = reference_forward(x, params, H)
    # Kernel matmuls use bf16 operands (f32 accumulation), h1 is stored bf16,
    # and the softmax denominator uses pl.reciprocal(approx=True); the
    # reference is full-f32 HIGHEST precision — hence the relaxed tolerance
    # (structural errors would be O(0.1-1)).
    np.testing.assert_allclose(np.asarray(out), np.asarray(ref),
                               rtol=5e-2, atol=5e-2)
    print("KERNEL_OK")
</pallas_src>

<mosaic_0001>
module attributes {stable_mosaic.version = 11 : i64} {
  func.func @_attn_conv1_kernel(%arg0: i32, %arg1: i32, %arg2: i32, %arg3: memref<1x64x32xbf16, #tpu.memory_space<vmem>>, %arg4: memref<1x64x32xbf16, #tpu.memory_space<vmem>>, %arg5: memref<32x32xbf16, #tpu.memory_space<vmem>>, %arg6: memref<1x32xf32, #tpu.memory_space<vmem>>, %arg7: memref<32x32xbf16, #tpu.memory_space<vmem>>, %arg8: memref<1x32xf32, #tpu.memory_space<vmem>>, %arg9: memref<32x32xbf16, #tpu.memory_space<vmem>>, %arg10: memref<1x32xf32, #tpu.memory_space<vmem>>, %arg11: memref<32x32xbf16, #tpu.memory_space<vmem>>, %arg12: memref<1x32xf32, #tpu.memory_space<vmem>>, %arg13: memref<32x64xbf16, #tpu.memory_space<vmem>>, %arg14: memref<32x64xbf16, #tpu.memory_space<vmem>>, %arg15: memref<1x64xf32, #tpu.memory_space<vmem>>, %arg16: memref<1x64x64xbf16, #tpu.memory_space<vmem>>, %arg17: memref<1x1x64xf32, #tpu.memory_space<vmem>>, %arg18: memref<1x1x64xf32, #tpu.memory_space<vmem>>, %arg19: memref<64x32xbf16, #tpu.memory_space<vmem>>, %arg20: memref<64x4xf32, #tpu.memory_space<vmem>>, %arg21: memref<64x4xf32, #tpu.memory_space<vmem>>, %arg22: memref<64x32xf32, #tpu.memory_space<vmem>>) attributes {dimension_semantics = [#tpu.dimension_semantics<parallel>, #tpu.dimension_semantics<parallel>, #tpu.dimension_semantics<arbitrary>], iteration_bounds = array<i64: 2, 1, 1>, scalar_prefetch = 0 : i64, scratch_operands = 4 : i64, tpu.core_type = #tpu.core_type<tc>, window_params = [{transform_indices = @transform_0, window_bounds = array<i64: 1, 64, 32>}, {transform_indices = @transform_1, window_bounds = array<i64: 1, 64, 32>}, {pipeline_mode = #tpu.pipeline_mode<synchronous>, transform_indices = @transform_2, window_bounds = array<i64: 32, 32>}, {pipeline_mode = #tpu.pipeline_mode<synchronous>, transform_indices = @transform_3, window_bounds = array<i64: 1, 32>}, {pipeline_mode = #tpu.pipeline_mode<synchronous>, transform_indices = @transform_4, window_bounds = array<i64: 32, 32>}, {pipeline_mode = #tpu.pipeline_mode<synchronous>, transform_indices = @transform_5, window_bounds = array<i64: 1, 32>}, {pipeline_mode = #tpu.pipeline_mode<synchronous>, transform_indices = @transform_6, window_bounds = array<i64: 32, 32>}, {pipeline_mode = #tpu.pipeline_mode<synchronous>, transform_indices = @transform_7, window_bounds = array<i64: 1, 32>}, {pipeline_mode = #tpu.pipeline_mode<synchronous>, transform_indices = @transform_8, window_bounds = array<i64: 32, 32>}, {pipeline_mode = #tpu.pipeline_mode<synchronous>, transform_indices = @transform_9, window_bounds = array<i64: 1, 32>}, {pipeline_mode = #tpu.pipeline_mode<synchronous>, transform_indices = @transform_10, window_bounds = array<i64: 32, 64>}, {pipeline_mode = #tpu.pipeline_mode<synchronous>, transform_indices = @transform_11, window_bounds = array<i64: 32, 64>}, {pipeline_mode = #tpu.pipeline_mode<synchronous>, transform_indices = @transform_12, window_bounds = array<i64: 1, 64>}, {transform_indices = @transform_13, window_bounds = array<i64: 1, 64, 64>}, {transform_indices = @transform_14, window_bounds = array<i64: 1, 1, 64>}, {transform_indices = @transform_15, window_bounds = array<i64: 1, 1, 64>}]} {
    %c0_i32 = arith.constant 0 : i32
    %0 = arith.cmpi eq, %arg2, %c0_i32 : i32
    %1 = arith.extui %0 : i1 to i32
    %c0_i32_0 = arith.constant 0 : i32
    %2 = arith.cmpi ne, %1, %c0_i32_0 : i32
    scf.if %2 {
      %c0_80 = arith.constant 0 : index
      %c0_81 = arith.constant 0 : index
      %c0_82 = arith.constant 0 : index
      %128 = vector.load %arg3[%c0_80, %c0_81, %c0_82] : memref<1x64x32xbf16, #tpu.memory_space<vmem>>, vector<1x64x32xbf16>
      %129 = vector.shape_cast %128 : vector<1x64x32xbf16> to vector<64x32xbf16>
      %c0_83 = arith.constant 0 : index
      %c0_84 = arith.constant 0 : index
      %130 = vector.load %arg5[%c0_83, %c0_84] : memref<32x32xbf16, #tpu.memory_space<vmem>>, vector<32x32xbf16>
      %cst_85 = arith.constant dense<0.000000e+00> : vector<64x32xf32>
      %131 = tpu.matmul %129, %130, %cst_85 {dimension_numbers = #tpu.dot_dimension_numbers<[1], [0], [0], [1], [0, 0, 1, 1], [], []>} : vector<64x32xbf16>, vector<32x32xbf16>, vector<64x32xf32> -> vector<64x32xf32>
      %c0_86 = arith.constant 0 : index
      %c0_87 = arith.constant 0 : index
      %132 = vector.load %arg6[%c0_86, %c0_87] : memref<1x32xf32, #tpu.memory_space<vmem>>, vector<1x32xf32>
      %133 = vector.broadcast %132 : vector<1x32xf32> to vector<64x32xf32>
      %134 = arith.addf %131, %133 : vector<64x32xf32>
      %135 = arith.truncf %134 : vector<64x32xf32> to vector<64x32xbf16>
      %c0_88 = arith.constant 0 : index
      %c0_89 = arith.constant 0 : index
      %136 = vector.load %arg19[%c0_88, %c0_89] : memref<64x32xbf16, #tpu.memory_space<vmem>>, vector<64x32xbf16>
      tpu.vector_store %arg19[%c0_88, %c0_89], %135 {strides = array<i32>} : memref<64x32xbf16, #tpu.memory_space<vmem>>, vector<64x32xbf16>,
      %cst_90 = arith.constant 0xFF800000 : f32
      %137 = vector.broadcast %cst_90 : f32 to vector<64x4xf32>
      %c0_91 = arith.constant 0 : index
      %c0_92 = arith.constant 0 : index
      %138 = vector.load %arg20[%c0_91, %c0_92] : memref<64x4xf32, #tpu.memory_space<vmem>>, vector<64x4xf32>
      tpu.vector_store %arg20[%c0_91, %c0_92], %137 {strides = array<i32>} : memref<64x4xf32, #tpu.memory_space<vmem>>, vector<64x4xf32>,
      %cst_93 = arith.constant 0.000000e+00 : f32
      %139 = vector.broadcast %cst_93 : f32 to vector<64x4xf32>
      %c0_94 = arith.constant 0 : index
      %c0_95 = arith.constant 0 : index
      %140 = vector.load %arg21[%c0_94, %c0_95] : memref<64x4xf32, #tpu.memory_space<vmem>>, vector<64x4xf32>
      tpu.vector_store %arg21[%c0_94, %c0_95], %139 {strides = array<i32>} : memref<64x4xf32, #tpu.memory_space<vmem>>, vector<64x4xf32>,
      %cst_96 = arith.constant 0.000000e+00 : f32
      %141 = vector.broadcast %cst_96 : f32 to vector<64x32xf32>
      %c0_97 = arith.constant 0 : index
      %c0_98 = arith.constant 0 : index
      %142 = vector.load %arg22[%c0_97, %c0_98] : memref<64x32xf32, #tpu.memory_space<vmem>>, vector<64x32xf32>
      tpu.vector_store %arg22[%c0_97, %c0_98], %141 {strides = array<i32>} : memref<64x32xf32, #tpu.memory_space<vmem>>, vector<64x32xf32>,
    } else {
    }
    %c0 = arith.constant 0 : index
    %c0_1 = arith.constant 0 : index
    %c0_2 = arith.constant 0 : index
    %3 = vector.load %arg4[%c0, %c0_1, %c0_2] : memref<1x64x32xbf16, #tpu.memory_space<vmem>>, vector<1x64x32xbf16>
    %4 = vector.shape_cast %3 : vector<1x64x32xbf16> to vector<64x32xbf16>
    %c0_3 = arith.constant 0 : index
    %c0_4 = arith.constant 0 : index
    %5 = vector.load %arg7[%c0_3, %c0_4] : memref<32x32xbf16, #tpu.memory_space<vmem>>, vector<32x32xbf16>
    %cst = arith.constant dense<0.000000e+00> : vector<64x32xf32>
    %6 = tpu.matmul %4, %5, %cst {dimension_numbers = #tpu.dot_dimension_numbers<[1], [0], [0], [1], [0, 0, 1, 1], [], []>} : vector<64x32xbf16>, vector<32x32xbf16>, vector<64x32xf32> -> vector<64x32xf32>
    %c0_5 = arith.constant 0 : index
    %c0_6 = arith.constant 0 : index
    %7 = vector.load %arg8[%c0_5, %c0_6] : memref<1x32xf32, #tpu.memory_space<vmem>>, vector<1x32xf32>
    %8 = vector.broadcast %7 : vector<1x32xf32> to vector<64x32xf32>
    %9 = arith.addf %6, %8 : vector<64x32xf32>
    %10 = arith.truncf %9 : vector<64x32xf32> to vector<64x32xbf16>
    %c0_7 = arith.constant 0 : index
    %c0_8 = arith.constant 0 : index
    %11 = vector.load %arg9[%c0_7, %c0_8] : memref<32x32xbf16, #tpu.memory_space<vmem>>, vector<32x32xbf16>
    %cst_9 = arith.constant dense<0.000000e+00> : vector<64x32xf32>
    %12 = tpu.matmul %4, %11, %cst_9 {dimension_numbers = #tpu.dot_dimension_numbers<[1], [0], [0], [1], [0, 0, 1, 1], [], []>} : vector<64x32xbf16>, vector<32x32xbf16>, vector<64x32xf32> -> vector<64x32xf32>
    %c0_10 = arith.constant 0 : index
    %c0_11 = arith.constant 0 : index
    %13 = vector.load %arg10[%c0_10, %c0_11] : memref<1x32xf32, #tpu.memory_space<vmem>>, vector<1x32xf32>
    %14 = vector.broadcast %13 : vector<1x32xf32> to vector<64x32xf32>
    %15 = arith.addf %12, %14 : vector<64x32xf32>
    %16 = arith.truncf %15 : vector<64x32xf32> to vector<64x32xbf16>
    %c0_12 = arith.constant 0 : index
    %c0_13 = arith.constant 0 : index
    %17 = vector.load %arg19[%c0_12, %c0_13] : memref<64x32xbf16, #tpu.memory_space<vmem>>, vector<64x8xbf16>
    %18 = vector.extract_strided_slice %10 {offsets = [0, 0], sizes = [64, 8], strides = [1, 1]} : vector<64x32xbf16> to vector<64x8xbf16>
    %19 = vector.extract_strided_slice %16 {offsets = [0, 0], sizes = [64, 8], strides = [1, 1]} : vector<64x32xbf16> to vector<64x8xbf16>
    %cst_14 = arith.constant dense<0.000000e+00> : vector<64x64xf32>
    %20 = tpu.matmul %17, %18, %cst_14 {dimension_numbers = #tpu.dot_dimension_numbers<[1], [1], [0], [0], [0, 0, 1, 0], [], []>} : vector<64x8xbf16>, vector<64x8xbf16>, vector<64x64xf32> -> vector<64x64xf32>
    %c0_15 = arith.constant 0 : index
    %c0_16 = arith.constant 0 : index
    %21 = vector.load %arg20[%c0_15, %c0_16] : memref<64x4xf32, #tpu.memory_space<vmem>>, vector<64x1xf32>
    %c0_17 = arith.constant 0 : index
    %c0_18 = arith.constant 0 : index
    %22 = vector.load %arg21[%c0_17, %c0_18] : memref<64x4xf32, #tpu.memory_space<vmem>>, vector<64x1xf32>
    %cst_19 = arith.constant dense<0xFF800000> : vector<64xf32>
    %23 = vector.multi_reduction <maximumf>, %20, %cst_19 [1] : vector<64x64xf32> to vector<64xf32>
    %24 = vector.shape_cast %23 : vector<64xf32> to vector<64x1xf32>
    %25 = arith.maximumf %21, %24 : vector<64x1xf32>
    %26 = arith.subf %21, %25 : vector<64x1xf32>
    %27 = math.exp %26 : vector<64x1xf32>
    %28 = vector.broadcast %25 : vector<64x1xf32> to vector<64x64xf32>
    %29 = arith.subf %20, %28 : vector<64x64xf32>
    %30 = math.exp %29 : vector<64x64xf32>
    %31 = arith.mulf %27, %22 : vector<64x1xf32>
    %cst_20 = arith.constant dense<0.000000e+00> : vector<64xf32>
    %32 = vector.multi_reduction <add>, %30, %cst_20 [1] : vector<64x64xf32> to vector<64xf32>
    %33 = vector.shape_cast %32 : vector<64xf32> to vector<64x1xf32>
    %34 = arith.addf %31, %33 : vector<64x1xf32>
    %c0_21 = arith.constant 0 : index
    %c0_22 = arith.constant 0 : index
    %35 = vector.load %arg21[%c0_21, %c0_22] : memref<64x4xf32, #tpu.memory_space<vmem>>, vector<64x1xf32>
    tpu.vector_store %arg21[%c0_21, %c0_22], %34 {strides = array<i32>} : memref<64x4xf32, #tpu.memory_space<vmem>>, vector<64x1xf32>,
    %c0_23 = arith.constant 0 : index
    %c0_24 = arith.constant 0 : index
    %36 = vector.load %arg22[%c0_23, %c0_24] : memref<64x32xf32, #tpu.memory_space<vmem>>, vector<64x8xf32>
    %37 = vector.broadcast %27 : vector<64x1xf32> to vector<64x8xf32>
    %38 = arith.mulf %37, %36 : vector<64x8xf32>
    %39 = arith.truncf %30 : vector<64x64xf32> to vector<64x64xbf16>
    %cst_25 = arith.constant dense<0.000000e+00> : vector<64x8xf32>
    %40 = tpu.matmul %39, %19, %cst_25 {dimension_numbers = #tpu.dot_dimension_numbers<[1], [0], [0], [1], [0, 0, 1, 1], [], []>} : vector<64x64xbf16>, vector<64x8xbf16>, vector<64x8xf32> -> vector<64x8xf32>
    %41 = arith.addf %38, %40 : vector<64x8xf32>
    %c0_26 = arith.constant 0 : index
    %c0_27 = arith.constant 0 : index
    %42 = vector.load %arg22[%c0_26, %c0_27] : memref<64x32xf32, #tpu.memory_space<vmem>>, vector<64x8xf32>
    tpu.vector_store %arg22[%c0_26, %c0_27], %41 {strides = array<i32>} : memref<64x32xf32, #tpu.memory_space<vmem>>, vector<64x8xf32>,
    %c0_28 = arith.constant 0 : index
    %c0_29 = arith.constant 0 : index
    %43 = vector.load %arg20[%c0_28, %c0_29] : memref<64x4xf32, #tpu.memory_space<vmem>>, vector<64x1xf32>
    tpu.vector_store %arg20[%c0_28, %c0_29], %25 {strides = array<i32>} : memref<64x4xf32, #tpu.memory_space<vmem>>, vector<64x1xf32>,
    %c0_30 = arith.constant 0 : index
    %c8 = arith.constant 8 : index
    %44 = vector.load %arg19[%c0_30, %c8] : memref<64x32xbf16, #tpu.memory_space<vmem>>, vector<64x8xbf16>
    %45 = vector.extract_strided_slice %10 {offsets = [0, 8], sizes = [64, 8], strides = [1, 1]} : vector<64x32xbf16> to vector<64x8xbf16>
    %46 = vector.extract_strided_slice %16 {offsets = [0, 8], sizes = [64, 8], strides = [1, 1]} : vector<64x32xbf16> to vector<64x8xbf16>
    %cst_31 = arith.constant dense<0.000000e+00> : vector<64x64xf32>
    %47 = tpu.matmul %44, %45, %cst_31 {dimension_numbers = #tpu.dot_dimension_numbers<[1], [1], [0], [0], [0, 0, 1, 0], [], []>} : vector<64x8xbf16>, vector<64x8xbf16>, vector<64x64xf32> -> vector<64x64xf32>
    %c0_32 = arith.constant 0 : index
    %c1 = arith.constant 1 : index
    %48 = vector.load %arg20[%c0_32, %c1] : memref<64x4xf32, #tpu.memory_space<vmem>>, vector<64x1xf32>
    %c0_33 = arith.constant 0 : index
    %c1_34 = arith.constant 1 : index
    %49 = vector.load %arg21[%c0_33, %c1_34] : memref<64x4xf32, #tpu.memory_space<vmem>>, vector<64x1xf32>
    %cst_35 = arith.constant dense<0xFF800000> : vector<64xf32>
    %50 = vector.multi_reduction <maximumf>, %47, %cst_35 [1] : vector<64x64xf32> to vector<64xf32>
    %51 = vector.shape_cast %50 : vector<64xf32> to vector<64x1xf32>
    %52 = arith.maximumf %48, %51 : vector<64x1xf32>
    %53 = arith.subf %48, %52 : vector<64x1xf32>
    %54 = math.exp %53 : vector<64x1xf32>
    %55 = vector.broadcast %52 : vector<64x1xf32> to vector<64x64xf32>
    %56 = arith.subf %47, %55 : vector<64x64xf32>
    %57 = math.exp %56 : vector<64x64xf32>
    %58 = arith.mulf %54, %49 : vector<64x1xf32>
    %cst_36 = arith.constant dense<0.000000e+00> : vector<64xf32>
    %59 = vector.multi_reduction <add>, %57, %cst_36 [1] : vector<64x64xf32> to vector<64xf32>
    %60 = vector.shape_cast %59 : vector<64xf32> to vector<64x1xf32>
    %61 = arith.addf %58, %60 : vector<64x1xf32>
    %c0_37 = arith.constant 0 : index
    %c1_38 = arith.constant 1 : index
    %62 = vector.load %arg21[%c0_37, %c1_38] : memref<64x4xf32, #tpu.memory_space<vmem>>, vector<64x1xf32>
    tpu.vector_store %arg21[%c0_37, %c1_38], %61 {strides = array<i32>} : memref<64x4xf32, #tpu.memory_space<vmem>>, vector<64x1xf32>,
    %c0_39 = arith.constant 0 : index
    %c8_40 = arith.constant 8 : index
    %63 = vector.load %arg22[%c0_39, %c8_40] : memref<64x32xf32, #tpu.memory_space<vmem>>, vector<64x8xf32>
    %64 = vector.broadcast %54 : vector<64x1xf32> to vector<64x8xf32>
    %65 = arith.mulf %64, %63 : vector<64x8xf32>
    %66 = arith.truncf %57 : vector<64x64xf32> to vector<64x64xbf16>
    %cst_41 = arith.constant dense<0.000000e+00> : vector<64x8xf32>
    %67 = tpu.matmul %66, %46, %cst_41 {dimension_numbers = #tpu.dot_dimension_numbers<[1], [0], [0], [1], [0, 0, 1, 1], [], []>} : vector<64x64xbf16>, vector<64x8xbf16>, vector<64x8xf32> -> vector<64x8xf32>
    %68 = arith.addf %65, %67 : vector<64x8xf32>
    %c0_42 = arith.constant 0 : index
    %c8_43 = arith.constant 8 : index
    %69 = vector.load %arg22[%c0_42, %c8_43] : memref<64x32xf32, #tpu.memory_space<vmem>>, vector<64x8xf32>
    tpu.vector_store %arg22[%c0_42, %c8_43], %68 {strides = array<i32>} : memref<64x32xf32, #tpu.memory_space<vmem>>, vector<64x8xf32>,
    %c0_44 = arith.constant 0 : index
    %c1_45 = arith.constant 1 : index
    %70 = vector.load %arg20[%c0_44, %c1_45] : memref<64x4xf32, #tpu.memory_space<vmem>>, vector<64x1xf32>
    tpu.vector_store %arg20[%c0_44, %c1_45], %52 {strides = array<i32>} : memref<64x4xf32, #tpu.memory_space<vmem>>, vector<64x1xf32>,
    %c0_46 = arith.constant 0 : index
    %c16 = arith.constant 16 : index
    %71 = vector.load %arg19[%c0_46, %c16] : memref<64x32xbf16, #tpu.memory_space<vmem>>, vector<64x8xbf16>
    %72 = vector.extract_strided_slice %10 {offsets = [0, 16], sizes = [64, 8], strides = [1, 1]} : vector<64x32xbf16> to vector<64x8xbf16>
    %73 = vector.extract_strided_slice %16 {offsets = [0, 16], sizes = [64, 8], strides = [1, 1]} : vector<64x32xbf16> to vector<64x8xbf16>
    %cst_47 = arith.constant dense<0.000000e+00> : vector<64x64xf32>
    %74 = tpu.matmul %71, %72, %cst_47 {dimension_numbers = #tpu.dot_dimension_numbers<[1], [1], [0], [0], [0, 0, 1, 0], [], []>} : vector<64x8xbf16>, vector<64x8xbf16>, vector<64x64xf32> -> vector<64x64xf32>
    %c0_48 = arith.constant 0 : index
    %c2 = arith.constant 2 : index
    %75 = vector.load %arg20[%c0_48, %c2] : memref<64x4xf32, #tpu.memory_space<vmem>>, vector<64x1xf32>
    %c0_49 = arith.constant 0 : index
    %c2_50 = arith.constant 2 : index
    %76 = vector.load %arg21[%c0_49, %c2_50] : memref<64x4xf32, #tpu.memory_space<vmem>>, vector<64x1xf32>
    %cst_51 = arith.constant dense<0xFF800000> : vector<64xf32>
    %77 = vector.multi_reduction <maximumf>, %74, %cst_51 [1] : vector<64x64xf32> to vector<64xf32>
    %78 = vector.shape_cast %77 : vector<64xf32> to vector<64x1xf32>
    %79 = arith.maximumf %75, %78 : vector<64x1xf32>
    %80 = arith.subf %75, %79 : vector<64x1xf32>
    %81 = math.exp %80 : vector<64x1xf32>
    %82 = vector.broadcast %79 : vector<64x1xf32> to vector<64x64xf32>
    %83 = arith.subf %74, %82 : vector<64x64xf32>
    %84 = math.exp %83 : vector<64x64xf32>
    %85 = arith.mulf %81, %76 : vector<64x1xf32>
    %cst_52 = arith.constant dense<0.000000e+00> : vector<64xf32>
    %86 = vector.multi_reduction <add>, %84, %cst_52 [1] : vector<64x64xf32> to vector<64xf32>
    %87 = vector.shape_cast %86 : vector<64xf32> to vector<64x1xf32>
    %88 = arith.addf %85, %87 : vector<64x1xf32>
    %c0_53 = arith.constant 0 : index
    %c2_54 = arith.constant 2 : index
    %89 = vector.load %arg21[%c0_53, %c2_54] : memref<64x4xf32, #tpu.memory_space<vmem>>, vector<64x1xf32>
    tpu.vector_store %arg21[%c0_53, %c2_54], %88 {strides = array<i32>} : memref<64x4xf32, #tpu.memory_space<vmem>>, vector<64x1xf32>,
    %c0_55 = arith.constant 0 : index
    %c16_56 = arith.constant 16 : index
    %90 = vector.load %arg22[%c0_55, %c16_56] : memref<64x32xf32, #tpu.memory_space<vmem>>, vector<64x8xf32>
    %91 = vector.broadcast %81 : vector<64x1xf32> to vector<64x8xf32>
    %92 = arith.mulf %91, %90 : vector<64x8xf32>
    %93 = arith.truncf %84 : vector<64x64xf32> to vector<64x64xbf16>
    %cst_57 = arith.constant dense<0.000000e+00> : vector<64x8xf32>
    %94 = tpu.matmul %93, %73, %cst_57 {dimension_numbers = #tpu.dot_dimension_numbers<[1], [0], [0], [1], [0, 0, 1, 1], [], []>} : vector<64x64xbf16>, vector<64x8xbf16>, vector<64x8xf32> -> vector<64x8xf32>
    %95 = arith.addf %92, %94 : vector<64x8xf32>
    %c0_58 = arith.constant 0 : index
    %c16_59 = arith.constant 16 : index
    %96 = vector.load %arg22[%c0_58, %c16_59] : memref<64x32xf32, #tpu.memory_space<vmem>>, vector<64x8xf32>
    tpu.vector_store %arg22[%c0_58, %c16_59], %95 {strides = array<i32>} : memref<64x32xf32, #tpu.memory_space<vmem>>, vector<64x8xf32>,
    %c0_60 = arith.constant 0 : index
    %c2_61 = arith.constant 2 : index
    %97 = vector.load %arg20[%c0_60, %c2_61] : memref<64x4xf32, #tpu.memory_space<vmem>>, vector<64x1xf32>
    tpu.vector_store %arg20[%c0_60, %c2_61], %79 {strides = array<i32>} : memref<64x4xf32, #tpu.memory_space<vmem>>, vector<64x1xf32>,
    %c0_62 = arith.constant 0 : index
    %c24 = arith.constant 24 : index
    %98 = vector.load %arg19[%c0_62, %c24] : memref<64x32xbf16, #tpu.memory_space<vmem>>, vector<64x8xbf16>
    %99 = vector.extract_strided_slice %10 {offsets = [0, 24], sizes = [64, 8], strides = [1, 1]} : vector<64x32xbf16> to vector<64x8xbf16>
    %100 = vector.extract_strided_slice %16 {offsets = [0, 24], sizes = [64, 8], strides = [1, 1]} : vector<64x32xbf16> to vector<64x8xbf16>
    %cst_63 = arith.constant dense<0.000000e+00> : vector<64x64xf32>
    %101 = tpu.matmul %98, %99, %cst_63 {dimension_numbers = #tpu.dot_dimension_numbers<[1], [1], [0], [0], [0, 0, 1, 0], [], []>} : vector<64x8xbf16>, vector<64x8xbf16>, vector<64x64xf32> -> vector<64x64xf32>
    %c0_64 = arith.constant 0 : index
    %c3 = arith.constant 3 : index
    %102 = vector.load %arg20[%c0_64, %c3] : memref<64x4xf32, #tpu.memory_space<vmem>>, vector<64x1xf32>
    %c0_65 = arith.constant 0 : index
    %c3_66 = arith.constant 3 : index
    %103 = vector.load %arg21[%c0_65, %c3_66] : memref<64x4xf32, #tpu.memory_space<vmem>>, vector<64x1xf32>
    %cst_67 = arith.constant dense<0xFF800000> : vector<64xf32>
    %104 = vector.multi_reduction <maximumf>, %101, %cst_67 [1] : vector<64x64xf32> to vector<64xf32>
    %105 = vector.shape_cast %104 : vector<64xf32> to vector<64x1xf32>
    %106 = arith.maximumf %102, %105 : vector<64x1xf32>
    %107 = arith.subf %102, %106 : vector<64x1xf32>
    %108 = math.exp %107 : vector<64x1xf32>
    %109 = vector.broadcast %106 : vector<64x1xf32> to vector<64x64xf32>
    %110 = arith.subf %101, %109 : vector<64x64xf32>
    %111 = math.exp %110 : vector<64x64xf32>
    %112 = arith.mulf %108, %103 : vector<64x1xf32>
    %cst_68 = arith.constant dense<0.000000e+00> : vector<64xf32>
    %113 = vector.multi_reduction <add>, %111, %cst_68 [1] : vector<64x64xf32> to vector<64xf32>
    %114 = vector.shape_cast %113 : vector<64xf32> to vector<64x1xf32>
    %115 = arith.addf %112, %114 : vector<64x1xf32>
    %c0_69 = arith.constant 0 : index
    %c3_70 = arith.constant 3 : index
    %116 = vector.load %arg21[%c0_69, %c3_70] : memref<64x4xf32, #tpu.memory_space<vmem>>, vector<64x1xf32>
    tpu.vector_store %arg21[%c0_69, %c3_70], %115 {strides = array<i32>} : memref<64x4xf32, #tpu.memory_space<vmem>>, vector<64x1xf32>,
    %c0_71 = arith.constant 0 : index
    %c24_72 = arith.constant 24 : index
    %117 = vector.load %arg22[%c0_71, %c24_72] : memref<64x32xf32, #tpu.memory_space<vmem>>, vector<64x8xf32>
    %118 = vector.broadcast %108 : vector<64x1xf32> to vector<64x8xf32>
    %119 = arith.mulf %118, %117 : vector<64x8xf32>
    %120 = arith.truncf %111 : vector<64x64xf32> to vector<64x64xbf16>
    %cst_73 = arith.constant dense<0.000000e+00> : vector<64x8xf32>
    %121 = tpu.matmul %120, %100, %cst_73 {dimension_numbers = #tpu.dot_dimension_numbers<[1], [0], [0], [1], [0, 0, 1, 1], [], []>} : vector<64x64xbf16>, vector<64x8xbf16>, vector<64x8xf32> -> vector<64x8xf32>
    %122 = arith.addf %119, %121 : vector<64x8xf32>
    %c0_74 = arith.constant 0 : index
    %c24_75 = arith.constant 24 : index
    %123 = vector.load %arg22[%c0_74, %c24_75] : memref<64x32xf32, #tpu.memory_space<vmem>>, vector<64x8xf32>
    tpu.vector_store %arg22[%c0_74, %c24_75], %122 {strides = array<i32>} : memref<64x32xf32, #tpu.memory_space<vmem>>, vector<64x8xf32>,
    %c0_76 = arith.constant 0 : index
    %c3_77 = arith.constant 3 : index
    %124 = vector.load %arg20[%c0_76, %c3_77] : memref<64x4xf32, #tpu.memory_space<vmem>>, vector<64x1xf32>
    tpu.vector_store %arg20[%c0_76, %c3_77], %106 {strides = array<i32>} : memref<64x4xf32, #tpu.memory_space<vmem>>, vector<64x1xf32>,
    %c0_i32_78 = arith.constant 0 : i32
    %125 = arith.cmpi eq, %arg2, %c0_i32_78 : i32
    %126 = arith.extui %125 : i1 to i32
    %c0_i32_79 = arith.constant 0 : i32
    %127 = arith.cmpi ne, %126, %c0_i32_79 : i32
    scf.if %127 {
      %c0_80 = arith.constant 0 : index
      %c0_81 = arith.constant 0 : index
      %128 = vector.load %arg21[%c0_80, %c0_81] : memref<64x4xf32, #tpu.memory_space<vmem>>, vector<64x4xf32>
      %129 = tpu.reciprocal %128 {approx = true} : vector<64x4xf32> -> vector<64x4xf32>
      %c0_82 = arith.constant 0 : index
      %c0_83 = arith.constant 0 : index
      %130 = vector.load %arg22[%c0_82, %c0_83] : memref<64x32xf32, #tpu.memory_space<vmem>>, vector<64x8xf32>
      %131 = vector.extract_strided_slice %129 {offsets = [0, 0], sizes = [64, 1], strides = [1, 1]} : vector<64x4xf32> to vector<64x1xf32>
      %132 = vector.broadcast %131 : vector<64x1xf32> to vector<64x8xf32>
      %133 = arith.mulf %130, %132 : vector<64x8xf32>
      %c0_84 = arith.constant 0 : index
      %c0_85 = arith.constant 0 : index
      %134 = vector.load %arg22[%c0_84, %c0_85] : memref<64x32xf32, #tpu.memory_space<vmem>>, vector<64x8xf32>
      tpu.vector_store %arg22[%c0_84, %c0_85], %133 {strides = array<i32>} : memref<64x32xf32, #tpu.memory_space<vmem>>, vector<64x8xf32>,
      %c0_86 = arith.constant 0 : index
      %c8_87 = arith.constant 8 : index
      %135 = vector.load %arg22[%c0_86, %c8_87] : memref<64x32xf32, #tpu.memory_space<vmem>>, vector<64x8xf32>
      %136 = vector.extract_strided_slice %129 {offsets = [0, 1], sizes = [64, 1], strides = [1, 1]} : vector<64x4xf32> to vector<64x1xf32>
      %137 = vector.broadcast %136 : vector<64x1xf32> to vector<64x8xf32>
      %138 = arith.mulf %135, %137 : vector<64x8xf32>
      %c0_88 = arith.constant 0 : index
      %c8_89 = arith.constant 8 : index
      %139 = vector.load %arg22[%c0_88, %c8_89] : memref<64x32xf32, #tpu.memory_space<vmem>>, vector<64x8xf32>
      tpu.vector_store %arg22[%c0_88, %c8_89], %138 {strides = array<i32>} : memref<64x32xf32, #tpu.memory_space<vmem>>, vector<64x8xf32>,
      %c0_90 = arith.constant 0 : index
      %c16_91 = arith.constant 16 : index
      %140 = vector.load %arg22[%c0_90, %c16_91] : memref<64x32xf32, #tpu.memory_space<vmem>>, vector<64x8xf32>
      %141 = vector.extract_strided_slice %129 {offsets = [0, 2], sizes = [64, 1], strides = [1, 1]} : vector<64x4xf32> to vector<64x1xf32>
      %142 = vector.broadcast %141 : vector<64x1xf32> to vector<64x8xf32>
      %143 = arith.mulf %140, %142 : vector<64x8xf32>
      %c0_92 = arith.constant 0 : index
      %c16_93 = arith.constant 16 : index
      %144 = vector.load %arg22[%c0_92, %c16_93] : memref<64x32xf32, #tpu.memory_space<vmem>>, vector<64x8xf32>
      tpu.vector_store %arg22[%c0_92, %c16_93], %143 {strides = array<i32>} : memref<64x32xf32, #tpu.memory_space<vmem>>, vector<64x8xf32>,
      %c0_94 = arith.constant 0 : index
      %c24_95 = arith.constant 24 : index
      %145 = vector.load %arg22[%c0_94, %c24_95] : memref<64x32xf32, #tpu.memory_space<vmem>>, vector<64x8xf32>
      %146 = vector.extract_strided_slice %129 {offsets = [0, 3], sizes = [64, 1], strides = [1, 1]} : vector<64x4xf32> to vector<64x1xf32>
      %147 = vector.broadcast %146 : vector<64x1xf32> to vector<64x8xf32>
      %148 = arith.mulf %145, %147 : vector<64x8xf32>
      %c0_96 = arith.constant 0 : index
      %c24_97 = arith.constant 24 : index
      %149 = vector.load %arg22[%c0_96, %c24_97] : memref<64x32xf32, #tpu.memory_space<vmem>>, vector<64x8xf32>
      tpu.vector_store %arg22[%c0_96, %c24_97], %148 {strides = array<i32>} : memref<64x32xf32, #tpu.memory_space<vmem>>, vector<64x8xf32>,
      %c0_98 = arith.constant 0 : index
      %c0_99 = arith.constant 0 : index
      %150 = vector.load %arg22[%c0_98, %c0_99] : memref<64x32xf32, #tpu.memory_space<vmem>>, vector<64x32xf32>
      %151 = arith.truncf %150 : vector<64x32xf32> to vector<64x32xbf16>
      %c0_100 = arith.constant 0 : index
      %c0_101 = arith.constant 0 : index
      %152 = vector.load %arg11[%c0_100, %c0_101] : memref<32x32xbf16, #tpu.memory_space<vmem>>, vector<32x32xbf16>
      %cst_102 = arith.constant dense<0.000000e+00> : vector<64x32xf32>
      %153 = tpu.matmul %151, %152, %cst_102 {dimension_numbers = #tpu.dot_dimension_numbers<[1], [0], [0], [1], [0, 0, 1, 1], [], []>} : vector<64x32xbf16>, vector<32x32xbf16>, vector<64x32xf32> -> vector<64x32xf32>
      %c0_103 = arith.constant 0 : index
      %c0_104 = arith.constant 0 : index
      %154 = vector.load %arg12[%c0_103, %c0_104] : memref<1x32xf32, #tpu.memory_space<vmem>>, vector<1x32xf32>
      %155 = vector.broadcast %154 : vector<1x32xf32> to vector<64x32xf32>
      %156 = arith.addf %153, %155 : vector<64x32xf32>
      %c0_105 = arith.constant 0 : index
      %c0_106 = arith.constant 0 : index
      %c0_107 = arith.constant 0 : index
      %157 = vector.load %arg3[%c0_105, %c0_106, %c0_107] : memref<1x64x32xbf16, #tpu.memory_space<vmem>>, vector<1x64x32xbf16>
      %158 = vector.shape_cast %157 : vector<1x64x32xbf16> to vector<64x32xbf16>
      %c0_108 = arith.constant 0 : index
      %c0_109 = arith.constant 0 : index
      %159 = vector.load %arg13[%c0_108, %c0_109] : memref<32x64xbf16, #tpu.memory_space<vmem>>, vector<32x64xbf16>
      %cst_110 = arith.constant dense<0.000000e+00> : vector<64x64xf32>
      %160 = tpu.matmul %158, %159, %cst_110 {dimension_numbers = #tpu.dot_dimension_numbers<[1], [0], [0], [1], [0, 0, 1, 1], [], []>} : vector<64x32xbf16>, vector<32x64xbf16>, vector<64x64xf32> -> vector<64x64xf32>
      %161 = arith.truncf %156 : vector<64x32xf32> to vector<64x32xbf16>
      %c0_111 = arith.constant 0 : index
      %c0_112 = arith.constant 0 : index
      %162 = vector.load %arg14[%c0_111, %c0_112] : memref<32x64xbf16, #tpu.memory_space<vmem>>, vector<32x64xbf16>
      %cst_113 = arith.constant dense<0.000000e+00> : vector<64x64xf32>
      %163 = tpu.matmul %161, %162, %cst_113 {dimension_numbers = #tpu.dot_dimension_numbers<[1], [0], [0], [1], [0, 0, 1, 1], [], []>} : vector<64x32xbf16>, vector<32x64xbf16>, vector<64x64xf32> -> vector<64x64xf32>
      %164 = arith.addf %160, %163 : vector<64x64xf32>
      %c0_114 = arith.constant 0 : index
      %c0_115 = arith.constant 0 : index
      %165 = vector.load %arg15[%c0_114, %c0_115] : memref<1x64xf32, #tpu.memory_space<vmem>>, vector<1x64xf32>
      %166 = vector.broadcast %165 : vector<1x64xf32> to vector<64x64xf32>
      %167 = arith.addf %164, %166 : vector<64x64xf32>
      %168 = arith.truncf %167 : vector<64x64xf32> to vector<64x64xbf16>
      %c0_116 = arith.constant 0 : index
      %c0_117 = arith.constant 0 : index
      %c0_118 = arith.constant 0 : index
      %169 = vector.load %arg16[%c0_116, %c0_117, %c0_118] : memref<1x64x64xbf16, #tpu.memory_space<vmem>>, vector<1x64x64xbf16>
      %170 = vector.shape_cast %169 : vector<1x64x64xbf16> to vector<64x64xbf16>
      %171 = vector.shape_cast %168 : vector<64x64xbf16> to vector<1x64x64xbf16>
      tpu.vector_store %arg16[%c0_116, %c0_117, %c0_118], %171 {strides = array<i32>} : memref<1x64x64xbf16, #tpu.memory_space<vmem>>, vector<1x64x64xbf16>,
      %cst_119 = arith.constant dense<0.000000e+00> : vector<64xf32>
      %172 = vector.multi_reduction <add>, %167, %cst_119 [0] : vector<64x64xf32> to vector<64xf32>
      %173 = vector.shape_cast %172 : vector<64xf32> to vector<1x64xf32>
      %c0_120 = arith.constant 0 : index
      %c0_121 = arith.constant 0 : index
      %c0_122 = arith.constant 0 : index
      %174 = vector.load %arg17[%c0_120, %c0_121, %c0_122] : memref<1x1x64xf32, #tpu.memory_space<vmem>>, vector<1x1x64xf32>
      %175 = vector.shape_cast %174 : vector<1x1x64xf32> to vector<1x64xf32>
      %176 = vector.shape_cast %173 : vector<1x64xf32> to vector<1x1x64xf32>
      tpu.vector_store %arg17[%c0_120, %c0_121, %c0_122], %176 {strides = array<i32>} : memref<1x1x64xf32, #tpu.memory_space<vmem>>, vector<1x1x64xf32>,
      %177 = arith.mulf %167, %167 : vector<64x64xf32>
      %cst_123 = arith.constant dense<0.000000e+00> : vector<64xf32>
      %178 = vector.multi_reduction <add>, %177, %cst_123 [0] : vector<64x64xf32> to vector<64xf32>
      %179 = vector.shape_cast %178 : vector<64xf32> to vector<1x64xf32>
      %c0_124 = arith.constant 0 : index
      %c0_125 = arith.constant 0 : index
      %c0_126 = arith.constant 0 : index
      %180 = vector.load %arg18[%c0_124, %c0_125, %c0_126] : memref<1x1x64xf32, #tpu.memory_space<vmem>>, vector<1x1x64xf32>
      %181 = vector.shape_cast %180 : vector<1x1x64xf32> to vector<1x64xf32>
      %182 = vector.shape_cast %179 : vector<1x64xf32> to vector<1x1x64xf32>
      tpu.vector_store %arg18[%c0_124, %c0_125, %c0_126], %182 {strides = array<i32>} : memref<1x1x64xf32, #tpu.memory_space<vmem>>, vector<1x1x64xf32>,
    } else {
    }
    return
  }
  func.func @transform_0(%arg0: i32, %arg1: i32, %arg2: i32) -> (i32, i32, i32) {
    %c0_i32 = arith.constant 0 : i32
    %c0_i32_0 = arith.constant 0 : i32
    return %arg0, %arg1, %c0_i32 : i32, i32, i32
  }
  func.func @transform_1(%arg0: i32, %arg1: i32, %arg2: i32) -> (i32, i32, i32) {
    %c0_i32 = arith.constant 0 : i32
    %c0_i32_0 = arith.constant 0 : i32
    return %arg0, %arg2, %c0_i32 : i32, i32, i32
  }
  func.func @transform_2(%arg0: i32, %arg1: i32, %arg2: i32) -> (i32, i32) {
    %c0_i32 = arith.constant 0 : i32
    %c0_i32_0 = arith.constant 0 : i32
    %c0_i32_1 = arith.constant 0 : i32
    return %c0_i32, %c0_i32_0 : i32, i32
  }
  func.func @transform_3(%arg0: i32, %arg1: i32, %arg2: i32) -> (i32, i32) {
    %c0_i32 = arith.constant 0 : i32
    %c0_i32_0 = arith.constant 0 : i32
    %c0_i32_1 = arith.constant 0 : i32
    return %c0_i32, %c0_i32_0 : i32, i32
  }
  func.func @transform_4(%arg0: i32, %arg1: i32, %arg2: i32) -> (i32, i32) {
    %c0_i32 = arith.constant 0 : i32
    %c0_i32_0 = arith.constant 0 : i32
    %c0_i32_1 = arith.constant 0 : i32
    return %c0_i32, %c0_i32_0 : i32, i32
  }
  func.func @transform_5(%arg0: i32, %arg1: i32, %arg2: i32) -> (i32, i32) {
    %c0_i32 = arith.constant 0 : i32
    %c0_i32_0 = arith.constant 0 : i32
    %c0_i32_1 = arith.constant 0 : i32
    return %c0_i32, %c0_i32_0 : i32, i32
  }
  func.func @transform_6(%arg0: i32, %arg1: i32, %arg2: i32) -> (i32, i32) {
    %c0_i32 = arith.constant 0 : i32
    %c0_i32_0 = arith.constant 0 : i32
    %c0_i32_1 = arith.constant 0 : i32
    return %c0_i32, %c0_i32_0 : i32, i32
  }
  func.func @transform_7(%arg0: i32, %arg1: i32, %arg2: i32) -> (i32, i32) {
    %c0_i32 = arith.constant 0 : i32
    %c0_i32_0 = arith.constant 0 : i32
    %c0_i32_1 = arith.constant 0 : i32
    return %c0_i32, %c0_i32_0 : i32, i32
  }
  func.func @transform_8(%arg0: i32, %arg1: i32, %arg2: i32) -> (i32, i32) {
    %c0_i32 = arith.constant 0 : i32
    %c0_i32_0 = arith.constant 0 : i32
    %c0_i32_1 = arith.constant 0 : i32
    return %c0_i32, %c0_i32_0 : i32, i32
  }
  func.func @transform_9(%arg0: i32, %arg1: i32, %arg2: i32) -> (i32, i32) {
    %c0_i32 = arith.constant 0 : i32
    %c0_i32_0 = arith.constant 0 : i32
    %c0_i32_1 = arith.constant 0 : i32
    return %c0_i32, %c0_i32_0 : i32, i32
  }
  func.func @transform_10(%arg0: i32, %arg1: i32, %arg2: i32) -> (i32, i32) {
    %c0_i32 = arith.constant 0 : i32
    %c0_i32_0 = arith.constant 0 : i32
    %c0_i32_1 = arith.constant 0 : i32
    return %c0_i32, %c0_i32_0 : i32, i32
  }
  func.func @transform_11(%arg0: i32, %arg1: i32, %arg2: i32) -> (i32, i32) {
    %c0_i32 = arith.constant 0 : i32
    %c0_i32_0 = arith.constant 0 : i32
    %c0_i32_1 = arith.constant 0 : i32
    return %c0_i32, %c0_i32_0 : i32, i32
  }
  func.func @transform_12(%arg0: i32, %arg1: i32, %arg2: i32) -> (i32, i32) {
    %c0_i32 = arith.constant 0 : i32
    %c0_i32_0 = arith.constant 0 : i32
    %c0_i32_1 = arith.constant 0 : i32
    return %c0_i32, %c0_i32_0 : i32, i32
  }
  func.func @transform_13(%arg0: i32, %arg1: i32, %arg2: i32) -> (i32, i32, i32) {
    %c0_i32 = arith.constant 0 : i32
    %c0_i32_0 = arith.constant 0 : i32
    return %arg0, %arg1, %c0_i32 : i32, i32, i32
  }
  func.func @transform_14(%arg0: i32, %arg1: i32, %arg2: i32) -> (i32, i32, i32) {
    %c0_i32 = arith.constant 0 : i32
    %c0_i32_0 = arith.constant 0 : i32
    return %arg0, %arg1, %c0_i32 : i32, i32, i32
  }
  func.func @transform_15(%arg0: i32, %arg1: i32, %arg2: i32) -> (i32, i32, i32) {
    %c0_i32 = arith.constant 0 : i32
    %c0_i32_0 = arith.constant 0 : i32
    return %arg0, %arg1, %c0_i32 : i32, i32, i32
  }
}

</mosaic_0001>

<bundles_post_ra>
// kernel: tpu_custom_call.1
= control target key start
LH: loop header
LB: loop body
LE: loop exit
PB: predicated region body
PF: predicated region fallthrough
CT: control target
= control target key end

     0   :  { %s6572_s0 = inlined_call_operand.vmem [shape: bf16[2,64,32], index: 0, kind: input, shape index: {}]   ;;  %s6573_s1 = inlined_call_operand.vmem [shape: bf16[2,64,32], index: 1, kind: input, shape index: {}]   ;;  %s6574_s2 = inlined_call_operand.vmem [shape: bf16[32,32], index: 2, kind: input, shape index: {}]   ;;  %s6575_s3 = inlined_call_operand.vmem [shape: f32[1,32], index: 3, kind: input, shape index: {}]   ;;  %s6576_s4 = inlined_call_operand.vmem [shape: bf16[32,32], index: 4, kind: input, shape index: {}]   ;;  %s6577_s5 = inlined_call_operand.vmem [shape: f32[1,32], index: 5, kind: input, shape index: {}]   ;;  %s6578_s6 = inlined_call_operand.vmem [shape: bf16[32,32], index: 6, kind: input, shape index: {}]   ;;  %s6579_s7 = inlined_call_operand.vmem [shape: f32[1,32], index: 7, kind: input, shape index: {}]   ;;  %s6580_s8 = inlined_call_operand.vmem [shape: bf16[32,32], index: 8, kind: input, shape index: {}]   ;;  %s6581_s9 = inlined_call_operand.vmem [shape: f32[1,32], index: 9, kind: input, shape index: {}]   ;;  %s6582_s10 = inlined_call_operand.vmem [shape: bf16[32,64], index: 10, kind: input, shape index: {}]   ;;  %s6583_s11 = inlined_call_operand.vmem [shape: bf16[32,64], index: 11, kind: input, shape index: {}]   ;;  %s6584_s12 = inlined_call_operand.vmem [shape: f32[1,64], index: 12, kind: input, shape index: {}]   ;;  %s6585_s13 = inlined_call_operand.hbm [shape: bf16[2,64,64], index: 13, kind: output, shape index: {0}]   ;;  %s6586_s14 = inlined_call_operand.hbm [shape: f32[2,1,64], index: 14, kind: output, shape index: {1}]   ;;  %s6587_s15 = inlined_call_operand.hbm [shape: f32[2,1,64], index: 15, kind: output, shape index: {2}]  }
   0x1   :  { %6632 = sst [smem:[#allocation68_spill]] %s6572_s0 }
   0x2   :  { %6633 = sst [smem:[#allocation69_spill]] %s6573_s1 }
   0x3   :  { %6634 = sst [smem:[#allocation70_spill]] %s6574_s2 }
   0x4   :  { %6635 = sst [smem:[#allocation71_spill]] %s6575_s3 }
   0x5   :  { %21 = vsyncpa [#allocation7], 0 }
   0x6   :  { %23 = vsyncpa [#allocation7 + $0x1], 0 }
   0x7   :  { %24 = vsyncpa [#allocation9], 0 }
   0x8   :  { %26 = vsyncpa [#allocation9 + $0x1], 0  ;;  %s4944_s18 = smov 0   ;;  %s4946_s19 = smov 0  }
   0x9   :  { %s4948_s20 = smov 0   ;;  %s4950_s21 = smov 0  }
   0xa   :  { %s4952_s22 = smov 0   ;;  %s4954_s23 = smov 0  }
   0xb LB: > { %6636 = sst [smem:[#allocation13_spill]] %s4833_s20  ;;  %s6588_s24 = sadd.s32 4294967295, %s4845_s23   ;;  %s4845_s23 = sphi %s4954_s23, %s32_s23   ;;  %s4841_s22 = sphi %s4952_s22, %s6792_s22   ;;  %s4837_s21 = sphi %s4950_s21, %s6791_s21   ;;  %s4833_s20 = sphi %s4948_s20, %s6790_s20   ;;  %s4829_s19 = sphi %s4946_s19, %s6794_s19   ;;  %s4825_s18 = sphi %s4944_s18, %s6793_s18  }
   0xc   : > { %6637 = sst [smem:[#allocation14_spill]] %s4841_s22  ;;  %s6589_s25 = sadd.s32 4294967294, %s4845_s23  }
   0xd   : > { %s51_s26 = sadd.s32 1, %s4841_s22  ;;  %s347_s27 = sadd.s32 1, %s4833_s20 }
   0xe   : > { %p53_p0 = scmp.ge.s32.totalorder %s51_s26, 2  ;;  %p357_p1 = scmp.ne.s32.totalorder %s4833_s20, %s4829_s19 }
   0xf   : > { %p358_p2 = scmp.eq.s32.totalorder %s6588_s24, 1  ;;  %p363_p3 = scmp.ne.s32.totalorder %s4829_s19, %s4825_s18 }
  0x10   : > { %s6796_s26 = smov (%p53_p0, %s51_s26), 0  ;;  %p364_p5 = scmp.eq.s32.totalorder %s6589_s25, 1 }
  0x11   : > { %6638 = sst [smem:[#allocation15_spill]] %s6796_s26  ;;  %p4986_p4 = por %p358_p2, %p357_p1 }
  0x12   : > { %s342_s29 = ssub.s32 %s4841_s22, %s6796_s26  ;;  %p3958_p6 = scmp.ge.s32.totalorder %s4845_s23, 1 }
  0x13   : > { %p345_p7 = scmp.eq.s32.totalorder %s342_s29, 0  ;;  %p4995_p8 = por %p364_p5, %p363_p3 }
  0x14   : > { %p497_p9 = scmp.lt.s32.totalorder %s4845_s23, 3 }
  0x15   : > { %s6640_s30 = scalar_select %p4995_p8, 1, 0 }
  0x16   : > { %s5001_s16 = scalar_select %p345_p7, %s4833_s20, %s347_s27  }
  0x17   : > { %6641 = sst [smem:[#allocation16_spill]] %s6640_s30  ;;  %p498_p10 = pnand %p3958_p6, %p497_p9 }
  0x18   : > { %6642 = sst [smem:[#allocation17_spill]] %s5001_s16 }
  0x19   : > { %501 = sbr.rel (%p498_p10) target bundleno = 3274 (0xcca), region = 72 }
  0x1e   : > { %v4529_v0 = vld [vmem:[%s6576_s4 + $0x8] sm:$0xff]   ;;  %p567_p11 = scmp.lt.s32.totalorder %s4837_s21, 1  ;;  %v4530_v1 = vld [vmem:[%s6576_s4] sm:$0xff]   ;;  %s6643_s2 = sld [smem:[#allocation70_spill]]  ;;  %vm643_vm0 = vcmask 261120   ;;  %vm753_vm1 = vcmask 257024  }
  0x1f   : > { %4219 = vmatprep.subr.bf16.mxu1 %v4529_v0  ;;  %s6644_s1 = sld [smem:[#allocation69_spill]]  ;;  %v3983_v31 = vld [vmem:[%s6577_s5] ss:$0 sm:$0xff]  ;;  %vm1040_vm2 = vcmask 64512   ;;  %vm762_vm3 = vcmask 31744   ;;  %vm1146_vm4 = vcmask 523264  }
  0x20   : > { %s568_s29 = scalar_select %p567_p11, %s4837_s21, 1  ;;  %4220 = vmatpush3.bf16.msra.mxu1 %v4529_v0  ;;  %vm1307_vm5 = vcmask 7168   ;;  %vm1790_vm6 = vcmask 15368   ;;  %vm2318_vm7 = vcmask 23568   ;;  %vm2842_vm8 = vcmask 31768  }
  0x21   : > { %4221 = vmatprep.subr.bf16.mxu1 %v4530_v1  ;;  %s6645_s0 = sld [smem:[#allocation68_spill]]  ;;  %s4850_s16 = smov 120   ;;  %vm1992_vm9 = vcmask 130112   ;;  %vm2516_vm10 = vcmask 195712   ;;  %vm3040_vm11 = vcmask 261312   ;;  %vm3685_vm12 = vcmask 519168  }
  0x22   : > { %s4088_s24 = sshll.u32 %s568_s29, 5  ;;  %s6646_s3 = sld [smem:[#allocation71_spill]] }
  0x23   : > { %s4852_s29 = smov 112   ;;  %s4854_s27 = smov 104  }
  0x24   : > { %v4535_v2 = vld [vmem:[%s6643_s2 + $0x8] sm:$0xff]   ;;  %v4536_v3 = vld [vmem:[%s6643_s2] sm:$0xff]   ;;  %4222 = vmatpush3.bf16.msra.mxu1 %v4530_v1  ;;  %s4857_s17 = smov 16   ;;  %s4106_s22 = sshll.u32 %s4837_s21, 9 }
  0x25   : > { %4207 = vmatprep.subr.bf16.mxu0 %v4535_v2  ;;  %s584_s25 = scalar_lea.vmem %s6644_s1, %s4088_s24 }
  0x26   : > { %4208 = vmatpush3.bf16.msra.mxu0 %v4535_v2  ;;  %v4531_v4 = vld [vmem:[%s584_s25] sm:$0xff]   ;;  %v5025_v5 = vld [vmem:[%s584_s25 + $0x8] sm:$0xff]   ;;  %v5028_v6 = vld [vmem:[%s584_s25 + $0x10] sm:$0xff]  }
  0x27   : > { %4209 = vmatprep.subr.bf16.mxu0 %v4536_v3  ;;  %s5023_s30 = scalar_lea.vmem %s6645_s0, %s4088_s24  ;;  %4223 = vmatprep.mubr.msk.bf16.mxu1 %vm643_vm0, %v4531_v4  ;;  %v5038_v10 = vld [vmem:[%s584_s25 + $0x18] sm:$0xff]   ;;  %v4545_v2 = vld [vmem:[%s6578_s6 + $0x8] sm:$0xff]   ;;  %s4856_s24 = smov 8  }
  0x28   : > { %4224 = vmatmul.mubr.msk.bf16.vlgmr.msra.gmra.mxu1 %vm643_vm0, %v5025_v5  ;;  %v4537_v7 = vld [vmem:[%s5023_s30] sm:$0xff]   ;;  %v4538_v8 = vld [vmem:[%s5023_s30 + $0x8] sm:$0xff]   ;;  %v4539_v9 = vld [vmem:[%s5023_s30 + $0x10] sm:$0xff]   ;;  %s4858_s25 = smov 24  }
  0x29   : > { %4227 = vmatprep.mubr.msk.bf16.mxu1 %vm643_vm0, %v5028_v6  ;;  %4211 = vmatprep.mubr.msk.bf16.mxu0 %vm643_vm0, %v4537_v7  ;;  %v4540_v11 = vld [vmem:[%s5023_s30 + $0x18] sm:$0xff]   ;;  %v3964_v13 = vld [vmem:[%s6646_s3] ss:$0 sm:$0xff] }
  0x2a   : > { %4210 = vmatpush3.bf16.msra.mxu0 %v4536_v3  ;;  %v4546_v3 = vld [vmem:[%s6578_s6] sm:$0xff]  }
  0x2b   : > { %4231 = vmatprep.subr.bf16.mxu0 %v4545_v2 }
  0x2d   : > { %4212 = vmatmul.mubr.msk.bf16.vlgmr.msra.gmra.mxu0 %vm643_vm0, %v4538_v8 }
  0x2e   : > { %4215 = vmatprep.mubr.msk.bf16.mxu0 %vm643_vm0, %v4539_v9  ;;  %4232 = vmatpush3.bf16.msra.mxu0 %v4545_v2 }
  0x2f   : > { %4233 = vmatprep.subr.bf16.mxu0 %v4546_v3 }
  0x30   : > { %4228 = vmatmul.mubr.msk.bf16.gmra.mxu1 %vm643_vm0, %v5038_v10 }
  0x32   : > { %4234 = vmatpush3.bf16.msra.mxu0 %v4546_v3 }
  0x35   : > { %4216 = vmatmul.mubr.msk.bf16.gmra.mxu0 %vm643_vm0, %v4540_v11 }
  0x36   : > { %4235 = vmatprep.mubr.msk.bf16.mxu0 %vm643_vm0, %v4531_v4  ;;  %v4847_v4 = vmov -inf  }
  0x37   : > { %765 = vst.msk [vmem:[#allocation3 + $0x10] sm:$0xff] %vm762_vm3, %v4847_v4  ;;  %763 = vst.msk [vmem:[#allocation3] sm:$0xff] %vm762_vm3, %v4847_v4 }
  0x38   : > { %764 = vst.msk [vmem:[#allocation3 + $0x8] sm:$0xff] %vm762_vm3, %v4847_v4  ;;  %766 = vst.msk [vmem:[#allocation3 + $0x18] sm:$0xff] %vm762_vm3, %v4847_v4 }
  0x39   : > { %767 = vst.msk [vmem:[#allocation3 + $0x20] sm:$0xff] %vm762_vm3, %v4847_v4  ;;  %768 = vst.msk [vmem:[#allocation3 + $0x28] sm:$0xff] %vm762_vm3, %v4847_v4 }
  0x3a   : > { %769 = vst.msk [vmem:[#allocation3 + $0x30] sm:$0xff] %vm762_vm3, %v4847_v4  ;;  %770 = vst.msk [vmem:[#allocation3 + $0x38] sm:$0xff] %vm762_vm3, %v4847_v4 }
  0x3d   : > { %4236 = vmatmul.mubr.msk.bf16.vlgmr.msra.gmra.mxu0 %vm643_vm0, %v5025_v5 }
  0x3e   : > { %4239 = vmatprep.mubr.msk.bf16.mxu0 %vm643_vm0, %v5028_v6 }
  0x40   : > { %v5226_v4 = vld [vmem:[#allocation3 + $0x28] sm:$0xff] }
  0x41   : > { %v5224_v3 = vld [vmem:[#allocation3 + $0x30] sm:$0xff] }
  0x45   : > { %4240 = vmatmul.mubr.msk.bf16.gmra.mxu0 %vm643_vm0, %v5038_v10 }
  0xe8   : > { %v4225_v12 = vpop.f32.mrf.mxu1 }
  0xe9   : > { %v894_v55 = vadd.f32 %v4225_v12, %v3983_v31 }
  0xea   : > { %v885_v14 = vpop.f32.mrf.mxu1 }
  0xeb   : > { %v886_v59 = vadd.f32 %v3983_v31, %v885_v14 }
  0xec   : > { %v4226_v16 = vpop.f32.mrf.mxu1 }
  0xed   : > { %v4213_v15 = vpop.f32.mrf.mxu0  ;;  %v897_v53 = vadd.f32 %v4226_v16, %v3983_v31 }
  0xee   : > { %v699_v17 = vadd.f32 %v4213_v15, %v3964_v13  ;;  %v888_v19 = vpop.f32.mrf.mxu1 }
  0xef   : > { %v690_v18 = vpop.f32.mrf.mxu0  ;;  %v5074_v57 = vpack.c.bf16 %v897_v53, %v894_v55  ;;  %v889_v58 = vadd.f32 %v3983_v31, %v888_v19  ;;  %v5195_v55 = vld [vmem:[#allocation3 + $0x8] sm:$0xff] }
  0xf0   : > { %v4092_v20 = vpack.c.bf16 %v699_v17, %v699_v17  ;;  %v691_v21 = vadd.f32 %v3964_v13, %v690_v18  ;;  %v4229_v23 = vpop.f32.mrf.mxu1  ;;  %v6594_v17 = vmov 0  }
  0xf1   : > { %v4214_v22 = vpop.f32.mrf.mxu0  ;;  %v910_v35 = vadd.f32 %v4229_v23, %v3983_v31  ;;  %v5078_v60 = vpack.c.bf16 %v889_v58, %v886_v59  ;;  %v1057_v61 = vsel %vm1040_vm2, %v5074_v57, 0  ;;  %4503 = vset.pattern.permute.xlu1 %v6594_v17  ;;  %4502 = vset.pattern.permute.xlu0 %v6594_v17 }
  0xf2   : > { %756 = vst.msk [vmem:[#allocation2 + $0x8] sm:$0xf] %vm753_vm1, %v4092_v20  ;;  %v4090_v24 = vpack.c.bf16 %v691_v21, %v691_v21  ;;  %v702_v25 = vadd.f32 %v4214_v22, %v3964_v13  ;;  %v901_v27 = vpop.f32.mrf.mxu1  ;;  %v4849_v22 = vmov 0.0  }
  0xf3   : > { %v693_v26 = vpop.f32.mrf.mxu0  ;;  %v902_v41 = vadd.f32 %v3983_v31, %v901_v27  ;;  %v1054_v62 = vsel %vm1040_vm2, %v5078_v60, 0  ;;  %772 = vst.msk [vmem:[#allocation4 + $0x8] sm:$0xff] %vm762_vm3, %v4849_v22  ;;  %771 = vst.msk [vmem:[#allocation4] sm:$0xff] %vm762_vm3, %v4849_v22  ;;  %v3994_v27 = vld [vmem:[%s6579_s7] ss:$0 sm:$0xff] }
  0xf4   : > { %754 = vst.msk [vmem:[#allocation2] sm:$0xf] %vm753_vm1, %v4090_v24  ;;  %v4093_v28 = vpack.c.bf16 %v702_v25, %v702_v25  ;;  %v694_v29 = vadd.f32 %v3964_v13, %v693_v26  ;;  %v4230_v32 = vpop.f32.mrf.mxu1 }
  0xf5   : > { %v4217_v30 = vpop.f32.mrf.mxu0  ;;  %v913_v36 = vadd.f32 %v4230_v32, %v3983_v31  ;;  %773 = vst.msk [vmem:[#allocation4 + $0x10] sm:$0xff] %vm762_vm3, %v4849_v22  ;;  %774 = vst.msk [vmem:[#allocation4 + $0x18] sm:$0xff] %vm762_vm3, %v4849_v22 }
  0xf6   : > { %757 = vst.msk [vmem:[#allocation2 + $0xc] sm:$0xf] %vm753_vm1, %v4093_v28  ;;  %v4091_v33 = vpack.c.bf16 %v694_v29, %v694_v29  ;;  %v715_v34 = vadd.f32 %v4217_v30, %v3964_v13  ;;  %v904_v38 = vpop.f32.mrf.mxu1 }
  0xf7   : > { %v706_v37 = vpop.f32.mrf.mxu0  ;;  %v5057_v42 = vpack.c.bf16 %v913_v36, %v910_v35  ;;  %v905_v43 = vadd.f32 %v3983_v31, %v904_v38  ;;  %775 = vst.msk [vmem:[#allocation4 + $0x20] sm:$0xff] %vm762_vm3, %v4849_v22  ;;  %776 = vst.msk [vmem:[#allocation4 + $0x28] sm:$0xff] %vm762_vm3, %v4849_v22 }
  0xf8   : > { %755 = vst.msk [vmem:[#allocation2 + $0x4] sm:$0xf] %vm753_vm1, %v4091_v33  ;;  %v4096_v39 = vpack.c.bf16 %v715_v34, %v715_v34  ;;  %v707_v40 = vadd.f32 %v3964_v13, %v706_v37 }
  0xf9   : > { %v4218_v44 = vpop.f32.mrf.mxu0  ;;  %v5060_v47 = vpack.c.bf16 %v905_v43, %v902_v41  ;;  %4407 = vmatprep.subr.msk.bf16.mxu1 %vm1040_vm2, %v5057_v42  ;;  %v1063_v48 = vsel %vm1040_vm2, %v5057_v42, 0  ;;  %777 = vst.msk [vmem:[#allocation4 + $0x30] sm:$0xff] %vm762_vm3, %v4849_v22  ;;  %778 = vst.msk [vmem:[#allocation4 + $0x38] sm:$0xff] %vm762_vm3, %v4849_v22 }
  0xfa   : > { %760 = vst.msk [vmem:[#allocation2 + $0x18] sm:$0xf] %vm753_vm1, %v4096_v39  ;;  %v4094_v45 = vpack.c.bf16 %v707_v40, %v707_v40  ;;  %v718_v46 = vadd.f32 %v4218_v44, %v3964_v13  ;;  %4244 = vmatpush3.bf16.xpose.msra.mxu1 %v1063_v48  ;;  %v5180_v48 = vld [vmem:[#allocation3] sm:$0xff] }
  0xfb   : > { %v709_v49 = vpop.f32.mrf.mxu0  ;;  %4408 = vmatprep.subr.msk.bf16.mxu1 %vm1040_vm2, %v5060_v47  ;;  %v1060_v56 = vsel %vm1040_vm2, %v5060_v47, 0  ;;  %779 = vst.msk [vmem:[#allocation5] sm:$0xff] %vm643_vm0, %v4849_v22  ;;  %780 = vst.msk [vmem:[#allocation5 + $0x8] sm:$0xff] %vm643_vm0, %v4849_v22 }
  0xfc   : > { %758 = vst.msk [vmem:[#allocation2 + $0x10] sm:$0xf] %vm753_vm1, %v4094_v45  ;;  %v4097_v50 = vpack.c.bf16 %v718_v46, %v718_v46  ;;  %v710_v51 = vadd.f32 %v3964_v13, %v709_v49  ;;  %v5178_v45 = vld [vmem:[#allocation3 + $0x10] sm:$0xff] }
  0xfd   : > { %v4542_v0 = vld [vmem:[#allocation2 + $0x8] sm:$0xff]   ;;  %781 = vst.msk [vmem:[#allocation5 + $0x10] sm:$0xff] %vm643_vm0, %v4849_v22  ;;  %782 = vst.msk [vmem:[#allocation5 + $0x18] sm:$0xff] %vm643_vm0, %v4849_v22  ;;  %v4237_v23 = vpop.f32.mrf.mxu0 }
  0xfe   : > { %761 = vst.msk [vmem:[#allocation2 + $0x1c] sm:$0xf] %vm753_vm1, %v4097_v50  ;;  %v4095_v52 = vpack.c.bf16 %v710_v51, %v710_v51  ;;  %v986_v35 = vadd.f32 %v4237_v23, %v3994_v27  ;;  %v5185_v51 = vld [vmem:[#allocation3 + $0x18] sm:$0xff] }
  0xff   : > { %v4541_v54 = vld [vmem:[#allocation2] sm:$0xff]   ;;  %783 = vst.msk [vmem:[#allocation5 + $0x20] sm:$0xff] %vm643_vm0, %v4849_v22  ;;  %784 = vst.msk [vmem:[#allocation5 + $0x28] sm:$0xff] %vm643_vm0, %v4849_v22  ;;  %v977_v24 = vpop.f32.mrf.mxu0 }
 0x100   : > { %759 = vst.msk [vmem:[#allocation2 + $0x14] sm:$0xf] %vm753_vm1, %v4095_v52  ;;  %4251 = vmatprep.mubr.msk.bf16.mxu1 %vm1040_vm2, %v4541_v54  ;;  %v978_v40 = vadd.f32 %v3994_v27, %v977_v24 }
 0x101   : > { %785 = vst.msk [vmem:[#allocation5 + $0x30] sm:$0xff] %vm643_vm0, %v4849_v22  ;;  %786 = vst.msk [vmem:[#allocation5 + $0x38] sm:$0xff] %vm643_vm0, %v4849_v22  ;;  %v4238_v25 = vpop.f32.mrf.mxu0 }
 0x102   : > { %4246 = vmatpush3.bf16.xpose.msra.mxu1 %v1060_v56  ;;  %v989_v36 = vadd.f32 %v4238_v25, %v3994_v27 }
 0x103   : > { %4409 = vmatprep.subr.msk.bf16.mxu1 %vm1040_vm2, %v5074_v57  ;;  %v980_v26 = vpop.f32.mrf.mxu0 }
 0x104   : > { %v5168_v41 = vpack.c.bf16 %v989_v36, %v986_v35  ;;  %v981_v43 = vadd.f32 %v3994_v27, %v980_v26 }
 0x105   : > { %v4544_v1 = vld [vmem:[#allocation2 + $0x18] sm:$0xff]   ;;  %v4241_v28 = vpop.f32.mrf.mxu0 }
 0x106   : > { %v1002_v30 = vadd.f32 %v4241_v28, %v3994_v27  ;;  %v5172_v44 = vpack.c.bf16 %v981_v43, %v978_v40  ;;  %v4548_v25 = vld [vmem:[#allocation2 + $0x18] sm:$0xff]  }
 0x107   : > { %v4543_v63 = vld [vmem:[#allocation2 + $0x10] sm:$0xff]   ;;  %v993_v29 = vpop.f32.mrf.mxu0 }
 0x108   : > { %v994_v32 = vadd.f32 %v3994_v27, %v993_v29  ;;  %v4550_v28 = vld [vmem:[#allocation2 + $0x10] sm:$0xff]  }
 0x109   : > { %v4242_v31 = vpop.f32.mrf.mxu0 }
 0x10a   : > { %4248 = vmatpush3.bf16.xpose.msra.mxu1 %v1057_v61  ;;  %v1005_v33 = vadd.f32 %v4242_v31, %v3994_v27 }
 0x10b   : > { %4410 = vmatprep.subr.msk.bf16.mxu1 %vm1040_vm2, %v5078_v60  ;;  %v996_v34 = vpop.f32.mrf.mxu0 }
 0x10c   : > { %v5162_v37 = vpack.c.bf16 %v1005_v33, %v1002_v30  ;;  %v997_v38 = vadd.f32 %v3994_v27, %v996_v34  ;;  %v4549_v27 = vld [vmem:[#allocation2] sm:$0xff]  }
 0x10e   : > { %v5164_v39 = vpack.c.bf16 %v997_v38, %v994_v32  ;;  %4259 = vmatprep.subr.bf16.mxu0 %v5162_v37 }
 0x10f   : > { %4260 = vmatpush3.bf16.msra.mxu0 %v5162_v37 }
 0x110   : > { %4261 = vmatprep.subr.bf16.mxu0 %v5164_v39 }
 0x112   : > { %4250 = vmatpush3.bf16.xpose.msra.mxu1 %v1054_v62 }
 0x113   : > { %4262 = vmatpush3.bf16.msra.mxu0 %v5164_v39 }
 0x114   : > { %4263 = vmatprep.subr.bf16.mxu0 %v5168_v41 }
 0x117   : > { %4264 = vmatpush3.bf16.msra.mxu0 %v5168_v41 }
 0x118   : > { %4265 = vmatprep.subr.bf16.mxu0 %v5172_v44 }
 0x119   : > { %4252 = vmatmul.mubr.msk.bf16.vlgmr.msra.gmra.mxu1 %vm1040_vm2, %v4542_v0  ;;  %v4553_v0 = vld [vmem:[#allocation2] sm:$0xff]  }
 0x11a   : > { %4255 = vmatprep.mubr.msk.bf16.mxu1 %vm1040_vm2, %v4543_v63  ;;  %v5212_v63 = vld [vmem:[#allocation3 + $0x20] sm:$0xff] }
 0x11b   : > { %4266 = vmatpush3.bf16.msra.mxu0 %v5172_v44 }
 0x121   : > { %4256 = vmatmul.mubr.msk.bf16.gmra.mxu1 %vm1040_vm2, %v4544_v1 }
 0x1d9   : > { %v5109_v7 = vpop.f32.mrf.mxu1 }
 0x1da   : > { %v1153_v8 = vsel %vm1146_vm4, %v5109_v7, -inf }
 0x1db   : > { %1154 = vmax.xlane.f32.xlu1 %v1153_v8  ;;  %v5113_v9 = vpop.f32.mrf.mxu1 }
 0x1dc   : > { %v1147_v11 = vsel %vm1146_vm4, %v5113_v9, -inf }
 0x1dd   : > { %1148 = vmax.xlane.f32.xlu0 %v1147_v11  ;;  %v5117_v5 = vpop.f32.mrf.mxu1 }
 0x1de   : > { %v1156_v6 = vsel %vm1146_vm4, %v5117_v5, -inf }
 0x1df   : > { %1157 = vmax.xlane.f32.xlu1 %v1156_v6  ;;  %v5121_v10 = vpop.f32.mrf.mxu1 }
 0x1e0   : > { %v1150_v12 = vsel %vm1146_vm4, %v5121_v10, -inf }
 0x1e1   : > { %1151 = vmax.xlane.f32.xlu0 %v1150_v12  ;;  %v5125_v13 = vpop.f32.mrf.mxu1 }
 0x1e2   : > { %v1165_v19 = vsel %vm1146_vm4, %v5125_v13, -inf }
 0x1e3   : > { %v5127_v14 = vpop.f32.mrf.mxu1 }
 0x1e4   : > { %v1159_v15 = vsel %vm1146_vm4, %v5127_v14, -inf }
 0x1e5   : > { %1160 = vmax.xlane.f32.xlu0 %v1159_v15  ;;  %v5131_v16 = vpop.f32.mrf.mxu1 }
 0x1e6   : > { %v1168_v21 = vsel %vm1146_vm4, %v5131_v16, -inf }
 0x1e7   : > { %v5135_v18 = vpop.f32.mrf.mxu1 }
 0x1e8   : > { %v1162_v20 = vsel %vm1146_vm4, %v5135_v18, -inf }
 0x1e9   : > { %1166 = vmax.xlane.f32.xlu0 %v1165_v19  ;;  %1163 = vmax.xlane.f32.xlu1 %v1162_v20  ;;  %v4547_v19 = vld [vmem:[#allocation2 + $0x8] sm:$0xff]   ;;  %v5241_v20 = vld [vmem:[#allocation3 + $0x38] sm:$0xff] }
 0x1ed   : > { %1169 = vmax.xlane.f32.xlu1 %v1168_v21 }
 0x264   : > { %v1155_v46 = vpop.xlane.xlu1 %1154 }
 0x265   : > { %v5183_v49 = vmax.f32 %v5178_v45, %v1155_v46 }
 0x266   : > { %v1149_v50 = vpop.xlane.xlu0 %1148 }
 0x267   : > { %1471 = vst.msk [vmem:[#allocation3 + $0x10] sm:$0xff] %vm1307_vm5, %v5183_v49  ;;  %v5192_v53 = vmax.f32 %v5180_v48, %v1149_v50  ;;  %1215 = vperm.xlu1 %4503, %v5183_v49  }
 0x268   : > { %v1158_v54 = vpop.xlane.xlu1 %1157 }
 0x269   : > { %1469 = vst.msk [vmem:[#allocation3] sm:$0xff] %vm1307_vm5, %v5192_v53  ;;  %v5202_v58 = vmax.f32 %v5185_v51, %v1158_v54  ;;  %1205 = vperm.xlu0 %4502, %v5192_v53  }
 0x26a   : > { %v1152_v59 = vpop.xlane.xlu0 %1151 }
 0x26b   : > { %1472 = vst.msk [vmem:[#allocation3 + $0x18] sm:$0xff] %vm1307_vm5, %v5202_v58  ;;  %v5210_v62 = vmax.f32 %v5195_v55, %v1152_v59 }
 0x26d   : > { %1470 = vst.msk [vmem:[#allocation3 + $0x8] sm:$0xff] %vm1307_vm5, %v5210_v62  ;;  %1521 = vrot.lane.b32.xlu0 %v5060_v47, %s4850_s16  ;;  %1210 = vperm.xlu1 %4503, %v5210_v62  }
 0x26e   : > { %v1161_v1 = vpop.xlane.xlu0 %1160  ;;  %v5396_v61 = vld [vmem:[#allocation3 + $0x10] sm:$0xff] }
 0x26f   : > { %v5222_v2 = vmax.f32 %v5212_v63, %v1161_v1  ;;  %6657 = vst [vmem:[#allocation28_spill] sm:$0xff] %v5396_v61 }
 0x271   : > { %1473 = vst.msk [vmem:[#allocation3 + $0x20] sm:$0xff] %vm1307_vm5, %v5222_v2  ;;  %1517 = vrot.lane.b32.xlu0 %v5078_v60, %s4850_s16  ;;  %1220 = vperm.xlu1 %4503, %v5202_v58  }
 0x272   : > { %v1167_v11 = vpop.xlane.xlu0 %1166  ;;  %v1164_v6 = vpop.xlane.xlu1 %1163 }
 0x273   : > { %v5236_v12 = vmax.f32 %v5224_v3, %v1167_v11  ;;  %v5239_v15 = vmax.f32 %v5226_v4, %v1164_v6 }
 0x275   : > { %1475 = vst.msk [vmem:[#allocation3 + $0x30] sm:$0xff] %vm1307_vm5, %v5236_v12  ;;  %1474 = vst.msk [vmem:[#allocation3 + $0x28] sm:$0xff] %vm1307_vm5, %v5239_v15  ;;  %1507 = vrot.lane.b32.xlu0 %v4547_v19, %s4850_s16  ;;  %1235 = vperm.xlu1 %4503, %v5236_v12  }
 0x276   : > { %v1170_v23 = vpop.xlane.xlu1 %1169 }
 0x277   : > { %v5254_v24 = vmax.f32 %v5241_v20, %v1170_v23 }
 0x278   : > { %v5406_v21 = vld [vmem:[#allocation3 + $0x20] sm:$0xff] }
 0x279   : > { %1476 = vst.msk [vmem:[#allocation3 + $0x38] sm:$0xff] %vm1307_vm5, %v5254_v24  ;;  %1511 = vrot.lane.b32.xlu0 %v4548_v25, %s4850_s16  ;;  %1225 = vperm.xlu1 %4503, %v5222_v2   ;;  %6659 = vst [vmem:[#allocation30_spill] sm:$0xff] %v5406_v21 }
 0x27c   : > { %v5408_v52 = vld [vmem:[#allocation3 + $0x28] sm:$0xff] }
 0x27d   : > { %1240 = vperm.xlu1 %4503, %v5254_v24  }
 0x281   : > { %1230 = vperm.xlu1 %4503, %v5239_v15  }
 0x285   : > { %1523 = vrot.lane.b32.xlu1 %v5057_v42, %s4850_s16 }
 0x289   : > { %1519 = vrot.lane.b32.xlu1 %v5074_v57, %s4850_s16 }
 0x28d   : > { %1505 = vrot.lane.b32.xlu1 %v4549_v27, %s4850_s16 }
 0x291   : > { %1509 = vrot.lane.b32.xlu1 %v4550_v28, %s4850_s16 }
 0x2e2   : > { %v1216_v29 = vpop.permute.xlu1 %1215 }
 0x2e3   : > { %v1245_v32 = vsub.f32 %v5109_v7, %v1216_v29 }
 0x2e4   : > { %v1206_v30 = vpop.permute.xlu0 %1205 }
 0x2e5   : > { %v1243_v31 = vsub.f32 %v5113_v9, %v1206_v30  ;;  %v1255_v38 = vmul.f32 1.442695, %v1245_v32 }
 0x2e7   : > { %v1251_v33 = vmul.f32 1.442695, %v1243_v31 }
 0x2e8   : > { %v1211_v34 = vpop.permute.xlu1 %1210 }
 0x2e9   : > { %v1244_v35 = vsub.f32 %v5121_v10, %v1211_v34  ;;  %4569 = vpow2.f32 %v1251_v33 }
 0x2eb   : > { %v1253_v36 = vmul.f32 1.442695, %v1244_v35 }
 0x2ec   : > { %v1221_v40 = vpop.permute.xlu1 %1220 }
 0x2ed   : > { %4571 = vpow2.f32 %v1253_v36  ;;  %v1246_v43 = vsub.f32 %v5117_v5, %v1221_v40 }
 0x2ee   : > { %4573 = vpow2.f32 %v1255_v38 }
 0x2ef   : > { %v1257_v46 = vmul.f32 1.442695, %v1246_v43 }
 0x2f0   : > { %v1236_v50 = vpop.permute.xlu1 %1235 }
 0x2f1   : > { %4575 = vpow2.f32 %v1257_v46  ;;  %v1249_v11 = vsub.f32 %v5125_v13, %v1236_v50 }
 0x2f3   : > { %v1263_v28 = vmul.f32 1.442695, %v1249_v11 }
 0x2f4   : > { %v1226_v54 = vpop.permute.xlu1 %1225 }
 0x2f5   : > { %v1247_v9 = vsub.f32 %v5127_v14, %v1226_v54 }
 0x2f6   : > { %v5275_v7 = vpop.eup %4569 }
 0x2f7   : > { %v1259_v6 = vmul.f32 1.442695, %v1247_v9 }
 0x2f8   : > { %v1241_v59 = vpop.permute.xlu1 %1240 }
 0x2f9   : > { %v1250_v1 = vsub.f32 %v5131_v16, %v1241_v59  ;;  %4577 = vpow2.f32 %v1259_v6 }
 0x2fa   : > { %v5278_v10 = vpop.eup %4571 }
 0x2fb   : > { %v1372_v5 = vpack.c.bf16 %v5278_v10, %v5275_v7  ;;  %v1265_v19 = vmul.f32 1.442695, %v1250_v1  ;;  %v5283_v25 = vpop.eup %4573 }
 0x2fc   : > { %v1231_v23 = vpop.permute.xlu1 %1230 }
 0x2fd   : > { %v1248_v27 = vsub.f32 %v5135_v18, %v1231_v23  ;;  %4267 = vmatprep.mubr.msk.bf16.mxu0 %vm1146_vm4, %v1372_v5  ;;  %4579 = vpow2.f32 %v1265_v19  ;;  %v1522_v18 = vpop.permute.xlu0 %1521 }
 0x2fe   : > { %v5287_v14 = vpop.eup %4575  ;;  %v1544_v31 = vsel %vm1040_vm2, %v1522_v18, 0 }
 0x2ff   : > { %v1373_v16 = vpack.c.bf16 %v5287_v14, %v5283_v25  ;;  %v1261_v13 = vmul.f32 1.442695, %v1248_v27 }
 0x300   : > { %v1524_v29 = vpop.permute.xlu1 %1523 }
 0x301   : > { %4581 = vpow2.f32 %v1261_v13  ;;  %4268 = vmatmul.mubr.msk.bf16.vlgmr.msra.gmra.mxu0 %vm1146_vm4, %v1373_v16  ;;  %4411 = vmatprep.subr.msk.bf16.mxu0 %vm1040_vm2, %v1524_v29  ;;  %v1547_v30 = vsel %vm1040_vm2, %v1524_v29, 0  ;;  %v1518_v50 = vpop.permute.xlu0 %1517 }
 0x302   : > { %4583 = vpow2.f32 %v1263_v28  ;;  %4276 = vmatpush3.bf16.xpose.msra.mxu0 %v1547_v30  ;;  %v1538_v54 = vsel %vm1040_vm2, %v1518_v50, 0 }
 0x303   : > { %4412 = vmatprep.subr.msk.bf16.mxu0 %vm1040_vm2, %v1522_v18 }
 0x304   : > { %v1520_v32 = vpop.permute.xlu1 %1519 }
 0x305   : > { %v1541_v46 = vsel %vm1040_vm2, %v1520_v32, 0  ;;  %v1508_v9 = vpop.permute.xlu0 %1507 }
 0x306   : > { %v5297_v33 = vpop.eup %4577 }
 0x308   : > { %v1506_v43 = vpop.permute.xlu1 %1505 }
 0x309   : > { %v1512_v1 = vpop.permute.xlu0 %1511 }
 0x30a   : > { %4278 = vmatpush3.bf16.xpose.msra.mxu0 %v1544_v31  ;;  %v5299_v34 = vpop.eup %4579 }
 0x30b   : > { %4413 = vmatprep.subr.msk.bf16.mxu0 %vm1040_vm2, %v1520_v32 }
 0x30c   : > { %v1510_v59 = vpop.permute.xlu1 %1509 }
 0x30e   : > { %v5301_v35 = vpop.eup %4581 }
 0x30f   : > { %v5303_v36 = vpop.eup %4583  ;;  %v1374_v38 = vpack.c.bf16 %v5301_v35, %v5297_v33 }
 0x310   : > { %v1375_v40 = vpack.c.bf16 %v5299_v34, %v5303_v36 }
 0x311   : > { %4271 = vmatprep.mubr.msk.bf16.mxu0 %vm1146_vm4, %v1374_v38 }
 0x312   : > { %4272 = vmatmul.mubr.msk.bf16.gmra.mxu0 %vm1146_vm4, %v1375_v40 }
 0x313   : > { %4280 = vmatpush3.bf16.xpose.msra.mxu0 %v1541_v46  ;;  %4283 = vmatprep.mubr.msk.bf16.mxu0 %vm1040_vm2, %v1506_v43 }
 0x314   : > { %4414 = vmatprep.subr.msk.bf16.mxu0 %vm1040_vm2, %v1518_v50 }
 0x31b   : > { %4282 = vmatpush3.bf16.xpose.msra.mxu0 %v1538_v54 }
 0x322   : > { %4284 = vmatmul.mubr.msk.bf16.vlgmr.msra.gmra.mxu0 %vm1040_vm2, %v1508_v9 }
 0x323   : > { %4287 = vmatprep.mubr.msk.bf16.mxu0 %vm1040_vm2, %v1510_v59 }
 0x32a   : > { %4288 = vmatmul.mubr.msk.bf16.gmra.mxu0 %vm1040_vm2, %v1512_v1  ;;  %v6596_v1 = vmov 1  }
 0x32b   : > { %4504 = vset.pattern.permute.xlu0 %v6596_v1  ;;  %4505 = vset.pattern.permute.xlu1 %v6596_v1 }
 0x3c1   : > { %v5318_v11 = vpop.f32.mrf.mxu0 }
 0x3c2   : > { %6647 = vst [vmem:[#allocation18_spill] sm:$0xff] %v5318_v11 }
 0x3c3   : > { %v5320_v6 = vpop.f32.mrf.mxu0 }
 0x3c4   : > { %6648 = vst [vmem:[#allocation19_spill] sm:$0xff] %v5320_v6  ;;  %v5428_v6 = vld [vmem:[#allocation3 + $0x38] sm:$0xff] }
 0x3c5   : > { %v5322_v5 = vpop.f32.mrf.mxu0  ;;  %6662 = vst [vmem:[#allocation33_spill] sm:$0xff] %v5428_v6 }
 0x3c6   : > { %6649 = vst [vmem:[#allocation20_spill] sm:$0xff] %v5322_v5 }
 0x3c7   : > { %v5324_v19 = vpop.f32.mrf.mxu0 }
 0x3c8   : > { %6650 = vst [vmem:[#allocation21_spill] sm:$0xff] %v5324_v19 }
 0x3d2   : > { %v5326_v23 = vpop.f32.mrf.mxu0 }
 0x3d3   : > { %6651 = vst [vmem:[#allocation22_spill] sm:$0xff] %v5326_v23 }
 0x3d4   : > { %v5328_v27 = vpop.f32.mrf.mxu0 }
 0x3d5   : > { %6652 = vst [vmem:[#allocation23_spill] sm:$0xff] %v5328_v27 }
 0x3d6   : > { %v5330_v28 = vpop.f32.mrf.mxu0 }
 0x3d7   : > { %6653 = vst [vmem:[#allocation24_spill] sm:$0xff] %v5330_v28 }
 0x3d8   : > { %v5332_v16 = vpop.f32.mrf.mxu0 }
 0x3d9   : > { %6654 = vst [vmem:[#allocation25_spill] sm:$0xff] %v5332_v16 }
 0x3e2   : > { %v5334_v13 = vpop.f32.mrf.mxu0 }
 0x3e3   : > { %v1636_v46 = vsel %vm1146_vm4, %v5334_v13, -inf }
 0x3e4   : > { %v5336_v29 = vpop.f32.mrf.mxu0 }
 0x3e5   : > { %v1630_v30 = vsel %vm1146_vm4, %v5336_v29, -inf }
 0x3e6   : > { %1631 = vmax.xlane.f32.xlu1 %v1630_v30  ;;  %v5340_v18 = vpop.f32.mrf.mxu0 }
 0x3e7   : > { %v1639_v32 = vsel %vm1146_vm4, %v5340_v18, -inf }
 0x3e8   : > { %v5342_v31 = vpop.f32.mrf.mxu0 }
 0x3e9   : > { %v1633_v38 = vsel %vm1146_vm4, %v5342_v31, -inf }
 0x3ea   : > { %1640 = vmax.xlane.f32.xlu1 %v1639_v32  ;;  %1634 = vmax.xlane.f32.xlu0 %v1633_v38  ;;  %v5348_v40 = vpop.f32.mrf.mxu0  ;;  %v5368_v38 = vld [vmem:[#allocation3] sm:$0xff] }
 0x3eb   : > { %v1648_v30 = vsel %vm1146_vm4, %v5348_v40, -inf }
 0x3ec   : > { %v5350_v43 = vpop.f32.mrf.mxu0 }
 0x3ed   : > { %v1642_v9 = vsel %vm1146_vm4, %v5350_v43, -inf }
 0x3ee   : > { %1637 = vmax.xlane.f32.xlu0 %v1636_v46  ;;  %v5354_v50 = vpop.f32.mrf.mxu0 }
 0x3ef   : > { %v1651_v32 = vsel %vm1146_vm4, %v5354_v50, -inf }
 0x3f0   : > { %v5356_v54 = vpop.f32.mrf.mxu0 }
 0x3f1   : > { %v1645_v59 = vsel %vm1146_vm4, %v5356_v54, -inf }
 0x3f2   : > { %1643 = vmax.xlane.f32.xlu0 %v1642_v9  ;;  %1646 = vmax.xlane.f32.xlu1 %v1645_v59  ;;  %v5378_v9 = vld [vmem:[#allocation3 + $0x8] sm:$0xff] }
 0x3f6   : > { %1649 = vmax.xlane.f32.xlu0 %v1648_v30  ;;  %1652 = vmax.xlane.f32.xlu1 %v1651_v32  ;;  %v5380_v30 = vld [vmem:[#allocation3 + $0x18] sm:$0xff] }
 0x3f7   : > { %6655 = vst [vmem:[#allocation26_spill] sm:$0xff] %v5380_v30 }
 0x46f   : > { %v1632_v46 = vpop.xlane.xlu1 %1631 }
 0x470   : > { %v5371_v17 = vmax.f32 %v5368_v38, %v1632_v46 }
 0x472   : > { %2001 = vst.msk [vmem:[#allocation3] sm:$0xff] %vm1790_vm6, %v5371_v17  ;;  %1688 = vperm.xlu0 %4504, %v5371_v17  }
 0x473   : > { %v1635_v59 = vpop.xlane.xlu0 %1634  ;;  %v1641_v32 = vpop.xlane.xlu1 %1640 }
 0x474   : > { %v5383_v1 = vmax.f32 %v5378_v9, %v1635_v59  ;;  %v5386_v46 = vmax.f32 %v5380_v30, %v1641_v32 }
 0x476   : > { %6656 = vst [vmem:[#allocation27_spill] sm:$0xff] %v5386_v46  ;;  %2002 = vst.msk [vmem:[#allocation3 + $0x8] sm:$0xff] %vm1790_vm6, %v5383_v1 }
 0x477   : > { %2004 = vst.msk [vmem:[#allocation3 + $0x18] sm:$0xff] %vm1790_vm6, %v5386_v46  ;;  %v1638_v26 = vpop.xlane.xlu0 %1637 }
 0x478   : > { %v5399_v59 = vmax.f32 %v5396_v61, %v1638_v26 }
 0x47a   : > { %6658 = vst [vmem:[#allocation29_spill] sm:$0xff] %v5399_v59  ;;  %2003 = vst.msk [vmem:[#allocation3 + $0x10] sm:$0xff] %vm1790_vm6, %v5399_v59  ;;  %1698 = vperm.xlu1 %4505, %v5399_v59  }
 0x47b   : > { %v1644_v8 = vpop.xlane.xlu0 %1643  ;;  %v1647_v22 = vpop.xlane.xlu1 %1646 }
 0x47c   : > { %v5411_v56 = vmax.f32 %v5406_v21, %v1644_v8  ;;  %v5414_v26 = vmax.f32 %v5408_v52, %v1647_v22  ;;  %v5426_v8 = vld [vmem:[#allocation3 + $0x30] sm:$0xff] }
 0x47d   : > { %6661 = vst [vmem:[#allocation32_spill] sm:$0xff] %v5426_v8 }
 0x47e   : > { %6660 = vst [vmem:[#allocation31_spill] sm:$0xff] %v5411_v56  ;;  %2005 = vst.msk [vmem:[#allocation3 + $0x20] sm:$0xff] %vm1790_vm6, %v5411_v56  ;;  %1703 = vperm.xlu1 %4505, %v5386_v46   ;;  %1713 = vperm.xlu0 %4504, %v5414_v26  }
 0x47f   : > { %2006 = vst.msk [vmem:[#allocation3 + $0x28] sm:$0xff] %vm1790_vm6, %v5414_v26  ;;  %v1650_v22 = vpop.xlane.xlu0 %1649  ;;  %v1653_v28 = vpop.xlane.xlu1 %1652 }
 0x480   : > { %v5431_v32 = vmax.f32 %v5426_v8, %v1650_v22  ;;  %v5434_v23 = vmax.f32 %v5428_v6, %v1653_v28  ;;  %v4551_v28 = vld [vmem:[#allocation2 + $0x8] sm:$0xff]   ;;  %v4552_v22 = vld [vmem:[#allocation2 + $0x18] sm:$0xff]  }
 0x482   : > { %6663 = vst [vmem:[#allocation34_spill] sm:$0xff] %v5431_v32  ;;  %6664 = vst [vmem:[#allocation35_spill] sm:$0xff] %v5434_v23  ;;  %1693 = vperm.xlu1 %4505, %v5383_v1   ;;  %1723 = vperm.xlu0 %4504, %v5434_v23  }
 0x483   : > { %2007 = vst.msk [vmem:[#allocation3 + $0x30] sm:$0xff] %vm1790_vm6, %v5431_v32  ;;  %2008 = vst.msk [vmem:[#allocation3 + $0x38] sm:$0xff] %vm1790_vm6, %v5434_v23  ;;  %v5571_v23 = vld [vmem:[#allocation3] sm:$0xff] }
 0x484   : > { %6676 = vst [vmem:[#allocation47_spill] sm:$0xff] %v5571_v23 }
 0x486   : > { %1869 = vrot.lane.b32.xlu1 %v5162_v37, %s4850_s16  ;;  %2049 = vrot.lane.b32.xlu0 %v5060_v47, %s4852_s29 }
 0x48a   : > { %1867 = vrot.lane.b32.xlu1 %v5164_v39, %s4850_s16  ;;  %2045 = vrot.lane.b32.xlu0 %v5078_v60, %s4852_s29 }
 0x48e   : > { %1865 = vrot.lane.b32.xlu1 %v5168_v41, %s4850_s16  ;;  %2039 = vrot.lane.b32.xlu0 %v4551_v28, %s4852_s29  ;;  %v4554_v28 = vld [vmem:[#allocation2 + $0x10] sm:$0xff]  }
 0x492   : > { %1863 = vrot.lane.b32.xlu1 %v5172_v44, %s4850_s16  ;;  %2043 = vrot.lane.b32.xlu0 %v4552_v22, %s4852_s29 }
 0x496   : > { %1718 = vperm.xlu1 %4505, %v5431_v32  }
 0x49a   : > { %1708 = vperm.xlu1 %4505, %v5411_v56  }
 0x49e   : > { %2051 = vrot.lane.b32.xlu1 %v5057_v42, %s4852_s29 }
 0x4a2   : > { %2047 = vrot.lane.b32.xlu1 %v5074_v57, %s4852_s29 }
 0x4a6   : > { %2037 = vrot.lane.b32.xlu1 %v4553_v0, %s4852_s29 }
 0x4aa   : > { %2041 = vrot.lane.b32.xlu1 %v4554_v28, %s4852_s29 }
 0x4ed   : > { %v1689_v27 = vpop.permute.xlu0 %1688 }
 0x4ee   : > { %v1726_v22 = vsub.f32 %v5336_v29, %v1689_v27 }
 0x4f0   : > { %v1734_v32 = vmul.f32 1.442695, %v1726_v22 }
 0x4f2   : > { %4585 = vpow2.f32 %v1734_v32 }
 0x4f5   : > { %v1699_v16 = vpop.permute.xlu1 %1698 }
 0x4f6   : > { %v1728_v19 = vsub.f32 %v5334_v13, %v1699_v16 }
 0x4f8   : > { %v1738_v59 = vmul.f32 1.442695, %v1728_v19 }
 0x4f9   : > { %v1704_v5 = vpop.permute.xlu1 %1703  ;;  %v1714_v29 = vpop.permute.xlu0 %1713 }
 0x4fa   : > { %v1729_v11 = vsub.f32 %v5340_v18, %v1704_v5 }
 0x4fc   : > { %v1740_v56 = vmul.f32 1.442695, %v1729_v11 }
 0x4fd   : > { %v1694_v8 = vpop.permute.xlu1 %1693 }
 0x4fe   : > { %v1727_v21 = vsub.f32 %v5342_v31, %v1694_v8  ;;  %4587 = vpow2.f32 %v1740_v56  ;;  %v1731_v56 = vsub.f32 %v5356_v54, %v1714_v29 }
 0x4ff   : > { %v5472_v11 = vpop.eup %4585 }
 0x500   : > { %v1736_v61 = vmul.f32 1.442695, %v1727_v21  ;;  %v1744_v28 = vmul.f32 1.442695, %v1731_v56 }
 0x501   : > { %v1870_v0 = vpop.permute.xlu1 %1869 }
 0x502   : > { %4291 = vmatprep.subr.bf16.mxu1 %v1870_v0  ;;  %4589 = vpow2.f32 %v1736_v61  ;;  %v1724_v61 = vpop.permute.xlu0 %1723 }
 0x503   : > { %4292 = vmatpush3.bf16.msra.mxu1 %v1870_v0  ;;  %4591 = vpow2.f32 %v1738_v59  ;;  %v1733_v8 = vsub.f32 %v5354_v50, %v1724_v61 }
 0x504   : > { %4593 = vpow2.f32 %v1744_v28 }
 0x505   : > { %v1868_v27 = vpop.permute.xlu1 %1867 }
 0x506   : > { %4293 = vmatprep.subr.bf16.mxu1 %v1868_v27  ;;  %v2050_v50 = vpop.permute.xlu0 %2049 }
 0x507   : > { %4294 = vmatpush3.bf16.msra.mxu1 %v1868_v27  ;;  %v1748_v27 = vmul.f32 1.442695, %v1733_v8 }
 0x509   : > { %v1866_v5 = vpop.permute.xlu1 %1865 }
 0x50a   : > { %4295 = vmatprep.subr.bf16.mxu1 %v1866_v5 }
 0x50b   : > { %4296 = vmatpush3.bf16.msra.mxu1 %v1866_v5  ;;  %v5474_v19 = vpop.eup %4587 }
 0x50d   : > { %v1864_v16 = vpop.permute.xlu1 %1863 }
 0x50e   : > { %4297 = vmatprep.subr.bf16.mxu1 %v1864_v16 }
 0x50f   : > { %4298 = vmatpush3.bf16.msra.mxu1 %v1864_v16  ;;  %v5476_v21 = vpop.eup %4589  ;;  %v2072_v16 = vsel %vm1040_vm2, %v2050_v50, 0 }
 0x510   : > { %v5479_v13 = vpop.eup %4591  ;;  %v1855_v31 = vpack.c.bf16 %v5476_v21, %v5472_v11 }
 0x511   : > { %v1719_v18 = vpop.permute.xlu1 %1718  ;;  %v1856_v59 = vpack.c.bf16 %v5474_v19, %v5479_v13 }
 0x512   : > { %v1732_v32 = vsub.f32 %v5348_v40, %v1719_v18  ;;  %4299 = vmatprep.mubr.msk.bf16.mxu1 %vm1146_vm4, %v1855_v31 }
 0x513   : > { %4300 = vmatmul.mubr.msk.bf16.vlgmr.msra.gmra.mxu1 %vm1146_vm4, %v1856_v59 }
 0x514   : > { %v1746_v54 = vmul.f32 1.442695, %v1732_v32 }
 0x515   : > { %v1709_v22 = vpop.permute.xlu1 %1708 }
 0x516   : > { %v1730_v0 = vsub.f32 %v5350_v43, %v1709_v22  ;;  %4595 = vpow2.f32 %v1746_v54  ;;  %v5495_v43 = vpop.eup %4593  ;;  %v2046_v54 = vpop.permute.xlu0 %2045 }
 0x517   : > { %v2066_v22 = vsel %vm1040_vm2, %v2046_v54, 0 }
 0x518   : > { %v1742_v5 = vmul.f32 1.442695, %v1730_v0 }
 0x519   : > { %v2052_v29 = vpop.permute.xlu1 %2051 }
 0x51a   : > { %4597 = vpow2.f32 %v1742_v5  ;;  %4415 = vmatprep.subr.msk.bf16.mxu1 %vm1040_vm2, %v2052_v29  ;;  %v2075_v40 = vsel %vm1040_vm2, %v2052_v29, 0  ;;  %v2040_v0 = vpop.permute.xlu0 %2039 }
 0x51b   : > { %4599 = vpow2.f32 %v1748_v27  ;;  %4308 = vmatpush3.bf16.xpose.msra.mxu1 %v2075_v40 }
 0x51c   : > { %4416 = vmatprep.subr.msk.bf16.mxu1 %vm1040_vm2, %v2050_v50 }
 0x51d   : > { %v2048_v56 = vpop.permute.xlu1 %2047 }
 0x51e   : > { %v2069_v28 = vsel %vm1040_vm2, %v2048_v56, 0  ;;  %v2044_v5 = vpop.permute.xlu0 %2043 }
 0x521   : > { %v2038_v8 = vpop.permute.xlu1 %2037 }
 0x523   : > { %4310 = vmatpush3.bf16.xpose.msra.mxu1 %v2072_v16  ;;  %v5497_v61 = vpop.eup %4595 }
 0x524   : > { %4417 = vmatprep.subr.msk.bf16.mxu1 %vm1040_vm2, %v2048_v56  ;;  %6665 = vst [vmem:[#allocation36_spill] sm:$0xff] %v5497_v61 }
 0x525   : > { %v2042_v27 = vpop.permute.xlu1 %2041 }
 0x527   : > { %v5499_v18 = vpop.eup %4597 }
 0x528   : > { %v5501_v31 = vpop.eup %4599  ;;  %v1857_v59 = vpack.c.bf16 %v5495_v43, %v5499_v18 }
 0x529   : > { %v1858_v32 = vpack.c.bf16 %v5501_v31, %v5497_v61 }
 0x52a   : > { %4303 = vmatprep.mubr.msk.bf16.mxu1 %vm1146_vm4, %v1857_v59 }
 0x52b   : > { %4304 = vmatmul.mubr.msk.bf16.gmra.mxu1 %vm1146_vm4, %v1858_v32 }
 0x52c   : > { %4312 = vmatpush3.bf16.xpose.msra.mxu1 %v2069_v28  ;;  %4315 = vmatprep.mubr.msk.bf16.mxu1 %vm1040_vm2, %v2038_v8 }
 0x52d   : > { %4418 = vmatprep.subr.msk.bf16.mxu1 %vm1040_vm2, %v2046_v54 }
 0x534   : > { %4314 = vmatpush3.bf16.xpose.msra.mxu1 %v2066_v22 }
 0x53b   : > { %4316 = vmatmul.mubr.msk.bf16.vlgmr.msra.gmra.mxu1 %vm1040_vm2, %v2040_v0 }
 0x53c   : > { %4319 = vmatprep.mubr.msk.bf16.mxu1 %vm1040_vm2, %v2042_v27 }
 0x543   : > { %4320 = vmatmul.mubr.msk.bf16.gmra.mxu1 %vm1040_vm2, %v2044_v5 }
 0x5d3   : > { %v5516_v29 = vpop.f32.mrf.mxu1 }
 0x5d4   : > { %6666 = vst [vmem:[#allocation37_spill] sm:$0xff] %v5516_v29  ;;  %v6608_v29 = vmov 2  }
 0x5d5   : > { %v5518_v40 = vpop.f32.mrf.mxu1  ;;  %4506 = vset.pattern.permute.xlu1 %v6608_v29  ;;  %4507 = vset.pattern.permute.xlu0 %v6608_v29 }
 0x5d6   : > { %6667 = vst [vmem:[#allocation38_spill] sm:$0xff] %v5518_v40 }
 0x5d7   : > { %v5520_v50 = vpop.f32.mrf.mxu1 }
 0x5d8   : > { %6668 = vst [vmem:[#allocation39_spill] sm:$0xff] %v5520_v50 }
 0x5d9   : > { %v5522_v16 = vpop.f32.mrf.mxu1 }
 0x5da   : > { %6669 = vst [vmem:[#allocation40_spill] sm:$0xff] %v5522_v16 }
 0x5eb   : > { %v5524_v56 = vpop.f32.mrf.mxu1 }
 0x5ec   : > { %6670 = vst [vmem:[#allocation41_spill] sm:$0xff] %v5524_v56 }
 0x5ed   : > { %v5526_v59 = vpop.f32.mrf.mxu1 }
 0x5ee   : > { %6671 = vst [vmem:[#allocation42_spill] sm:$0xff] %v5526_v59 }
 0x5ef   : > { %v5528_v32 = vpop.f32.mrf.mxu1 }
 0x5f0   : > { %6672 = vst [vmem:[#allocation43_spill] sm:$0xff] %v5528_v32 }
 0x5f1   : > { %v5530_v8 = vpop.f32.mrf.mxu1 }
 0x5f2   : > { %6673 = vst [vmem:[#allocation44_spill] sm:$0xff] %v5530_v8 }
 0x5fb   : > { %v5532_v28 = vpop.f32.mrf.mxu1 }
 0x5fc   : > { %v2164_v54 = vsel %vm1146_vm4, %v5532_v28, -inf }
 0x5fd   : > { %2165 = vmax.xlane.f32.xlu0 %v2164_v54  ;;  %v5536_v22 = vpop.f32.mrf.mxu1 }
 0x5fe   : > { %v2158_v0 = vsel %vm1146_vm4, %v5536_v22, -inf }
 0x5ff   : > { %2159 = vmax.xlane.f32.xlu1 %v2158_v0  ;;  %v5540_v27 = vpop.f32.mrf.mxu1 }
 0x600   : > { %v2167_v54 = vsel %vm1146_vm4, %v5540_v27, -inf }
 0x601   : > { %v5542_v5 = vpop.f32.mrf.mxu1 }
 0x602   : > { %v2161_v56 = vsel %vm1146_vm4, %v5542_v5, -inf }
 0x603   : > { %2162 = vmax.xlane.f32.xlu0 %v2161_v56  ;;  %v5546_v59 = vpop.f32.mrf.mxu1 }
 0x604   : > { %v2176_v8 = vsel %vm1146_vm4, %v5546_v59, -inf }
 0x605   : > { %v5548_v50 = vpop.f32.mrf.mxu1 }
 0x606   : > { %v2170_v16 = vsel %vm1146_vm4, %v5548_v50, -inf }
 0x607   : > { %2168 = vmax.xlane.f32.xlu0 %v2167_v54  ;;  %2171 = vmax.xlane.f32.xlu1 %v2170_v16  ;;  %v5554_v0 = vpop.f32.mrf.mxu1  ;;  %v5566_v54 = vld [vmem:[#allocation3 + $0x10] sm:$0xff] }
 0x608   : > { %v2179_v16 = vsel %vm1146_vm4, %v5554_v0, -inf  ;;  %6674 = vst [vmem:[#allocation45_spill] sm:$0xff] %v5566_v54 }
 0x609   : > { %v5556_v32 = vpop.f32.mrf.mxu1 }
 0x60a   : > { %v2173_v56 = vsel %vm1146_vm4, %v5556_v32, -inf }
 0x60b   : > { %2177 = vmax.xlane.f32.xlu1 %v2176_v8  ;;  %2174 = vmax.xlane.f32.xlu0 %v2173_v56 }
 0x60f   : > { %2180 = vmax.xlane.f32.xlu0 %v2179_v16 }
 0x686   : > { %v2166_v40 = vpop.xlane.xlu0 %2165 }
 0x687   : > { %v5569_v61 = vmax.f32 %v5566_v54, %v2166_v40  ;;  %v5585_v40 = vld [vmem:[#allocation3 + $0x8] sm:$0xff]  ;;  %v5598_v54 = vld [vmem:[#allocation3 + $0x20] sm:$0xff] }
 0x688   : > { %v2160_v6 = vpop.xlane.xlu1 %2159  ;;  %6678 = vst [vmem:[#allocation49_spill] sm:$0xff] %v5585_v40  ;;  %6680 = vst [vmem:[#allocation51_spill] sm:$0xff] %v5598_v54 }
 0x689   : > { %6675 = vst [vmem:[#allocation46_spill] sm:$0xff] %v5569_v61  ;;  %2527 = vst.msk [vmem:[#allocation3 + $0x10] sm:$0xff] %vm2318_vm7, %v5569_v61  ;;  %v5578_v8 = vmax.f32 %v5571_v23, %v2160_v6  ;;  %v5596_v6 = vld [vmem:[#allocation3 + $0x18] sm:$0xff] }
 0x68b   : > { %6677 = vst [vmem:[#allocation48_spill] sm:$0xff] %v5578_v8  ;;  %2525 = vst.msk [vmem:[#allocation3] sm:$0xff] %vm2318_vm7, %v5578_v8  ;;  %2216 = vperm.xlu1 %4506, %v5578_v8  }
 0x68c   : > { %v2163_v16 = vpop.xlane.xlu0 %2162 }
 0x68d   : > { %v5588_v29 = vmax.f32 %v5585_v40, %v2163_v16  ;;  %v5617_v40 = vld [vmem:[#allocation3 + $0x30] sm:$0xff] }
 0x68e   : > { %6683 = vst [vmem:[#allocation54_spill] sm:$0xff] %v5617_v40 }
 0x68f   : > { %6679 = vst [vmem:[#allocation50_spill] sm:$0xff] %v5588_v29  ;;  %2526 = vst.msk [vmem:[#allocation3 + $0x8] sm:$0xff] %vm2318_vm7, %v5588_v29  ;;  %2221 = vperm.xlu0 %4507, %v5588_v29   ;;  %2226 = vperm.xlu1 %4506, %v5569_v61   ;;  %v5615_v29 = vld [vmem:[#allocation3 + $0x28] sm:$0xff] }
 0x690   : > { %v2169_v56 = vpop.xlane.xlu0 %2168  ;;  %v2172_v8 = vpop.xlane.xlu1 %2171 }
 0x691   : > { %v5601_v23 = vmax.f32 %v5596_v6, %v2169_v56  ;;  %v5604_v16 = vmax.f32 %v5598_v54, %v2172_v8  ;;  %v4555_v54 = vld [vmem:[#allocation2] sm:$0xff]  }
 0x693   : > { %6681 = vst [vmem:[#allocation52_spill] sm:$0xff] %v5601_v23  ;;  %6682 = vst [vmem:[#allocation53_spill] sm:$0xff] %v5604_v16  ;;  %2231 = vperm.xlu1 %4506, %v5601_v23  }
 0x694   : > { %2528 = vst.msk [vmem:[#allocation3 + $0x18] sm:$0xff] %vm2318_vm7, %v5601_v23  ;;  %2529 = vst.msk [vmem:[#allocation3 + $0x20] sm:$0xff] %vm2318_vm7, %v5604_v16  ;;  %v2175_v56 = vpop.xlane.xlu0 %2174  ;;  %v2178_v8 = vpop.xlane.xlu1 %2177 }
 0x695   : > { %v5620_v30 = vmax.f32 %v5615_v29, %v2175_v56  ;;  %v5623_v46 = vmax.f32 %v5617_v40, %v2178_v8  ;;  %v5636_v56 = vld [vmem:[#allocation3 + $0x38] sm:$0xff] }
 0x697   : > { %6684 = vst [vmem:[#allocation55_spill] sm:$0xff] %v5623_v46  ;;  %2530 = vst.msk [vmem:[#allocation3 + $0x28] sm:$0xff] %vm2318_vm7, %v5620_v30  ;;  %2393 = vrot.lane.b32.xlu1 %v5162_v37, %s4852_s29  ;;  %2246 = vperm.xlu0 %4507, %v5623_v46  }
 0x698   : > { %2531 = vst.msk [vmem:[#allocation3 + $0x30] sm:$0xff] %vm2318_vm7, %v5623_v46  ;;  %v2181_v8 = vpop.xlane.xlu0 %2180 }
 0x699   : > { %v5639_v23 = vmax.f32 %v5636_v56, %v2181_v8  ;;  %v4556_v8 = vld [vmem:[#allocation2 + $0x10] sm:$0xff]  }
 0x69b   : > { %6685 = vst [vmem:[#allocation56_spill] sm:$0xff] %v5639_v23  ;;  %2532 = vst.msk [vmem:[#allocation3 + $0x38] sm:$0xff] %vm2318_vm7, %v5639_v23  ;;  %2391 = vrot.lane.b32.xlu1 %v5164_v39, %s4852_s29  ;;  %2575 = vrot.lane.b32.xlu0 %v5057_v42, %s4854_s27  ;;  %v4557_v42 = vld [vmem:[#allocation2 + $0x8] sm:$0xff]  }
 0x69f   : > { %2389 = vrot.lane.b32.xlu1 %v5168_v41, %s4852_s29  ;;  %2571 = vrot.lane.b32.xlu0 %v5074_v57, %s4854_s27  ;;  %v4558_v57 = vld [vmem:[#allocation2 + $0x18] sm:$0xff]  }
 0x6a3   : > { %2387 = vrot.lane.b32.xlu1 %v5172_v44, %s4852_s29  ;;  %2561 = vrot.lane.b32.xlu0 %v4555_v54, %s4854_s27  ;;  %s6441_s29 = scalar_lea.hbm %s6585_s13, %s4106_s22 }
 0x6a7   : > { %2236 = vperm.xlu1 %4506, %v5604_v16   ;;  %2565 = vrot.lane.b32.xlu0 %v4556_v8, %s4854_s27 }
 0x6ab   : > { %2241 = vperm.xlu1 %4506, %v5620_v30   ;;  %2913 = vrot.lane.b32.xlu0 %v5168_v41, %s4854_s27 }
 0x6af   : > { %2251 = vperm.xlu1 %4506, %v5639_v23  }
 0x6b3   : > { %2573 = vrot.lane.b32.xlu1 %v5060_v47, %s4854_s27 }
 0x6b7   : > { %2569 = vrot.lane.b32.xlu1 %v5078_v60, %s4854_s27 }
 0x6bb   : > { %2563 = vrot.lane.b32.xlu1 %v4557_v42, %s4854_s27 }
 0x6bf   : > { %2567 = vrot.lane.b32.xlu1 %v4558_v57, %s4854_s27 }
 0x6c3   : > { %2917 = vrot.lane.b32.xlu1 %v5162_v37, %s4854_s27 }
 0x6c7   : > { %2915 = vrot.lane.b32.xlu1 %v5164_v39, %s4854_s27 }
 0x6cb   : > { %2911 = vrot.lane.b32.xlu1 %v5172_v44, %s4854_s27 }
 0x706   : > { %v2217_v54 = vpop.permute.xlu1 %2216 }
 0x707   : > { %v2254_v8 = vsub.f32 %v5536_v22, %v2217_v54 }
 0x709   : > { %v2262_v41 = vmul.f32 1.442695, %v2254_v8 }
 0x70a   : > { %v2222_v61 = vpop.permute.xlu0 %2221  ;;  %v2227_v46 = vpop.permute.xlu1 %2226 }
 0x70b   : > { %v2255_v47 = vsub.f32 %v5542_v5, %v2222_v61  ;;  %v2256_v60 = vsub.f32 %v5532_v28, %v2227_v46  ;;  %4601 = vpow2.f32 %v2262_v41 }
 0x70d   : > { %v2264_v40 = vmul.f32 1.442695, %v2255_v47  ;;  %v2266_v42 = vmul.f32 1.442695, %v2256_v60 }
 0x70e   : > { %v2232_v57 = vpop.permute.xlu1 %2231 }
 0x70f   : > { %4603 = vpow2.f32 %v2264_v40  ;;  %v2257_v37 = vsub.f32 %v5540_v27, %v2232_v57 }
 0x710   : > { %4605 = vpow2.f32 %v2266_v42 }
 0x711   : > { %v2268_v39 = vmul.f32 1.442695, %v2257_v37 }
 0x712   : > { %v2394_v44 = vpop.permute.xlu1 %2393  ;;  %v2247_v54 = vpop.permute.xlu0 %2246 }
 0x713   : > { %4607 = vpow2.f32 %v2268_v39  ;;  %4323 = vmatprep.subr.bf16.mxu0 %v2394_v44  ;;  %v2260_v37 = vsub.f32 %v5546_v59, %v2247_v54 }
 0x714   : > { %4324 = vmatpush3.bf16.msra.mxu0 %v2394_v44 }
 0x716   : > { %v2392_v22 = vpop.permute.xlu1 %2391  ;;  %v2576_v41 = vpop.permute.xlu0 %2575 }
 0x717   : > { %4325 = vmatprep.subr.bf16.mxu0 %v2392_v22  ;;  %v2599_v57 = vsel %vm1040_vm2, %v2576_v41, 0 }
 0x718   : > { %4326 = vmatpush3.bf16.msra.mxu0 %v2392_v22  ;;  %v5666_v5 = vpop.eup %4601 }
 0x71a   : > { %v2390_v61 = vpop.permute.xlu1 %2389  ;;  %v2572_v59 = vpop.permute.xlu0 %2571 }
 0x71b   : > { %4327 = vmatprep.subr.bf16.mxu0 %v2390_v61 }
 0x71c   : > { %v5668_v46 = vpop.eup %4603  ;;  %4328 = vmatpush3.bf16.msra.mxu0 %v2390_v61 }
 0x71d   : > { %v2383_v28 = vpack.c.bf16 %v5668_v46, %v5666_v5  ;;  %v5672_v40 = vpop.eup %4605 }
 0x71e   : > { %v2388_v27 = vpop.permute.xlu1 %2387 }
 0x71f   : > { %4329 = vmatprep.subr.bf16.mxu0 %v2388_v27  ;;  %4331 = vmatprep.mubr.msk.bf16.mxu0 %vm1146_vm4, %v2383_v28  ;;  %v2274_v28 = vmul.f32 1.442695, %v2260_v37 }
 0x720   : > { %v5675_v8 = vpop.eup %4607  ;;  %4330 = vmatpush3.bf16.msra.mxu0 %v2388_v27 }
 0x721   : > { %v2384_v47 = vpack.c.bf16 %v5675_v8, %v5672_v40  ;;  %4419 = vmatprep.subr.msk.bf16.mxu0 %vm1040_vm2, %v2576_v41 }
 0x722   : > { %v2237_v60 = vpop.permute.xlu1 %2236 }
 0x723   : > { %v2258_v42 = vsub.f32 %v5548_v50, %v2237_v60  ;;  %4332 = vmatmul.mubr.msk.bf16.vlgmr.msra.gmra.mxu0 %vm1146_vm4, %v2384_v47  ;;  %v2593_v60 = vsel %vm1040_vm2, %v2572_v59, 0 }
 0x724   : > { %4340 = vmatpush3.bf16.xpose.msra.mxu0 %v2599_v57 }
 0x725   : > { %v2270_v39 = vmul.f32 1.442695, %v2258_v42 }
 0x726   : > { %v2242_v44 = vpop.permute.xlu1 %2241 }
 0x727   : > { %v2259_v22 = vsub.f32 %v5556_v32, %v2242_v44  ;;  %4609 = vpow2.f32 %v2270_v39 }
 0x729   : > { %v2272_v61 = vmul.f32 1.442695, %v2259_v22 }
 0x72a   : > { %v2252_v27 = vpop.permute.xlu1 %2251 }
 0x72b   : > { %4611 = vpow2.f32 %v2272_v61  ;;  %v2261_v16 = vsub.f32 %v5554_v0, %v2252_v27  ;;  %v2562_v0 = vpop.permute.xlu0 %2561 }
 0x72c   : > { %4613 = vpow2.f32 %v2274_v28 }
 0x72d   : > { %v2276_v23 = vmul.f32 1.442695, %v2261_v16 }
 0x72e   : > { %v2574_v50 = vpop.permute.xlu1 %2573 }
 0x72f   : > { %4615 = vpow2.f32 %v2276_v23  ;;  %4420 = vmatprep.subr.msk.bf16.mxu0 %vm1040_vm2, %v2574_v50  ;;  %v2596_v41 = vsel %vm1040_vm2, %v2574_v50, 0  ;;  %v2566_v22 = vpop.permute.xlu0 %2565 }
 0x730   : > { %4342 = vmatpush3.bf16.xpose.msra.mxu0 %v2596_v41 }
 0x731   : > { %4421 = vmatprep.subr.msk.bf16.mxu0 %vm1040_vm2, %v2572_v59 }
 0x732   : > { %v2570_v32 = vpop.permute.xlu1 %2569 }
 0x733   : > { %v2590_v61 = vsel %vm1040_vm2, %v2570_v32, 0  ;;  %v2914_v27 = vpop.permute.xlu0 %2913 }
 0x734   : > { %v5689_v47 = vpop.eup %4609 }
 0x736   : > { %v2564_v54 = vpop.permute.xlu1 %2563 }
 0x738   : > { %v5692_v42 = vpop.eup %4611  ;;  %4344 = vmatpush3.bf16.xpose.msra.mxu0 %v2593_v60 }
 0x739   : > { %4422 = vmatprep.subr.msk.bf16.mxu0 %vm1040_vm2, %v2570_v32  ;;  %v2385_v23 = vpack.c.bf16 %v5692_v42, %v5689_v47  ;;  %v5697_v57 = vpop.eup %4613 }
 0x73a   : > { %v2568_v16 = vpop.permute.xlu1 %2567 }
 0x73b   : > { %4335 = vmatprep.mubr.msk.bf16.mxu0 %vm1146_vm4, %v2385_v23 }
 0x73c   : > { %v5700_v37 = vpop.eup %4615 }
 0x73d   : > { %v2386_v39 = vpack.c.bf16 %v5700_v37, %v5697_v57 }
 0x73e   : > { %v2918_v44 = vpop.permute.xlu1 %2917 }
 0x73f   : > { %4336 = vmatmul.mubr.msk.bf16.gmra.mxu0 %vm1146_vm4, %v2386_v39  ;;  %4355 = vmatprep.subr.bf16.mxu1 %v2918_v44 }
 0x740   : > { %4346 = vmatpush3.bf16.xpose.msra.mxu0 %v2590_v61  ;;  %4347 = vmatprep.mubr.msk.bf16.mxu0 %vm1040_vm2, %v2562_v0 }
 0x741   : > { %4356 = vmatpush3.bf16.msra.mxu1 %v2918_v44 }
 0x742   : > { %v2916_v28 = vpop.permute.xlu1 %2915 }
 0x743   : > { %4357 = vmatprep.subr.bf16.mxu1 %v2916_v28 }
 0x745   : > { %4358 = vmatpush3.bf16.msra.mxu1 %v2916_v28 }
 0x746   : > { %4359 = vmatprep.subr.bf16.mxu1 %v2914_v27  ;;  %v2912_v50 = vpop.permute.xlu1 %2911 }
 0x747   : > { %4348 = vmatmul.mubr.msk.bf16.vlgmr.msra.gmra.mxu0 %vm1040_vm2, %v2564_v54 }
 0x748   : > { %4351 = vmatprep.mubr.msk.bf16.mxu0 %vm1040_vm2, %v2566_v22 }
 0x749   : > { %4360 = vmatpush3.bf16.msra.mxu1 %v2914_v27 }
 0x74a   : > { %4361 = vmatprep.subr.bf16.mxu1 %v2912_v50 }
 0x74d   : > { %4362 = vmatpush3.bf16.msra.mxu1 %v2912_v50 }
 0x74f   : > { %4352 = vmatmul.mubr.msk.bf16.gmra.mxu0 %vm1040_vm2, %v2568_v16 }
 0x7e3   : > { %v5710_v41 = vpop.f32.mrf.mxu0 }
 0x7e4   : > { %6686 = vst [vmem:[#allocation57_spill] sm:$0xff] %v5710_v41 }
 0x7e5   : > { %v5712_v59 = vpop.f32.mrf.mxu0 }
 0x7e6   : > { %6687 = vst [vmem:[#allocation58_spill] sm:$0xff] %v5712_v59 }
 0x7e7   : > { %v5714_v32 = vpop.f32.mrf.mxu0 }
 0x7e9   : > { %v5716_v60 = vpop.f32.mrf.mxu0 }
 0x7ff   : > { %v5718_v0 = vpop.f32.mrf.mxu0 }
 0x800   : > { %6688 = vst [vmem:[#allocation59_spill] sm:$0xff] %v5718_v0 }
 0x801   : > { %v5720_v23 = vpop.f32.mrf.mxu0 }
 0x803   : > { %v5722_v54 = vpop.f32.mrf.mxu0 }
 0x804   : > { %6689 = vst [vmem:[#allocation60_spill] sm:$0xff] %v5722_v54 }
 0x805   : > { %v5724_v39 = vpop.f32.mrf.mxu0 }
 0x806   : > { %6690 = vst [vmem:[#allocation61_spill] sm:$0xff] %v5724_v39 }
 0x807   : > { %v5726_v44 = vpop.f32.mrf.mxu0 }
 0x808   : > { %v2688_v16 = vsel %vm1146_vm4, %v5726_v44, -inf }
 0x809   : > { %2689 = vmax.xlane.f32.xlu0 %v2688_v16  ;;  %v5730_v22 = vpop.f32.mrf.mxu0 }
 0x80a   : > { %v2682_v28 = vsel %vm1146_vm4, %v5730_v22, -inf }
 0x80b   : > { %v5732_v61 = vpop.f32.mrf.mxu0 }
 0x80c   : > { %6691 = vst [vmem:[#allocation62_spill] sm:$0xff] %v5732_v61  ;;  %v2691_v39 = vsel %vm1146_vm4, %v5732_v61, -inf  ;;  %v6625_v61 = vmov 3  }
 0x80d   : > { %2683 = vmax.xlane.f32.xlu0 %v2682_v28  ;;  %v5736_v27 = vpop.f32.mrf.mxu0  ;;  %4509 = vset.pattern.permute.xlu1 %v6625_v61 }
 0x80e   : > { %v2685_v50 = vsel %vm1146_vm4, %v5736_v27, -inf  ;;  %4508 = vset.pattern.permute.xlu0 %v6625_v61  ;;  %v6713_v61 = vld [vmem:[#allocation35_spill] sm:$0xff] }
 0x80f   : > { %2686 = vmax.xlane.f32.xlu1 %v2685_v50  ;;  %v5740_v54 = vpop.f32.mrf.mxu0 }
 0x810   : > { %v2700_v41 = vsel %vm1146_vm4, %v5740_v54, -inf }
 0x811   : > { %2692 = vmax.xlane.f32.xlu0 %v2691_v39  ;;  %v5744_v16 = vpop.f32.mrf.mxu0 }
 0x812   : > { %v2694_v50 = vsel %vm1146_vm4, %v5744_v16, -inf }
 0x813   : > { %2701 = vmax.xlane.f32.xlu1 %v2700_v41  ;;  %v5748_v59 = vpop.f32.mrf.mxu0  ;;  %v1278_v41 = vsel %vm1146_vm4, %v5278_v10, 0.0  ;;  %v1284_v10 = vsel %vm1146_vm4, %v5287_v14, 0.0  ;;  %v1773_v14 = vsel %vm1146_vm4, %v5495_v43, 0.0  ;;  %v1770_v43 = vsel %vm1146_vm4, %v5499_v18, 0.0 }
 0x814   : > { %v2703_v28 = vsel %vm1146_vm4, %v5748_v59, -inf }
 0x815   : > { %2704 = vmax.xlane.f32.xlu0 %v2703_v28  ;;  %v5752_v0 = vpop.f32.mrf.mxu0  ;;  %v1275_v28 = vsel %vm1146_vm4, %v5275_v7, 0.0  ;;  %v1761_v7 = vsel %vm1146_vm4, %v5476_v21, 0.0  ;;  %v1758_v21 = vsel %vm1146_vm4, %v5472_v11, 0.0  ;;  %v6693_v11 = vsub.f32 %v5195_v55, %v5210_v62 }
 0x816   : > { %6692 = vst [vmem:[#allocation63_spill] sm:$0xff] %v5752_v0  ;;  %v2697_v39 = vsel %vm1146_vm4, %v5752_v0, -inf  ;;  %v1296_v0 = vsel %vm1146_vm4, %v5299_v34, 0.0  ;;  %v1293_v34 = vsel %vm1146_vm4, %v5303_v36, 0.0  ;;  %v2289_v36 = vsel %vm1146_vm4, %v5668_v46, 0.0 }
 0x817   : > { %2695 = vmax.xlane.f32.xlu1 %v2694_v50  ;;  %v1290_v50 = vsel %vm1146_vm4, %v5301_v35, 0.0  ;;  %v1287_v35 = vsel %vm1146_vm4, %v5297_v33, 0.0  ;;  %v1779_v33 = vsel %vm1146_vm4, %v5501_v31, 0.0  ;;  %v6694_v31 = vsub.f32 %v5180_v48, %v5192_v53  ;;  %v5813_v53 = vld [vmem:[#allocation3] sm:$0xff] }
 0x818   : > { %v6695_v46 = vsub.f32 %v5226_v4, %v5239_v15  ;;  %v6696_v55 = vsub.f32 %v5178_v45, %v5183_v49  ;;  %v6697_v4 = vsub.f32 %v5241_v20, %v5254_v24  ;;  %v5821_v45 = vld [vmem:[#allocation3 + $0x8] sm:$0xff]  ;;  %v5834_v24 = vld [vmem:[#allocation3 + $0x18] sm:$0xff] }
 0x819   : > { %2698 = vmax.xlane.f32.xlu0 %v2697_v39  ;;  %v1281_v39 = vsel %vm1146_vm4, %v5283_v25, 0.0  ;;  %v1767_v25 = vsel %vm1146_vm4, %v5474_v19, 0.0  ;;  %v1764_v19 = vsel %vm1146_vm4, %v5479_v13, 0.0  ;;  %v6712_v48 = vld [vmem:[#allocation33_spill] sm:$0xff] }
 0x81a   : > { %v1191_v62 = vmul.f32 1.442695, %v6696_v55  ;;  %v1201_v15 = vmul.f32 1.442695, %v6697_v4 }
 0x81b   : > { %1279 = vadd.xlane.f32.xlu1 %v1278_v41  ;;  %v1187_v41 = vmul.f32 1.442695, %v6694_v31 }
 0x81d   : > { %1276 = vadd.xlane.f32.xlu0 %v1275_v28  ;;  %v5798_v28 = vld [vmem:[#allocation3 + $0x10] sm:$0xff] }
 0x81f   : > { %1291 = vadd.xlane.f32.xlu1 %v1290_v50  ;;  %v1197_v50 = vmul.f32 1.442695, %v6695_v46 }
 0x821   : > { %1282 = vadd.xlane.f32.xlu0 %v1281_v39 }
 0x823   : > { %1297 = vadd.xlane.f32.xlu1 %v1296_v0  ;;  %v1189_v0 = vmul.f32 1.442695, %v6693_v11 }
 0x825   : > { %1285 = vadd.xlane.f32.xlu0 %v1284_v10  ;;  %4617 = vpow2.f32 %v1189_v0 }
 0x826   : > { %4619 = vpow2.f32 %v1187_v41 }
 0x827   : > { %1762 = vadd.xlane.f32.xlu1 %v1761_v7  ;;  %4621 = vpow2.f32 %v1197_v50  ;;  %v6698_v7 = vsub.f32 %v5185_v51, %v5202_v58  ;;  %v6699_v58 = vsub.f32 %v5212_v63, %v5222_v2  ;;  %v5860_v63 = vld [vmem:[#allocation3 + $0x38] sm:$0xff]  ;;  %v5875_v50 = vld [vmem:[#allocation3 + $0x20] sm:$0xff] }
 0x828   : > { %4623 = vpow2.f32 %v1191_v62  ;;  %6701 = vst [vmem:[#allocation64_spill] sm:$0xff] %v5860_v63  ;;  %v1139_v62 = vld [vmem:[#allocation4 + $0x8] sm:$0xff] }
 0x829   : > { %1288 = vadd.xlane.f32.xlu0 %v1287_v35  ;;  %v1193_v35 = vmul.f32 1.442695, %v6698_v7  ;;  %4625 = vpow2.f32 %v1201_v15 }
 0x82b   : > { %1768 = vadd.xlane.f32.xlu1 %v1767_v25  ;;  %4627 = vpow2.f32 %v1193_v35  ;;  %v1145_v25 = vld [vmem:[#allocation4 + $0x38] sm:$0xff] }
 0x82d   : > { %1294 = vadd.xlane.f32.xlu0 %v1293_v34 }
 0x82f   : > { %1774 = vadd.xlane.f32.xlu1 %v1773_v14  ;;  %v6725_v14 = vld [vmem:[#allocation36_spill] sm:$0xff] }
 0x831   : > { %1759 = vadd.xlane.f32.xlu0 %v1758_v21  ;;  %v1195_v21 = vmul.f32 1.442695, %v6699_v58 }
 0x832   : > { %v5870_v41 = vpop.eup %4617 }
 0x833   : > { %1780 = vadd.xlane.f32.xlu1 %v1779_v33  ;;  %v5847_v33 = vld [vmem:[#allocation3 + $0x30] sm:$0xff]  ;;  %4629 = vpow2.f32 %v1195_v21  ;;  %v5885_v15 = vpop.eup %4619 }
 0x834   : > { %v5897_v58 = vpop.eup %4621 }
 0x835   : > { %1765 = vadd.xlane.f32.xlu0 %v1764_v19 }
 0x837   : > { %2290 = vadd.xlane.f32.xlu1 %v2289_v36  ;;  %v6700_v36 = vsub.f32 %v5378_v9, %v5383_v1  ;;  %v6703_v9 = vmov 1  }
 0x839   : > { %1771 = vadd.xlane.f32.xlu0 %v1770_v43  ;;  %v1672_v43 = vmul.f32 1.442695, %v6700_v36  ;;  %v6707_v36 = vsub.f32 %v5408_v52, %v5414_v26  ;;  %v1140_v52 = vld [vmem:[#allocation4 + $0x10] sm:$0xff]  ;;  %v6709_v26 = vld [vmem:[#allocation26_spill] sm:$0xff] }
 0x83b   : > { %4631 = vpow2.f32 %v1672_v43  ;;  %v1680_v43 = vmul.f32 1.442695, %v6707_v36  ;;  %v6710_v36 = vld [vmem:[#allocation27_spill] sm:$0xff] }
 0x83c   : > { %v6711_v31 = vsub.f32 %v6709_v26, %v6710_v36  ;;  %v6716_v26 = vld [vmem:[#allocation29_spill] sm:$0xff] }
 0x892   : > { %v2690_v13 = vpop.xlane.xlu0 %2689 }
 0x893   : > { %v5804_v18 = vmax.f32 %v5798_v28, %v2690_v13  ;;  %v6704_v13 = vsub.f32 %v5224_v3, %v5236_v12  ;;  %v5887_v3 = vld [vmem:[#allocation3 + $0x28] sm:$0xff] }
 0x894   : > { %6705 = vst [vmem:[#allocation66_spill] sm:$0xff] %v5887_v3 }
 0x895   : > { %3051 = vst.msk [vmem:[#allocation3 + $0x10] sm:$0xff] %vm2842_vm8, %v5804_v18  ;;  %v1199_v46 = vmul.f32 1.442695, %v6704_v13 }
 0x896   : > { %v2684_v39 = vpop.xlane.xlu0 %2683 }
 0x897   : > { %v5819_v10 = vmax.f32 %v5813_v53, %v2684_v39  ;;  %4633 = vpow2.f32 %v1199_v46  ;;  %v6708_v46 = vsub.f32 %v5368_v38, %v5371_v17  ;;  %v6714_v17 = vsub.f32 %v6712_v48, %v6713_v61 }
 0x898   : > { %v2687_v49 = vpop.xlane.xlu1 %2686  ;;  %4635 = vpow2.f32 %v1680_v43 }
 0x899   : > { %3049 = vst.msk [vmem:[#allocation3] sm:$0xff] %vm2842_vm8, %v5819_v10  ;;  %v5831_v20 = vmax.f32 %v5821_v45, %v2687_v49  ;;  %2740 = vperm.xlu1 %4509, %v5819_v10   ;;  %v1138_v49 = vld [vmem:[#allocation4] sm:$0xff]  ;;  %v1684_v38 = vmul.f32 1.442695, %v6714_v17 }
 0x89a   : > { %v2693_v34 = vpop.xlane.xlu0 %2692 }
 0x89b   : > { %3050 = vst.msk [vmem:[#allocation3 + $0x8] sm:$0xff] %vm2842_vm8, %v5831_v20  ;;  %v5841_v51 = vmax.f32 %v5834_v24, %v2693_v34  ;;  %2745 = vperm.xlu0 %4508, %v5831_v20   ;;  %v1268_v34 = vmul.f32 %v5870_v41, %v1139_v62  ;;  %v5908_v62 = vpop.eup %4623 }
 0x89c   : > { %v2702_v19 = vpop.xlane.xlu1 %2701 }
 0x89d   : > { %3052 = vst.msk [vmem:[#allocation3 + $0x18] sm:$0xff] %vm2842_vm8, %v5841_v51  ;;  %v5857_v0 = vmax.f32 %v5847_v33, %v2702_v19  ;;  %2750 = vperm.xlu1 %4509, %v5804_v18   ;;  %v1143_v19 = vld [vmem:[#allocation4 + $0x28] sm:$0xff] }
 0x89e   : > { %v2705_v2 = vpop.xlane.xlu0 %2704 }
 0x89f   : > { %3055 = vst.msk [vmem:[#allocation3 + $0x30] sm:$0xff] %vm2842_vm8, %v5857_v0  ;;  %v5867_v1 = vmax.f32 %v5860_v63, %v2705_v2  ;;  %4512 = vset.pattern.permute.xlu0 %v6703_v9  ;;  %v1676_v2 = vmul.f32 1.442695, %v6711_v31  ;;  %v1269_v31 = vmul.f32 %v5908_v62, %v1140_v52  ;;  %v6718_v52 = vld [vmem:[#allocation49_spill] sm:$0xff] }
 0x8a0   : > { %v2696_v55 = vpop.xlane.xlu1 %2695 }
 0x8a1   : > { %6702 = vst [vmem:[#allocation65_spill] sm:$0xff] %v5867_v1  ;;  %3056 = vst.msk [vmem:[#allocation3 + $0x38] sm:$0xff] %vm2842_vm8, %v5867_v1  ;;  %v5882_v4 = vmax.f32 %v5875_v50, %v2696_v55  ;;  %2755 = vperm.xlu1 %4509, %v5841_v51   ;;  %v1267_v55 = vmul.f32 %v5885_v15, %v1138_v49 }
 0x8a2   : > { %v2699_v12 = vpop.xlane.xlu0 %2698 }
 0x8a3   : > { %3053 = vst.msk [vmem:[#allocation3 + $0x20] sm:$0xff] %vm2842_vm8, %v5882_v4  ;;  %v5894_v35 = vmax.f32 %v5887_v3, %v2699_v12  ;;  %v1670_v12 = vmul.f32 1.442695, %v6708_v46 }
 0x8a4   : > { %v1280_v21 = vpop.xlane.xlu1 %1279 }
 0x8a5   : > { %6706 = vst [vmem:[#allocation67_spill] sm:$0xff] %v5894_v35  ;;  %3054 = vst.msk [vmem:[#allocation3 + $0x28] sm:$0xff] %vm2842_vm8, %v5894_v35  ;;  %v1300_v13 = vadd.f32 %v1280_v21, %v1268_v34  ;;  %2770 = vperm.xlu1 %4509, %v5857_v0   ;;  %v1272_v34 = vmul.f32 %v5897_v58, %v1143_v19  ;;  %v5918_v21 = vpop.eup %4625  ;;  %4637 = vpow2.f32 %v1670_v12  ;;  %v1141_v19 = vld [vmem:[#allocation4 + $0x18] sm:$0xff] }
 0x8a6   : > { %v1277_v39 = vpop.xlane.xlu0 %1276  ;;  %4639 = vpow2.f32 %v1676_v2  ;;  %v1274_v48 = vmul.f32 %v5918_v21, %v1145_v25  ;;  %v1142_v25 = vld [vmem:[#allocation4 + $0x20] sm:$0xff] }
 0x8a7   : > { %1309 = vst.msk [vmem:[#allocation4 + $0x8] sm:$0xff] %vm1307_vm5, %v1300_v13  ;;  %v1299_v11 = vadd.f32 %v1277_v39, %v1267_v55  ;;  %v5926_v13 = vpop.eup %4627  ;;  %v6715_v55 = vld [vmem:[#allocation28_spill] sm:$0xff]  ;;  %4641 = vpow2.f32 %v1684_v38 }
 0x8a8   : > { %v1292_v49 = vpop.xlane.xlu1 %1291  ;;  %v6717_v43 = vsub.f32 %v6715_v55, %v6716_v26  ;;  %v1270_v55 = vmul.f32 %v5926_v13, %v1141_v19 }
 0x8a9   : > { %1308 = vst.msk [vmem:[#allocation4] sm:$0xff] %vm1307_vm5, %v1299_v11  ;;  %v1304_v46 = vadd.f32 %v1292_v49, %v1272_v34  ;;  %2760 = vperm.xlu1 %4509, %v5882_v4   ;;  %v5933_v34 = vpop.eup %4629  ;;  %v6719_v49 = vld [vmem:[#allocation50_spill] sm:$0xff] }
 0x8aa   : > { %v1283_v39 = vpop.xlane.xlu0 %1282  ;;  %v1674_v36 = vmul.f32 1.442695, %v6717_v43  ;;  %v6720_v17 = vsub.f32 %v6718_v52, %v6719_v49  ;;  %v5941_v26 = vpop.eup %4631  ;;  %v6722_v43 = vld [vmem:[#allocation31_spill] sm:$0xff] }
 0x8ab   : > { %1313 = vst.msk [vmem:[#allocation4 + $0x28] sm:$0xff] %vm1307_vm5, %v1304_v46  ;;  %v1301_v61 = vadd.f32 %v1283_v39, %v1269_v31  ;;  %v6721_v39 = vld [vmem:[#allocation30_spill] sm:$0xff] }
 0x8ac   : > { %v1298_v11 = vpop.xlane.xlu1 %1297  ;;  %v2200_v12 = vmul.f32 1.442695, %v6720_v17  ;;  %4643 = vpow2.f32 %v1674_v36  ;;  %v6723_v38 = vsub.f32 %v6721_v39, %v6722_v43  ;;  %v1271_v36 = vmul.f32 %v5933_v34, %v1142_v25  ;;  %v1144_v17 = vld [vmem:[#allocation4 + $0x30] sm:$0xff] }
 0x8ad   : > { %1310 = vst.msk [vmem:[#allocation4 + $0x10] sm:$0xff] %vm1307_vm5, %v1301_v61  ;;  %v1306_v2 = vadd.f32 %v1298_v11, %v1274_v48  ;;  %2775 = vperm.xlu1 %4509, %v5867_v1   ;;  %v5948_v11 = vpop.eup %4633  ;;  %v1776_v1 = vsel %vm1146_vm4, %v6725_v14, 0.0 }
 0x8ae   : > { %v1286_v46 = vpop.xlane.xlu0 %1285  ;;  %v1623_v31 = vld [vmem:[#allocation4 + $0x8] sm:$0xff]  ;;  %v1678_v7 = vmul.f32 1.442695, %v6723_v38  ;;  %4645 = vpow2.f32 %v2200_v12  ;;  %v6724_v12 = vmov 0   ;;  %v5957_v39 = vpop.eup %4635 }
 0x8af   : > { %1315 = vst.msk [vmem:[#allocation4 + $0x38] sm:$0xff] %vm1307_vm5, %v1306_v2  ;;  %v1302_v52 = vadd.f32 %v1286_v46, %v1270_v55  ;;  %v1751_v61 = vmul.f32 %v5941_v26, %v1623_v31  ;;  %v1273_v31 = vmul.f32 %v5948_v11, %v1144_v17 }
 0x8b0   : > { %v1763_v48 = vpop.xlane.xlu1 %1762  ;;  %4647 = vpow2.f32 %v1678_v7  ;;  %v1622_v38 = vld [vmem:[#allocation4] sm:$0xff] }
 0x8b1   : > { %1311 = vst.msk [vmem:[#allocation4 + $0x18] sm:$0xff] %vm1307_vm5, %v1302_v52  ;;  %v1783_v19 = vadd.f32 %v1763_v48, %v1751_v61  ;;  %2765 = vperm.xlu1 %4509, %v5894_v35  }
 0x8b2   : > { %v1289_v49 = vpop.xlane.xlu0 %1288  ;;  %v1627_v46 = vld [vmem:[#allocation4 + $0x28] sm:$0xff]  ;;  %v5959_v52 = vpop.eup %4637 }
 0x8b3   : > { %1792 = vst.msk [vmem:[#allocation4 + $0x8] sm:$0xff] %vm1790_vm6, %v1783_v19  ;;  %v1303_v2 = vadd.f32 %v1289_v49, %v1271_v36  ;;  %v1755_v7 = vmul.f32 %v5957_v39, %v1627_v46  ;;  %v5962_v61 = vpop.eup %4639 }
 0x8b4   : > { %v1769_v55 = vpop.xlane.xlu1 %1768  ;;  %v5969_v63 = vpop.eup %4641  ;;  %v1624_v46 = vld [vmem:[#allocation4 + $0x10] sm:$0xff] }
 0x8b5   : > { %1312 = vst.msk [vmem:[#allocation4 + $0x20] sm:$0xff] %vm1307_vm5, %v1303_v2  ;;  %4510 = vset.pattern.permute.xlu1 %v6724_v12  ;;  %v1750_v2 = vmul.f32 %v5959_v52, %v1622_v38 }
 0x8b6   : > { %v1295_v43 = vpop.xlane.xlu0 %1294  ;;  %v1629_v36 = vld [vmem:[#allocation4 + $0x38] sm:$0xff] }
 0x8b7   : > { %v1305_v25 = vadd.f32 %v1295_v43, %v1273_v31  ;;  %v1757_v3 = vmul.f32 %v5969_v63, %v1629_v36 }
 0x8b8   : > { %v1625_v48 = vld [vmem:[#allocation4 + $0x18] sm:$0xff]  ;;  %v1775_v19 = vpop.xlane.xlu1 %1774 }
 0x8b9   : > { %v1753_v49 = vmul.f32 %v5962_v61, %v1625_v48  ;;  %1314 = vst.msk [vmem:[#allocation4 + $0x30] sm:$0xff] %vm1307_vm5, %v1305_v25  ;;  %v1787_v17 = vadd.f32 %v1775_v19, %v1755_v7  ;;  %v5973_v48 = vpop.eup %4643 }
 0x8ba   : > { %v1760_v31 = vpop.xlane.xlu0 %1759  ;;  %1777 = vadd.xlane.f32.xlu0 %v1776_v1  ;;  %v2151_v7 = vld [vmem:[#allocation4 + $0x8] sm:$0xff]  ;;  %v1752_v38 = vmul.f32 %v5973_v48, %v1624_v46  ;;  %v2286_v1 = vsel %vm1146_vm4, %v5666_v5, 0.0  ;;  %v2292_v46 = vsel %vm1146_vm4, %v5672_v40, 0.0  ;;  %v2301_v40 = vsel %vm1146_vm4, %v5692_v42, 0.0  ;;  %v6733_v42 = vld [vmem:[#allocation52_spill] sm:$0xff] }
 0x8bb   : > { %v1785_v43 = vadd.f32 %v1769_v55, %v1753_v49  ;;  %1796 = vst.msk [vmem:[#allocation4 + $0x28] sm:$0xff] %vm1790_vm6, %v1787_v17  ;;  %v1782_v35 = vadd.f32 %v1760_v31, %v1750_v2  ;;  %v5980_v55 = vpop.eup %4645 }
 0x8bc   : > { %v1781_v25 = vpop.xlane.xlu1 %1780  ;;  %v1626_v49 = vld [vmem:[#allocation4 + $0x20] sm:$0xff]  ;;  %v2279_v17 = vmul.f32 %v5980_v55, %v2151_v7  ;;  %v2304_v7 = vsel %vm1146_vm4, %v5697_v57, 0.0  ;;  %v6729_v57 = vld [vmem:[#allocation47_spill] sm:$0xff] }
 0x8bd   : > { %1794 = vst.msk [vmem:[#allocation4 + $0x18] sm:$0xff] %vm1790_vm6, %v1785_v43  ;;  %1791 = vst.msk [vmem:[#allocation4] sm:$0xff] %vm1790_vm6, %v1782_v35  ;;  %v1789_v14 = vadd.f32 %v1781_v25, %v1757_v3  ;;  %v4648_v2 = vpop.eup %4647  ;;  %v2298_v25 = vsel %vm1146_vm4, %v5689_v47, 0.0 }
 0x8be   : > { %v1766_v19 = vpop.xlane.xlu0 %1765  ;;  %2287 = vadd.xlane.f32.xlu0 %v2286_v1  ;;  %v1754_v35 = vmul.f32 %v4648_v2, %v1626_v49  ;;  %v6726_v1 = vld [vmem:[#allocation32_spill] sm:$0xff] }
 0x8bf   : > { %1798 = vst.msk [vmem:[#allocation4 + $0x38] sm:$0xff] %vm1790_vm6, %v1789_v14  ;;  %v1784_v36 = vadd.f32 %v1766_v19, %v1752_v38  ;;  %v2295_v14 = vsel %vm1146_vm4, %v5675_v8, 0.0  ;;  %v2307_v38 = vsel %vm1146_vm4, %v5700_v37, 0.0  ;;  %v6727_v19 = vld [vmem:[#allocation34_spill] sm:$0xff]  ;;  %v6734_v37 = vsub.f32 %v5596_v6, %v6733_v42 }
 0x8c0   : > { %v2291_v31 = vpop.xlane.xlu1 %2290  ;;  %v6728_v47 = vsub.f32 %v6726_v1, %v6727_v19  ;;  %v6737_v6 = vsub.f32 %v5615_v29, %v5620_v30  ;;  %v6742_v29 = vsub.f32 %v5821_v45, %v5831_v20 }
 0x8c1   : > { %1793 = vst.msk [vmem:[#allocation4 + $0x10] sm:$0xff] %vm1790_vm6, %v1784_v36  ;;  %v2311_v3 = vadd.f32 %v2291_v31, %v2279_v17  ;;  %v6730_v36 = vld [vmem:[#allocation48_spill] sm:$0xff]  ;;  %v6732_v31 = vld [vmem:[#allocation38_spill] sm:$0xff] }
 0x8c2   : > { %v1772_v5 = vpop.xlane.xlu0 %1771  ;;  %2293 = vadd.xlane.f32.xlu0 %v2292_v46  ;;  %v1682_v49 = vmul.f32 1.442695, %v6728_v47  ;;  %v6731_v17 = vsub.f32 %v6729_v57, %v6730_v36  ;;  %v6750_v47 = vld [vmem:[#allocation62_spill] sm:$0xff]  ;;  %v6751_v57 = vld [vmem:[#allocation39_spill] sm:$0xff] }
 0x8c3   : > { %2320 = vst.msk [vmem:[#allocation4 + $0x8] sm:$0xff] %vm2318_vm7, %v2311_v3  ;;  %v1786_v43 = vadd.f32 %v1772_v5, %v1754_v35  ;;  %v2204_v3 = vmul.f32 1.442695, %v6734_v37  ;;  %v6735_v35 = vld [vmem:[#allocation37_spill] sm:$0xff]  ;;  %v6736_v5 = vmov 2  }
 0x8c4   : > { %4649 = vpow2.f32 %v1682_v49  ;;  %v2198_v8 = vmul.f32 1.442695, %v6731_v17 }
 0x8c5   : > { %1795 = vst.msk [vmem:[#allocation4 + $0x20] sm:$0xff] %vm1790_vm6, %v1786_v43 }
 0x8c6   : > { %2299 = vadd.xlane.f32.xlu0 %v2298_v25  ;;  %4651 = vpow2.f32 %v2198_v8 }
 0x8c7   : > { %4653 = vpow2.f32 %v2204_v3 }
 0x8ca   : > { %2305 = vadd.xlane.f32.xlu0 %v2304_v7  ;;  %v6741_v7 = vld [vmem:[#allocation43_spill] sm:$0xff] }
 0x8d5   : > { %2296 = vadd.xlane.f32.xlu1 %v2295_v14 }
 0x8d9   : > { %2302 = vadd.xlane.f32.xlu1 %v2301_v40  ;;  %v6748_v40 = vld [vmem:[#allocation46_spill] sm:$0xff] }
 0x8dd   : > { %2308 = vadd.xlane.f32.xlu1 %v2307_v38 }
 0x8e0   : > { %1814 = vperm.xlu0 %4512, %v5941_v26   ;;  %v6014_v26 = vpop.eup %4649 }
 0x8e1   : > { %v6018_v46 = vpop.eup %4651 }
 0x8e2   : > { %v6026_v43 = vpop.eup %4653 }
 0x8e4   : > { %1960 = vrot.lane.b32.xlu0 %v6732_v31, %s4856_s24 }
 0x8e8   : > { %1829 = vperm.xlu0 %4512, %v4648_v2   ;;  %v2208_v2 = vmul.f32 1.442695, %v6737_v6  ;;  %v6752_v6 = vld [vmem:[#allocation51_spill] sm:$0xff] }
 0x8ea   : > { %4655 = vpow2.f32 %v2208_v2  ;;  %v6753_v2 = vld [vmem:[#allocation53_spill] sm:$0xff] }
 0x8ec   : > { %1964 = vrot.lane.b32.xlu0 %v6735_v35, %s4856_s24 }
 0x8ee   : > { %1331 = vperm.xlu1 %4510, %v5870_v41   ;;  %v6738_v41 = vld [vmem:[#allocation44_spill] sm:$0xff] }
 0x8f0   : > { %1839 = vperm.xlu0 %4512, %v6014_v26  }
 0x8f2   : > { %1336 = vperm.xlu1 %4510, %v5908_v62   ;;  %v6739_v62 = vld [vmem:[#allocation56_spill] sm:$0xff] }
 0x8f3   : > { %v6740_v25 = vsub.f32 %v5636_v56, %v6739_v62  ;;  %v2724_v56 = vmul.f32 1.442695, %v6742_v29 }
 0x8f4   : > { %4513 = vset.pattern.permute.xlu0 %v6736_v5 }
 0x8f5   : > { %2337 = vperm.xlu0 %4513, %v6018_v46  }
 0x8f6   : > { %1341 = vperm.xlu1 %4510, %v5926_v13   ;;  %v2212_v13 = vmul.f32 1.442695, %v6740_v25 }
 0x8f7   : > { %v6042_v30 = vpop.eup %4655 }
 0x8f8   : > { %4657 = vpow2.f32 %v2212_v13 }
 0x8f9   : > { %2352 = vperm.xlu0 %4513, %v6026_v43   ;;  %4659 = vpow2.f32 %v2724_v56 }
 0x8fa   : > { %1346 = vperm.xlu1 %4510, %v5933_v34   ;;  %v6744_v34 = vmov 3  }
 0x8fd   : > { %1970 = vrot.lane.b32.xlu0 %v6738_v41, %s4856_s24  ;;  %v6754_v41 = vsub.f32 %v6752_v6, %v6753_v2  ;;  %v2152_v2 = vld [vmem:[#allocation4 + $0x10] sm:$0xff] }
 0x8fe   : > { %1351 = vperm.xlu1 %4510, %v5897_v58  }
 0x8ff   : > { %v2206_v62 = vmul.f32 1.442695, %v6754_v41 }
 0x901   : > { %1974 = vrot.lane.b32.xlu0 %v6741_v7, %s4856_s24 }
 0x902   : > { %1356 = vperm.xlu1 %4510, %v5948_v11   ;;  %v6745_v11 = vld [vmem:[#allocation40_spill] sm:$0xff] }
 0x905   : > { %2486 = vrot.lane.b32.xlu0 %v5716_v60, %s4857_s17  ;;  %v6743_v60 = vsub.f32 %v5875_v50, %v5882_v4 }
 0x906   : > { %1361 = vperm.xlu1 %4510, %v5918_v21   ;;  %v6056_v21 = vpop.eup %4657 }
 0x907   : > { %v2730_v58 = vmul.f32 1.442695, %v6743_v60  ;;  %v6074_v1 = vpop.eup %4659 }
 0x909   : > { %2362 = vperm.xlu0 %4513, %v6042_v30   ;;  %4661 = vpow2.f32 %v2730_v58 }
 0x90a   : > { %4511 = vset.pattern.permute.xlu1 %v6703_v9 }
 0x90b   : > { %1809 = vperm.xlu1 %4511, %v5959_v52  }
 0x90d   : > { %2490 = vrot.lane.b32.xlu0 %v5714_v32, %s4857_s17 }
 0x90f   : > { %1819 = vperm.xlu1 %4511, %v5973_v48  }
 0x911   : > { %2372 = vperm.xlu0 %4513, %v6056_v21  }
 0x913   : > { %1824 = vperm.xlu1 %4511, %v5962_v61   ;;  %v6746_v61 = vld [vmem:[#allocation59_spill] sm:$0xff] }
 0x914   : > { %v2741_v45 = vpop.permute.xlu1 %2740 }
 0x915   : > { %v2778_v20 = vsub.f32 %v5730_v22, %v2741_v45  ;;  %2492 = vrot.lane.b32.xlu0 %v5720_v23, %s4857_s17  ;;  %v6747_v22 = vld [vmem:[#allocation45_spill] sm:$0xff] }
 0x916   : > { %v2746_v32 = vpop.permute.xlu0 %2745  ;;  %4516 = vset.pattern.permute.xlu0 %v6744_v34  ;;  %v6749_v38 = vsub.f32 %v6747_v22, %v6748_v40  ;;  %v6080_v36 = vpop.eup %4661  ;;  %v6762_v40 = vsub.f32 %v5798_v28, %v5804_v18 }
 0x917   : > { %v2786_v50 = vmul.f32 1.442695, %v2778_v20  ;;  %v2779_v4 = vsub.f32 %v5736_v27, %v2746_v32  ;;  %1962 = vrot.lane.b32.xlu1 %v6745_v11, %s4856_s24  ;;  %v6757_v20 = vld [vmem:[#allocation54_spill] sm:$0xff]  ;;  %v6758_v32 = vld [vmem:[#allocation55_spill] sm:$0xff]  ;;  %v6760_v11 = vld [vmem:[#allocation41_spill] sm:$0xff] }
 0x918   : > { %v2751_v52 = vpop.permute.xlu1 %2750  ;;  %v2202_v23 = vmul.f32 1.442695, %v6749_v38  ;;  %v2726_v38 = vmul.f32 1.442695, %v6762_v40  ;;  %v2157_v40 = vld [vmem:[#allocation4 + $0x38] sm:$0xff] }
 0x919   : > { %v2788_v48 = vmul.f32 1.442695, %v2779_v4  ;;  %v2780_v14 = vsub.f32 %v5726_v44, %v2751_v52  ;;  %2496 = vrot.lane.b32.xlu0 %v6746_v61, %s4857_s17  ;;  %4663 = vpow2.f32 %v2786_v50  ;;  %v6759_v50 = vsub.f32 %v6757_v20, %v6758_v32  ;;  %v6761_v52 = vld [vmem:[#allocation58_spill] sm:$0xff] }
 0x91b   : > { %4665 = vpow2.f32 %v2788_v48  ;;  %1834 = vperm.xlu1 %4511, %v5957_v39   ;;  %v2790_v27 = vmul.f32 1.442695, %v2780_v14  ;;  %v2210_v4 = vmul.f32 1.442695, %v6759_v50 }
 0x91c   : > { %v2756_v19 = vpop.permute.xlu1 %2755  ;;  %4667 = vpow2.f32 %v2202_v23 }
 0x91d   : > { %v2781_v49 = vsub.f32 %v6750_v47, %v2756_v19  ;;  %2866 = vperm.xlu0 %4516, %v6074_v1   ;;  %4669 = vpow2.f32 %v2790_v27  ;;  %v1628_v47 = vld [vmem:[#allocation4 + $0x30] sm:$0xff] }
 0x91e   : > { %v1756_v18 = vmul.f32 %v6014_v26, %v1628_v47  ;;  %v1317_v47 = vld [vmem:[#allocation5 + $0x8] sm:$0xff] }
 0x91f   : > { %v2792_v44 = vmul.f32 1.442695, %v2781_v49  ;;  %1966 = vrot.lane.b32.xlu1 %v6751_v57, %s4856_s24  ;;  %v6763_v49 = vld [vmem:[#allocation57_spill] sm:$0xff]  ;;  %v6764_v57 = vsub.f32 %v5813_v53, %v5819_v10 }
 0x920   : > { %v2771_v17 = vpop.permute.xlu1 %2770 }
 0x921   : > { %4671 = vpow2.f32 %v2792_v44  ;;  %2881 = vperm.xlu0 %4516, %v6080_v36   ;;  %v2722_v28 = vmul.f32 1.442695, %v6764_v57  ;;  %v1318_v57 = vld [vmem:[#allocation5 + $0x10] sm:$0xff] }
 0x922   : > { %4673 = vpow2.f32 %v2206_v62 }
 0x923   : > { %1844 = vperm.xlu1 %4511, %v5969_v63   ;;  %v2784_v63 = vsub.f32 %v5740_v54, %v2771_v17  ;;  %v6756_v54 = vld [vmem:[#allocation42_spill] sm:$0xff] }
 0x924   : > { %v2761_v39 = vpop.permute.xlu1 %2760 }
 0x925   : > { %v2782_v31 = vsub.f32 %v5744_v16, %v2761_v39 }
 0x926   : > { %v4664_v8 = vpop.eup %4663 }
 0x927   : > { %4514 = vset.pattern.permute.xlu1 %v6736_v5  ;;  %v2794_v13 = vmul.f32 1.442695, %v2782_v31  ;;  %v2810_v31 = vsel %vm1146_vm4, %v4664_v8, 0.0 }
 0x928   : > { %v6086_v42 = vpop.eup %4665  ;;  %2342 = vperm.xlu1 %4514, %v5980_v55   ;;  %v2776_v37 = vpop.permute.xlu1 %2775  ;;  %v6755_v55 = vld [vmem:[#allocation63_spill] sm:$0xff] }
 0x929   : > { %v2785_v3 = vsub.f32 %v5748_v59, %v2776_v37  ;;  %v2907_v35 = vpack.c.bf16 %v6086_v42, %v4664_v8  ;;  %v4668_v25 = vpop.eup %4667  ;;  %v2798_v59 = vmul.f32 1.442695, %v2784_v63  ;;  %4675 = vpow2.f32 %v2794_v13  ;;  %v2150_v37 = vld [vmem:[#allocation4] sm:$0xff]  ;;  %v6767_v13 = vld [vmem:[#allocation60_spill] sm:$0xff] }
 0x92a   : > { %v4670_v29 = vpop.eup %4669  ;;  %v2278_v53 = vmul.f32 %v6018_v46, %v2150_v37  ;;  %v6766_v8 = vld [vmem:[#allocation61_spill] sm:$0xff]  ;;  %v6770_v37 = vld [vmem:[#allocation18_spill] sm:$0xff] }
 0x92b   : > { %4363 = vmatprep.mubr.msk.bf16.mxu1 %vm1146_vm4, %v2907_v35  ;;  %v2800_v16 = vmul.f32 1.442695, %v2785_v3  ;;  %v2816_v27 = vsel %vm1146_vm4, %v4670_v29, 0.0  ;;  %v6765_v35 = vsub.f32 %v5834_v24, %v5841_v51  ;;  %v2280_v24 = vmul.f32 %v4668_v25, %v2152_v2  ;;  %v2154_v63 = vld [vmem:[#allocation4 + $0x20] sm:$0xff] }
 0x92c   : > { %2347 = vperm.xlu1 %4514, %v4668_v25   ;;  %v2766_v7 = vpop.permute.xlu1 %2765 }
 0x92d   : > { %v2783_v56 = vsub.f32 %v6755_v55, %v2766_v7  ;;  %4677 = vpow2.f32 %v2800_v16  ;;  %v2728_v6 = vmul.f32 1.442695, %v6765_v35 }
 0x92e   : > { %v6097_v60 = vpop.eup %4671 }
 0x92f   : > { %v2908_v58 = vpack.c.bf16 %v6097_v60, %v4670_v29  ;;  %v2796_v45 = vmul.f32 1.442695, %v2783_v56  ;;  %v4674_v48 = vpop.eup %4673  ;;  %v6768_v56 = vsub.f32 %v5847_v33, %v5857_v0  ;;  %v2153_v33 = vld [vmem:[#allocation4 + $0x18] sm:$0xff] }
 0x930   : > { %1968 = vrot.lane.b32.xlu1 %v6756_v54, %s4856_s24  ;;  %v2282_v16 = vmul.f32 %v4674_v48, %v2154_v63  ;;  %v2281_v0 = vmul.f32 %v6026_v43, %v2153_v33  ;;  %v2285_v43 = vmul.f32 %v6056_v21, %v2157_v40 }
 0x931   : > { %4679 = vpow2.f32 %v2796_v45  ;;  %4364 = vmatmul.mubr.msk.bf16.vlgmr.msra.gmra.mxu1 %vm1146_vm4, %v2908_v58  ;;  %v2734_v25 = vmul.f32 1.442695, %v6768_v56 }
 0x932   : > { %4681 = vpow2.f32 %v2798_v59 }
 0x933   : > { %4683 = vpow2.f32 %v2210_v4  ;;  %v2155_v4 = vld [vmem:[#allocation4 + $0x28] sm:$0xff] }
 0x934   : > { %1972 = vrot.lane.b32.xlu1 %v6760_v11, %s4856_s24  ;;  %4685 = vpow2.f32 %v2726_v38 }
 0x935   : > { %4687 = vpow2.f32 %v2722_v28  ;;  %v6769_v28 = vld [vmem:[#allocation21_spill] sm:$0xff] }
 0x936   : > { %v4676_v14 = vpop.eup %4675  ;;  %4689 = vpow2.f32 %v2728_v6  ;;  %v1320_v6 = vld [vmem:[#allocation5 + $0x20] sm:$0xff] }
 0x937   : > { %v2822_v62 = vsel %vm1146_vm4, %v4676_v14, 0.0  ;;  %4691 = vpow2.f32 %v2734_v25 }
 0x938   : > { %2484 = vrot.lane.b32.xlu1 %v6761_v52, %s4857_s17 }
 0x93a   : > { %v6110_v61 = vpop.eup %4677 }
 0x93c   : > { %2357 = vperm.xlu1 %4514, %v4674_v48   ;;  %v2283_v48 = vmul.f32 %v6042_v30, %v2155_v4  ;;  %v6775_v4 = vld [vmem:[#allocation24_spill] sm:$0xff] }
 0x93e   : > { %v6112_v22 = vpop.eup %4679 }
 0x93f   : > { %v4682_v23 = vpop.eup %4681  ;;  %v2909_v19 = vpack.c.bf16 %v6112_v22, %v4676_v14 }
 0x940   : > { %2488 = vrot.lane.b32.xlu1 %v6763_v49, %s4857_s17  ;;  %2817 = vadd.xlane.f32.xlu0 %v2816_v27  ;;  %v2910_v44 = vpack.c.bf16 %v6110_v61, %v4682_v23  ;;  %v4684_v17 = vpop.eup %4683  ;;  %v2828_v26 = vsel %vm1146_vm4, %v4682_v23, 0.0 }
 0x941   : > { %4367 = vmatprep.mubr.msk.bf16.mxu1 %vm1146_vm4, %v2909_v19  ;;  %v6143_v7 = vpop.eup %4685 }
 0x942   : > { %4368 = vmatmul.mubr.msk.bf16.gmra.mxu1 %vm1146_vm4, %v2910_v44  ;;  %v6150_v45 = vpop.eup %4687 }
 0x943   : > { %v1778_v39 = vpop.xlane.xlu0 %1777  ;;  %v6154_v32 = vpop.eup %4689 }
 0x944   : > { %v1788_v3 = vadd.f32 %v1778_v39, %v1756_v18  ;;  %2367 = vperm.xlu1 %4514, %v4684_v17   ;;  %2811 = vadd.xlane.f32.xlu0 %v2810_v31  ;;  %v6158_v52 = vpop.eup %4691  ;;  %v1319_v31 = vld [vmem:[#allocation5 + $0x18] sm:$0xff] }
 0x946   : > { %1797 = vst.msk [vmem:[#allocation4 + $0x30] sm:$0xff] %vm1790_vm6, %v1788_v3 }
 0x947   : > { %v2288_v10 = vpop.xlane.xlu0 %2287 }
 0x948   : > { %v2310_v41 = vadd.f32 %v2288_v10, %v2278_v53  ;;  %2494 = vrot.lane.b32.xlu1 %v6766_v8, %s4857_s17  ;;  %2829 = vadd.xlane.f32.xlu0 %v2828_v26  ;;  %v6771_v53 = vld [vmem:[#allocation20_spill] sm:$0xff]  ;;  %v1321_v8 = vld [vmem:[#allocation5 + $0x28] sm:$0xff] }
 0x949   : > { %4515 = vset.pattern.permute.xlu1 %v6744_v34 }
 0x94a   : > { %2319 = vst.msk [vmem:[#allocation4] sm:$0xff] %vm2318_vm7, %v2310_v41 }
 0x94b   : > { %v2294_v51 = vpop.xlane.xlu0 %2293 }
 0x94c   : > { %v2312_v46 = vadd.f32 %v2294_v51, %v2280_v24  ;;  %2498 = vrot.lane.b32.xlu1 %v6767_v13, %s4857_s17  ;;  %2823 = vadd.xlane.f32.xlu0 %v2822_v62  ;;  %v6772_v24 = vld [vmem:[#allocation23_spill] sm:$0xff] }
 0x94d   : > { %v2156_v55 = vld [vmem:[#allocation4 + $0x30] sm:$0xff] }
 0x94e   : > { %2321 = vst.msk [vmem:[#allocation4 + $0x10] sm:$0xff] %vm2318_vm7, %v2312_v46  ;;  %v2284_v58 = vmul.f32 %v4684_v17, %v2156_v55  ;;  %v2819_v46 = vsel %vm1146_vm4, %v6097_v60, 0.0 }
 0x94f   : > { %v2300_v29 = vpop.xlane.xlu0 %2299 }
 0x950   : > { %v2314_v59 = vadd.f32 %v2300_v29, %v2282_v16  ;;  %2871 = vperm.xlu1 %4515, %v6143_v7   ;;  %v1322_v16 = vld [vmem:[#allocation5 + $0x30] sm:$0xff]  ;;  %v6773_v29 = vld [vmem:[#allocation25_spill] sm:$0xff] }
 0x952   : > { %2323 = vst.msk [vmem:[#allocation4 + $0x20] sm:$0xff] %vm2318_vm7, %v2314_v59  ;;  %v2813_v59 = vsel %vm1146_vm4, %v6086_v42, 0.0  ;;  %v6777_v42 = vld [vmem:[#allocation67_spill] sm:$0xff] }
 0x953   : > { %v2306_v54 = vpop.xlane.xlu0 %2305 }
 0x954   : > { %v2316_v20 = vadd.f32 %v2306_v54, %v2284_v58  ;;  %2861 = vperm.xlu1 %4515, %v6150_v45   ;;  %v1323_v58 = vld [vmem:[#allocation5 + $0x38] sm:$0xff]  ;;  %v6774_v54 = vld [vmem:[#allocation22_spill] sm:$0xff] }
 0x956   : > { %2325 = vst.msk [vmem:[#allocation4 + $0x30] sm:$0xff] %vm2318_vm7, %v2316_v20 }
 0x958   : > { %2876 = vperm.xlu1 %4515, %v6154_v32  }
 0x95b   : > { %v6163_v23 = vpop.permute.xlu0 %1814 }
 0x95e   : > { %v2297_v50 = vpop.xlane.xlu1 %2296 }
 0x95f   : > { %v2313_v11 = vadd.f32 %v2297_v50, %v2281_v0  ;;  %v6170_v30 = vpop.permute.xlu0 %1960  ;;  %v2831_v50 = vsel %vm1146_vm4, %v6110_v61, 0.0  ;;  %v6780_v61 = vld [vmem:[#allocation65_spill] sm:$0xff] }
 0x961   : > { %2322 = vst.msk [vmem:[#allocation4 + $0x18] sm:$0xff] %vm2318_vm7, %v2313_v11 }
 0x962   : > { %2891 = vperm.xlu0 %4516, %v6158_v52   ;;  %v2303_v14 = vpop.xlane.xlu1 %2302 }
 0x963   : > { %v2315_v38 = vadd.f32 %v2303_v14, %v2283_v48  ;;  %v6174_v39 = vpop.permute.xlu0 %1829  ;;  %v6776_v14 = vld [vmem:[#allocation66_spill] sm:$0xff] }
 0x964   : > { %v6778_v40 = vsub.f32 %v6776_v14, %v6777_v42 }
 0x965   : > { %2324 = vst.msk [vmem:[#allocation4 + $0x28] sm:$0xff] %vm2318_vm7, %v2315_v38 }
 0x966   : > { %4517 = vset.pattern.permute.xlu0 %v6724_v12  ;;  %v2309_v27 = vpop.xlane.xlu1 %2308  ;;  %v2732_v38 = vmul.f32 1.442695, %v6778_v40 }
 0x967   : > { %v2317_v19 = vadd.f32 %v2309_v27, %v2285_v43  ;;  %1326 = vperm.xlu0 %4517, %v5885_v15   ;;  %v1965_v26 = vpop.permute.xlu0 %1964  ;;  %v2825_v43 = vsel %vm1146_vm4, %v6112_v22, 0.0 }
 0x968   : > { %4693 = vpow2.f32 %v2732_v38 }
 0x969   : > { %2326 = vst.msk [vmem:[#allocation4 + $0x38] sm:$0xff] %vm2318_vm7, %v2317_v19 }
 0x96a   : > { %v1332_v49 = vpop.permute.xlu1 %1331 }
 0x96b   : > { %v1365_v44 = vmul.f32 %v1332_v49, %v1317_v47  ;;  %v6184_v13 = vpop.permute.xlu0 %1839  ;;  %v6779_v49 = vld [vmem:[#allocation64_spill] sm:$0xff] }
 0x96d   : > { %v1454_v18 = vadd.f32 %v6769_v28, %v1365_v44  ;;  %v6781_v44 = vsub.f32 %v6779_v49, %v6780_v61 }
 0x96e   : > { %v1337_v17 = vpop.permute.xlu1 %1336 }
 0x96f   : > { %1462 = vst.msk [vmem:[#allocation5 + $0x8] sm:$0xff] %vm1040_vm2, %v1454_v18  ;;  %v1366_v21 = vmul.f32 %v1337_v17, %v1318_v57  ;;  %v2736_v57 = vmul.f32 1.442695, %v6781_v44 }
 0x970   : > { %v6191_v33 = vpop.permute.xlu0 %2337 }
 0x971   : > { %v1455_v3 = vadd.f32 %v6770_v37, %v1366_v21  ;;  %4695 = vpow2.f32 %v2736_v57 }
 0x972   : > { %v1342_v15 = vpop.permute.xlu1 %1341 }
 0x973   : > { %1463 = vst.msk [vmem:[#allocation5 + $0x10] sm:$0xff] %vm1040_vm2, %v1455_v3  ;;  %v1367_v35 = vmul.f32 %v1342_v15, %v1319_v31 }
 0x974   : > { %v2353_v27 = vpop.permute.xlu0 %2352 }
 0x975   : > { %v1456_v10 = vadd.f32 %v6771_v53, %v1367_v35 }
 0x976   : > { %v1347_v2 = vpop.permute.xlu1 %1346  ;;  %v1800_v31 = vld [vmem:[#allocation5 + $0x8] sm:$0xff] }
 0x977   : > { %1464 = vst.msk [vmem:[#allocation5 + $0x18] sm:$0xff] %vm1040_vm2, %v1456_v10  ;;  %v1368_v41 = vmul.f32 %v1347_v2, %v1320_v6  ;;  %v1848_v22 = vmul.f32 %v6163_v23, %v1800_v31  ;;  %v6211_v10 = vpop.eup %4693 }
 0x978   : > { %v1971_v17 = vpop.permute.xlu0 %1970 }
 0x979   : > { %v1457_v51 = vadd.f32 %v6772_v24, %v1368_v41 }
 0x97a   : > { %v1352_v62 = vpop.permute.xlu1 %1351  ;;  %v1801_v19 = vld [vmem:[#allocation5 + $0x10] sm:$0xff] }
 0x97b   : > { %1465 = vst.msk [vmem:[#allocation5 + $0x20] sm:$0xff] %vm1040_vm2, %v1457_v51  ;;  %v1369_v63 = vmul.f32 %v1352_v62, %v1321_v8 }
 0x97c   : > { %2820 = vadd.xlane.f32.xlu1 %v2819_v46  ;;  %v1975_v15 = vpop.permute.xlu0 %1974 }
 0x97d   : > { %v1458_v55 = vadd.f32 %v6773_v29, %v1369_v63 }
 0x97e   : > { %v1357_v56 = vpop.permute.xlu1 %1356  ;;  %v1802_v2 = vld [vmem:[#allocation5 + $0x18] sm:$0xff]  ;;  %v6215_v51 = vpop.eup %4695 }
 0x97f   : > { %1466 = vst.msk [vmem:[#allocation5 + $0x28] sm:$0xff] %vm1040_vm2, %v1458_v55  ;;  %v1370_v25 = vmul.f32 %v1357_v56, %v1322_v16 }
 0x980   : > { %2814 = vadd.xlane.f32.xlu1 %v2813_v59  ;;  %v2487_v8 = vpop.permute.xlu0 %2486 }
 0x981   : > { %v1459_v20 = vadd.f32 %v6774_v54, %v1370_v25 }
 0x982   : > { %v1362_v60 = vpop.permute.xlu1 %1361 }
 0x983   : > { %1467 = vst.msk [vmem:[#allocation5 + $0x30] sm:$0xff] %vm1040_vm2, %v1459_v20  ;;  %v1371_v0 = vmul.f32 %v1362_v60, %v1323_v58 }
 0x984   : > { %2832 = vadd.xlane.f32.xlu1 %v2831_v50  ;;  %v2363_v16 = vpop.permute.xlu0 %2362  ;;  %v1803_v50 = vld [vmem:[#allocation5 + $0x20] sm:$0xff] }
 0x985   : > { %v1460_v11 = vadd.f32 %v6775_v4, %v1371_v0  ;;  %v1851_v4 = vmul.f32 %v6174_v39, %v1803_v50 }
 0x986   : > { %v6197_v48 = vpop.permute.xlu1 %1809  ;;  %v1804_v35 = vld [vmem:[#allocation5 + $0x28] sm:$0xff] }
 0x987   : > { %1468 = vst.msk [vmem:[#allocation5 + $0x38] sm:$0xff] %vm1040_vm2, %v1460_v11 }
 0x988   : > { %2826 = vadd.xlane.f32.xlu1 %v2825_v43  ;;  %v2491_v54 = vpop.permute.xlu0 %2490 }
 0x98a   : > { %v1820_v47 = vpop.permute.xlu1 %1819  ;;  %v1805_v14 = vld [vmem:[#allocation5 + $0x30] sm:$0xff] }
 0x98b   : > { %v1849_v28 = vmul.f32 %v1820_v47, %v1801_v19  ;;  %v1853_v38 = vmul.f32 %v6184_v13, %v1805_v14 }
 0x98c   : > { %v2373_v40 = vpop.permute.xlu0 %2372 }
 0x98d   : > { %v1986_v18 = vadd.f32 %v1965_v26, %v1849_v28 }
 0x98e   : > { %v1825_v21 = vpop.permute.xlu1 %1824  ;;  %v1806_v62 = vld [vmem:[#allocation5 + $0x38] sm:$0xff] }
 0x98f   : > { %1995 = vst.msk [vmem:[#allocation5 + $0x10] sm:$0xff] %vm1992_vm9, %v1986_v18  ;;  %v1850_v26 = vmul.f32 %v1825_v21, %v1802_v2 }
 0x990   : > { %v2493_v19 = vpop.permute.xlu0 %2492 }
 0x992   : > { %v1963_v37 = vpop.permute.xlu1 %1962 }
 0x993   : > { %v1985_v3 = vadd.f32 %v1963_v37, %v1848_v22 }
 0x994   : > { %v2497_v57 = vpop.permute.xlu0 %2496 }
 0x995   : > { %1994 = vst.msk [vmem:[#allocation5 + $0x8] sm:$0xff] %vm1992_vm9, %v1985_v3 }
 0x996   : > { %v1835_v6 = vpop.permute.xlu1 %1834  ;;  %v2329_v39 = vld [vmem:[#allocation5 + $0x10] sm:$0xff] }
 0x997   : > { %v1852_v53 = vmul.f32 %v1835_v6, %v1804_v35 }
 0x998   : > { %v6231_v13 = vpop.permute.xlu0 %2866 }
 0x999   : > { %v1989_v41 = vadd.f32 %v1971_v17, %v1852_v53  ;;  %2886 = vperm.xlu1 %4515, %v6211_v10  }
 0x99a   : > { %v1967_v24 = vpop.permute.xlu1 %1966 }
 0x99b   : > { %1998 = vst.msk [vmem:[#allocation5 + $0x28] sm:$0xff] %vm1992_vm9, %v1989_v41  ;;  %v1987_v23 = vadd.f32 %v1967_v24, %v1850_v26  ;;  %v2676_v41 = vld [vmem:[#allocation4 + $0x10] sm:$0xff] }
 0x99c   : > { %v2328_v55 = vld [vmem:[#allocation5 + $0x8] sm:$0xff]  ;;  %v6234_v26 = vpop.permute.xlu0 %2881 }
 0x99d   : > { %1996 = vst.msk [vmem:[#allocation5 + $0x18] sm:$0xff] %vm1992_vm9, %v1987_v23  ;;  %2896 = vperm.xlu1 %4515, %v6215_v51  }
 0x99e   : > { %v1845_v63 = vpop.permute.xlu1 %1844 }
 0x99f   : > { %v1854_v46 = vmul.f32 %v1845_v63, %v1806_v62  ;;  %v2804_v62 = vmul.f32 %v6143_v7, %v2676_v41 }
 0x9a1   : > { %v1991_v29 = vadd.f32 %v1975_v15, %v1854_v46  ;;  %4518 = vset.pattern.permute.xlu1 %v6724_v12  ;;  %v2674_v46 = vld [vmem:[#allocation4] sm:$0xff] }
 0x9a2   : > { %v2332_v37 = vld [vmem:[#allocation5 + $0x28] sm:$0xff] }
 0x9a3   : > { %2000 = vst.msk [vmem:[#allocation5 + $0x38] sm:$0xff] %vm1992_vm9, %v1991_v29  ;;  %v2343_v56 = vpop.permute.xlu1 %2342  ;;  %v2380_v35 = vmul.f32 %v2363_v16, %v2332_v37  ;;  %v2802_v29 = vmul.f32 %v6150_v45, %v2674_v46  ;;  %v2681_v37 = vld [vmem:[#allocation4 + $0x38] sm:$0xff] }
 0x9a4   : > { %v2330_v25 = vld [vmem:[#allocation5 + $0x18] sm:$0xff]  ;;  %v2376_v59 = vmul.f32 %v2343_v56, %v2328_v55  ;;  %v2680_v56 = vld [vmem:[#allocation4 + $0x30] sm:$0xff] }
 0x9a5   : > { %v2378_v58 = vmul.f32 %v2353_v27, %v2330_v25 }
 0x9a6   : > { %v2509_v20 = vadd.f32 %v2487_v8, %v2376_v59  ;;  %v2808_v59 = vmul.f32 %v6158_v52, %v2680_v56 }
 0x9a7   : > { %v2511_v60 = vadd.f32 %v2491_v54, %v2378_v58  ;;  %v2348_v0 = vpop.permute.xlu1 %2347  ;;  %v2678_v54 = vld [vmem:[#allocation4 + $0x20] sm:$0xff] }
 0x9a8   : > { %2518 = vst.msk [vmem:[#allocation5 + $0x8] sm:$0xff] %vm2516_vm10, %v2509_v20  ;;  %v2377_v28 = vmul.f32 %v2348_v0, %v2329_v39 }
 0x9a9   : > { %2520 = vst.msk [vmem:[#allocation5 + $0x18] sm:$0xff] %vm2516_vm10, %v2511_v60  ;;  %v2806_v60 = vmul.f32 %v6080_v36, %v2678_v54 }
 0x9aa   : > { %v2334_v53 = vld [vmem:[#allocation5 + $0x38] sm:$0xff] }
 0x9ab   : > { %v1969_v11 = vpop.permute.xlu1 %1968  ;;  %v2382_v8 = vmul.f32 %v2373_v40, %v2334_v53 }
 0x9ac   : > { %v1988_v42 = vadd.f32 %v1969_v11, %v1851_v4  ;;  %v1316_v11 = vld [vmem:[#allocation5] sm:$0xff] }
 0x9ae   : > { %1997 = vst.msk [vmem:[#allocation5 + $0x20] sm:$0xff] %vm1992_vm9, %v1988_v42 }
 0x9af   : > { %v1973_v43 = vpop.permute.xlu1 %1972 }
 0x9b0   : > { %v1990_v27 = vadd.f32 %v1973_v43, %v1853_v38  ;;  %v6782_v38 = vld [vmem:[#allocation19_spill] sm:$0xff] }
 0x9b2   : > { %1999 = vst.msk [vmem:[#allocation5 + $0x30] sm:$0xff] %vm1992_vm9, %v1990_v27 }
 0x9b3   : > { %v6227_v47 = vpop.permute.xlu1 %2484 }
 0x9b5   : > { %v2331_v49 = vld [vmem:[#allocation5 + $0x20] sm:$0xff] }
 0x9b7   : > { %v2358_v61 = vpop.permute.xlu1 %2357 }
 0x9b8   : > { %v2379_v44 = vmul.f32 %v2358_v61, %v2331_v49 }
 0x9b9   : > { %v2333_v31 = vld [vmem:[#allocation5 + $0x30] sm:$0xff] }
 0x9ba   : > { %v2512_v18 = vadd.f32 %v2493_v19, %v2379_v44 }
 0x9bb   : > { %v2489_v17 = vpop.permute.xlu1 %2488 }
 0x9bc   : > { %2521 = vst.msk [vmem:[#allocation5 + $0x20] sm:$0xff] %vm2516_vm10, %v2512_v18  ;;  %v2510_v21 = vadd.f32 %v2489_v17, %v2377_v28  ;;  %v2677_v18 = vld [vmem:[#allocation4 + $0x18] sm:$0xff] }
 0x9be   : > { %2519 = vst.msk [vmem:[#allocation5 + $0x10] sm:$0xff] %vm2516_vm10, %v2510_v21 }
 0x9bf   : > { %v2368_v22 = vpop.permute.xlu1 %2367 }
 0x9c0   : > { %v2381_v3 = vmul.f32 %v2368_v22, %v2333_v31 }
 0x9c2   : > { %v2514_v15 = vadd.f32 %v2497_v57, %v2381_v3 }
 0x9c3   : > { %v2495_v6 = vpop.permute.xlu1 %2494 }
 0x9c4   : > { %2523 = vst.msk [vmem:[#allocation5 + $0x30] sm:$0xff] %vm2516_vm10, %v2514_v15  ;;  %v2513_v2 = vadd.f32 %v2495_v6, %v2380_v35  ;;  %v2679_v15 = vld [vmem:[#allocation4 + $0x28] sm:$0xff] }
 0x9c6   : > { %2522 = vst.msk [vmem:[#allocation5 + $0x28] sm:$0xff] %vm2516_vm10, %v2513_v2 }
 0x9c7   : > { %v2499_v24 = vpop.permute.xlu1 %2498 }
 0x9c8   : > { %v2515_v23 = vadd.f32 %v2499_v24, %v2382_v8 }
 0x9c9   : > { %v2818_v63 = vpop.xlane.xlu0 %2817 }
 0x9ca   : > { %2524 = vst.msk [vmem:[#allocation5 + $0x38] sm:$0xff] %vm2516_vm10, %v2515_v23  ;;  %v2836_v16 = vadd.f32 %v2818_v63, %v2804_v62 }
 0x9cb   : > { %v6262_v49 = vpop.permute.xlu1 %2871 }
 0x9cc   : > { %2845 = vst.msk [vmem:[#allocation4 + $0x10] sm:$0xff] %vm2842_vm8, %v2836_v16 }
 0x9cd   : > { %v2812_v55 = vpop.xlane.xlu0 %2811 }
 0x9ce   : > { %v2834_v25 = vadd.f32 %v2812_v55, %v2802_v29 }
 0x9cf   : > { %v6264_v44 = vpop.permute.xlu1 %2861 }
 0x9d0   : > { %2843 = vst.msk [vmem:[#allocation4] sm:$0xff] %vm2842_vm8, %v2834_v25 }
 0x9d1   : > { %v2830_v58 = vpop.xlane.xlu0 %2829 }
 0x9d2   : > { %v2840_v20 = vadd.f32 %v2830_v58, %v2808_v59 }
 0x9d3   : > { %v3062_v7 = vld [vmem:[#allocation4 + $0x10] sm:$0xff]  ;;  %v6269_v28 = vpop.permute.xlu1 %2876 }
 0x9d4   : > { %4697 = vrcp.f32 %v3062_v7  ;;  %2849 = vst.msk [vmem:[#allocation4 + $0x30] sm:$0xff] %vm2842_vm8, %v2840_v20  ;;  %v6304_v20 = vld [vmem:[%s6582_s10 + $0x8] sm:$0xff]  }
 0x9d5   : > { %v2824_v0 = vpop.xlane.xlu0 %2823 }
 0x9d6   : > { %v2838_v50 = vadd.f32 %v2824_v0, %v2806_v60 }
 0x9d7   : > { %v3060_v4 = vld [vmem:[#allocation4] sm:$0xff] }
 0x9d8   : > { %4699 = vrcp.f32 %v3060_v4  ;;  %2847 = vst.msk [vmem:[#allocation4 + $0x20] sm:$0xff] %vm2842_vm8, %v2838_v50 }
 0x9dd   : > { %v6246_v45 = vpop.permute.xlu0 %2891 }
 0x9df   : > { %v3064_v8 = vld [vmem:[#allocation4 + $0x20] sm:$0xff] }
 0x9e1   : > { %v6248_v14 = vpop.eup %4697 }
 0x9e2   : > { %v1327_v52 = vpop.permute.xlu0 %1326  ;;  %3096 = vperm.xlu1 %4518, %v6248_v14  }
 0x9e3   : > { %v1364_v42 = vmul.f32 %v1327_v52, %v1316_v11 }
 0x9e5   : > { %v6251_v40 = vpop.eup %4699  ;;  %v1453_v43 = vadd.f32 %v6782_v38, %v1364_v42 }
 0x9e6   : > { %3086 = vperm.xlu0 %4517, %v6251_v40   ;;  %4519 = vset.pattern.permute.xlu1 %v6703_v9 }
 0x9e7   : > { %1461 = vst.msk [vmem:[#allocation5] sm:$0xff] %vm1040_vm2, %v1453_v43  ;;  %3157 = vperm.xlu1 %4519, %v6248_v14  }
 0x9eb   : > { %3149 = vperm.xlu1 %4519, %v6251_v40  }
 0x9ee   : > { %v1799_v36 = vld [vmem:[#allocation5] sm:$0xff] }
 0x9ef   : > { %v1847_v27 = vmul.f32 %v6197_v48, %v1799_v36  ;;  %v2805_v48 = vmul.f32 %v6154_v32, %v2677_v18  ;;  %v2807_v32 = vmul.f32 %v6211_v10, %v2679_v15 }
 0x9f1   : > { %v1984_v19 = vadd.f32 %v6170_v30, %v1847_v27  ;;  %v2675_v30 = vld [vmem:[#allocation4 + $0x8] sm:$0xff]  ;;  %v4365_v63 = vpop.f32.mrf.mxu1 }
 0x9f2   : > { %v2803_v31 = vmul.f32 %v6074_v1, %v2675_v30  ;;  %v3066_v1 = vld [vmem:[#allocation4 + $0x30] sm:$0xff] }
 0x9f3   : > { %1993 = vst.msk [vmem:[#allocation5] sm:$0xff] %vm1992_vm9, %v1984_v19  ;;  %v2969_v16 = vpop.f32.mrf.mxu1 }
 0x9f5   : > { %v4366_v55 = vpop.f32.mrf.mxu1 }
 0x9f7   : > { %v2972_v25 = vpop.f32.mrf.mxu1 }
 0x9fa   : > { %v2327_v61 = vld [vmem:[#allocation5] sm:$0xff] }
 0x9fb   : > { %v2375_v57 = vmul.f32 %v6191_v33, %v2327_v61  ;;  %v2809_v33 = vmul.f32 %v6215_v51, %v2681_v37 }
 0x9fd   : > { %v2508_v39 = vadd.f32 %v6227_v47, %v2375_v57  ;;  %v2853_v57 = vld [vmem:[#allocation5 + $0x10] sm:$0xff] }
 0x9fe   : > { %v2901_v18 = vmul.f32 %v6262_v49, %v2853_v57 }
 0x9ff   : > { %2517 = vst.msk [vmem:[#allocation5] sm:$0xff] %vm2516_vm10, %v2508_v39  ;;  %v2854_v39 = vld [vmem:[#allocation5 + $0x18] sm:$0xff] }
 0xa02   : > { %v4369_v59 = vpop.f32.mrf.mxu1 }
 0xa04   : > { %v2985_v58 = vpop.f32.mrf.mxu1 }
 0xa05   : > { %v2821_v17 = vpop.xlane.xlu1 %2820 }
 0xa06   : > { %v2837_v21 = vadd.f32 %v2821_v17, %v2805_v48  ;;  %v4370_v54 = vpop.f32.mrf.mxu1  ;;  %v2902_v48 = vmul.f32 %v6269_v28, %v2854_v39  ;;  %v2857_v28 = vld [vmem:[#allocation5 + $0x30] sm:$0xff] }
 0xa08   : > { %2846 = vst.msk [vmem:[#allocation4 + $0x18] sm:$0xff] %vm2842_vm8, %v2837_v21  ;;  %v2851_v21 = vld [vmem:[#allocation5] sm:$0xff] }
 0xa09   : > { %v2815_v22 = vpop.xlane.xlu1 %2814 }
 0xa0a   : > { %v2835_v3 = vadd.f32 %v2815_v22, %v2803_v31  ;;  %v2852_v31 = vld [vmem:[#allocation5 + $0x8] sm:$0xff] }
 0xa0c   : > { %2844 = vst.msk [vmem:[#allocation4 + $0x8] sm:$0xff] %vm2842_vm8, %v2835_v3  ;;  %v2899_v3 = vmul.f32 %v6264_v44, %v2851_v21 }
 0xa0d   : > { %v2833_v47 = vpop.xlane.xlu1 %2832 }
 0xa0e   : > { %v2841_v35 = vadd.f32 %v2833_v47, %v2809_v33  ;;  %v2900_v33 = vmul.f32 %v6231_v13, %v2852_v31 }
 0xa0f   : > { %v3063_v6 = vld [vmem:[#allocation4 + $0x18] sm:$0xff] }
 0xa10   : > { %4701 = vrcp.f32 %v3063_v6  ;;  %2850 = vst.msk [vmem:[#allocation4 + $0x38] sm:$0xff] %vm2842_vm8, %v2841_v35  ;;  %v2858_v6 = vld [vmem:[#allocation5 + $0x38] sm:$0xff] }
 0xa11   : > { %v2827_v53 = vpop.xlane.xlu1 %2826 }
 0xa12   : > { %v2839_v2 = vadd.f32 %v2827_v53, %v2807_v32  ;;  %v2905_v32 = vmul.f32 %v6246_v45, %v2857_v28 }
 0xa13   : > { %v3061_v41 = vld [vmem:[#allocation4 + $0x8] sm:$0xff] }
 0xa14   : > { %4703 = vrcp.f32 %v3061_v41  ;;  %2848 = vst.msk [vmem:[#allocation4 + $0x28] sm:$0xff] %vm2842_vm8, %v2839_v2 }
 0xa15   : > { %4705 = vrcp.f32 %v3066_v1  ;;  %v2887_v7 = vpop.permute.xlu1 %2886  ;;  %v2855_v1 = vld [vmem:[#allocation5 + $0x20] sm:$0xff] }
 0xa16   : > { %4707 = vrcp.f32 %v3064_v8  ;;  %v2903_v45 = vmul.f32 %v6234_v26, %v2855_v1 }
 0xa17   : > { %v3067_v51 = vld [vmem:[#allocation4 + $0x38] sm:$0xff] }
 0xa18   : > { %4709 = vrcp.f32 %v3067_v51  ;;  %v2856_v51 = vld [vmem:[#allocation5 + $0x28] sm:$0xff] }
 0xa19   : > { %v2897_v60 = vpop.permute.xlu1 %2896 }
 0xa1a   : > { %v2906_v53 = vmul.f32 %v2897_v60, %v2858_v6 }
 0xa1b   : > { %v3065_v23 = vld [vmem:[#allocation4 + $0x28] sm:$0xff] }
 0xa1c   : > { %4711 = vrcp.f32 %v3065_v23  ;;  %v2904_v23 = vmul.f32 %v2887_v7, %v2856_v51 }
 0xa1d   : > { %v4702_v24 = vpop.eup %4701 }
 0xa1e   : > { %3161 = vperm.xlu1 %4519, %v4702_v24   ;;  %3101 = vperm.xlu0 %4517, %v4702_v24  }
 0xa21   : > { %v4704_v62 = vpop.eup %4703 }
 0xa22   : > { %4520 = vset.pattern.permute.xlu1 %v6724_v12  ;;  %4521 = vset.pattern.permute.xlu0 %v6703_v9  ;;  %v4706_v10 = vpop.eup %4705 }
 0xa23   : > { %3153 = vperm.xlu0 %4521, %v4704_v62   ;;  %3091 = vperm.xlu1 %4520, %v4704_v62   ;;  %v4708_v46 = vpop.eup %4707 }
 0xa25   : > { %v4710_v29 = vpop.eup %4709 }
 0xa27   : > { %3165 = vperm.xlu0 %4521, %v4708_v46   ;;  %3116 = vperm.xlu1 %4520, %v4706_v10  }
 0xa29   : > { %v4712_v56 = vpop.eup %4711 }
 0xa2b   : > { %4522 = vset.pattern.permute.xlu0 %v6724_v12  ;;  %3106 = vperm.xlu1 %4520, %v4708_v46   ;;  %v2988_v12 = vpop.f32.mrf.mxu1 }
 0xa2c   : > { %3121 = vperm.xlu0 %4522, %v4710_v29  }
 0xa2f   : > { %4523 = vset.pattern.permute.xlu1 %v6703_v9 }
 0xa30   : > { %3169 = vperm.xlu1 %4523, %v4712_v56   ;;  %3111 = vperm.xlu0 %4522, %v4712_v56  }
 0xa34   : > { %3014 = vrot.lane.b32.xlu1 %v4366_v55, %s4858_s25  ;;  %3012 = vrot.lane.b32.xlu0 %v4365_v63, %s4858_s25 }
 0xa35   : > { %4524 = vset.pattern.permute.xlu0 %v6703_v9  ;;  %v4559_v9 = vld [vmem:[%s6580_s8 + $0x8] sm:$0xff]  }
 0xa36   : > { %4371 = vmatprep.subr.bf16.mxu1 %v4559_v9 }
 0xa37   : > { %4372 = vmatpush3.bf16.msra.mxu1 %v4559_v9 }
 0xa38   : > { %3010 = vrot.lane.b32.xlu1 %v2972_v25, %s4858_s25  ;;  %3008 = vrot.lane.b32.xlu0 %v2969_v16, %s4858_s25 }
 0xa3c   : > { %3020 = vrot.lane.b32.xlu1 %v4369_v59, %s4858_s25  ;;  %3022 = vrot.lane.b32.xlu0 %v4370_v54, %s4858_s25 }
 0xa40   : > { %3016 = vrot.lane.b32.xlu1 %v2985_v58, %s4858_s25  ;;  %3018 = vrot.lane.b32.xlu0 %v2988_v12, %s4858_s25 }
 0xa44   : > { %3177 = vperm.xlu1 %4523, %v4710_v29   ;;  %3173 = vperm.xlu0 %4524, %v4706_v10  }
 0xa48   : > { %4526 = vset.pattern.permute.xlu1 %v6736_v5  ;;  %4525 = vset.pattern.permute.xlu0 %v6736_v5  ;;  %v4560_v5 = vld [vmem:[%s6580_s8] sm:$0xff]  }
 0xa49   : > { %3209 = vperm.xlu1 %4526, %v4704_v62   ;;  %3205 = vperm.xlu0 %4525, %v6251_v40  }
 0xa4a   : > { %4373 = vmatprep.subr.bf16.mxu1 %v4560_v5 }
 0xa4b   : > { %4374 = vmatpush3.bf16.msra.mxu1 %v4560_v5 }
 0xa4c   : > { %4395 = vmatprep.subr.bf16.mxu1 %v6304_v20 }
 0xa4d   : > { %3213 = vperm.xlu1 %4526, %v6248_v14   ;;  %3217 = vperm.xlu0 %4525, %v4702_v24  }
 0xa51   : > { %3221 = vperm.xlu1 %4526, %v4708_v46   ;;  %3225 = vperm.xlu0 %4525, %v4712_v56  }
 0xa55   : > { %3229 = vperm.xlu1 %4526, %v4706_v10   ;;  %3233 = vperm.xlu0 %4525, %v4710_v29  }
 0xa59   : > { %4527 = vset.pattern.permute.xlu1 %v6744_v34  ;;  %4528 = vset.pattern.permute.xlu0 %v6744_v34  ;;  %v4561_v34 = vld [vmem:[%s6583_s11 + $0x8] sm:$0xff]  }
 0xa5a   : > { %3261 = vperm.xlu1 %4527, %v6251_v40   ;;  %3265 = vperm.xlu0 %4528, %v4704_v62  }
 0xa5b   : > { %4383 = vmatprep.subr.bf16.mxu0 %v4561_v34 }
 0xa5c   : > { %4384 = vmatpush3.bf16.msra.mxu0 %v4561_v34 }
 0xa5d   : > { %v3097_v0 = vpop.permute.xlu1 %3096 }
 0xa5e   : > { %3269 = vperm.xlu1 %4527, %v6248_v14   ;;  %3277 = vperm.xlu0 %4528, %v4708_v46  }
 0xa61   : > { %v3087_v4 = vpop.permute.xlu0 %3086 }
 0xa62   : > { %3273 = vperm.xlu1 %4527, %v4702_v24   ;;  %3285 = vperm.xlu0 %4528, %v4706_v10   ;;  %v6307_v50 = vpop.permute.xlu1 %3157 }
 0xa66   : > { %3281 = vperm.xlu1 %4527, %v4712_v56   ;;  %v6309_v11 = vpop.permute.xlu1 %3149 }
 0xa6a   : > { %3289 = vperm.xlu1 %4527, %v4710_v29  }
 0xa99   : > { %v3102_v14 = vpop.permute.xlu0 %3101  ;;  %v6311_v52 = vpop.permute.xlu1 %3161 }
 0xa9e   : > { %v6313_v42 = vpop.permute.xlu0 %3153  ;;  %v3092_v40 = vpop.permute.xlu1 %3091 }
 0xaa2   : > { %v6315_v38 = vpop.permute.xlu0 %3165  ;;  %v3117_v43 = vpop.permute.xlu1 %3116 }
 0xaa6   : > { %v6317_v36 = vpop.permute.xlu1 %3106 }
 0xaa7   : > { %v3122_v27 = vpop.permute.xlu0 %3121 }
 0xaab   : > { %v6319_v19 = vpop.permute.xlu0 %3111  ;;  %v6321_v61 = vpop.permute.xlu1 %3169 }
 0xaaf   : > { %v3013_v17 = vpop.permute.xlu0 %3012  ;;  %v3015_v30 = vpop.permute.xlu1 %3014 }
 0xab0   : > { %v3034_v22 = vadd.f32 %v3013_v17, %v2901_v18  ;;  %v3035_v37 = vadd.f32 %v3015_v30, %v2902_v48 }
 0xab2   : > { %3043 = vst.msk [vmem:[#allocation5 + $0x10] sm:$0xff] %vm3040_vm11, %v3034_v22  ;;  %3044 = vst.msk [vmem:[#allocation5 + $0x18] sm:$0xff] %vm3040_vm11, %v3035_v37 }
 0xab3   : > { %v3009_v47 = vpop.permute.xlu0 %3008  ;;  %v3011_v15 = vpop.permute.xlu1 %3010 }
 0xab4   : > { %v3032_v49 = vadd.f32 %v3009_v47, %v2899_v3  ;;  %v3033_v35 = vadd.f32 %v3011_v15, %v2900_v33 }
 0xab6   : > { %3041 = vst.msk [vmem:[#allocation5] sm:$0xff] %vm3040_vm11, %v3032_v49  ;;  %3042 = vst.msk [vmem:[#allocation5 + $0x8] sm:$0xff] %vm3040_vm11, %v3033_v35 }
 0xab7   : > { %v3023_v2 = vpop.permute.xlu0 %3022  ;;  %v3021_v41 = vpop.permute.xlu1 %3020 }
 0xab8   : > { %v3039_v8 = vadd.f32 %v3023_v2, %v2906_v53  ;;  %v3038_v44 = vadd.f32 %v3021_v41, %v2905_v32 }
 0xab9   : > { %v3078_v13 = vld [vmem:[#allocation5 + $0x10] sm:$0xff]  ;;  %v3079_v24 = vld [vmem:[#allocation5 + $0x18] sm:$0xff] }
 0xaba   : > { %v3126_v62 = vmul.f32 %v3097_v0, %v3078_v13  ;;  %v3127_v10 = vmul.f32 %v3102_v14, %v3079_v24  ;;  %3048 = vst.msk [vmem:[#allocation5 + $0x38] sm:$0xff] %vm3040_vm11, %v3039_v8  ;;  %3047 = vst.msk [vmem:[#allocation5 + $0x30] sm:$0xff] %vm3040_vm11, %v3038_v44 }
 0xabb   : > { %v3019_v63 = vpop.permute.xlu0 %3018  ;;  %v3017_v46 = vpop.permute.xlu1 %3016 }
 0xabc   : > { %3134 = vst.msk [vmem:[#allocation5 + $0x10] sm:$0xff] %vm1040_vm2, %v3126_v62  ;;  %3135 = vst.msk [vmem:[#allocation5 + $0x18] sm:$0xff] %vm1040_vm2, %v3127_v10  ;;  %v3037_v16 = vadd.f32 %v3019_v63, %v2904_v23  ;;  %v3036_v29 = vadd.f32 %v3017_v46, %v2903_v45 }
 0xabd   : > { %v3076_v55 = vld [vmem:[#allocation5] sm:$0xff]  ;;  %v3077_v56 = vld [vmem:[#allocation5 + $0x8] sm:$0xff] }
 0xabe   : > { %v3124_v25 = vmul.f32 %v3087_v4, %v3076_v55  ;;  %v3125_v59 = vmul.f32 %v3092_v40, %v3077_v56  ;;  %3046 = vst.msk [vmem:[#allocation5 + $0x28] sm:$0xff] %vm3040_vm11, %v3037_v16  ;;  %3045 = vst.msk [vmem:[#allocation5 + $0x20] sm:$0xff] %vm3040_vm11, %v3036_v29 }
 0xabf   : > { %v3174_v58 = vpop.permute.xlu0 %3173  ;;  %v3178_v54 = vpop.permute.xlu1 %3177 }
 0xac0   : > { %3132 = vst.msk [vmem:[#allocation5] sm:$0xff] %vm1040_vm2, %v3124_v25  ;;  %3133 = vst.msk [vmem:[#allocation5 + $0x8] sm:$0xff] %vm1040_vm2, %v3125_v59 }
 0xac1   : > { %v3082_v26 = vld [vmem:[#allocation5 + $0x30] sm:$0xff]  ;;  %v3083_v12 = vld [vmem:[#allocation5 + $0x38] sm:$0xff] }
 0xac2   : > { %v3130_v9 = vmul.f32 %v3117_v43, %v3082_v26  ;;  %v3131_v5 = vmul.f32 %v3122_v27, %v3083_v12 }
 0xac3   : > { %v3143_v34 = vld [vmem:[#allocation5 + $0x18] sm:$0xff]  ;;  %v3142_v7 = vld [vmem:[#allocation5 + $0x10] sm:$0xff] }
 0xac4   : > { %3138 = vst.msk [vmem:[#allocation5 + $0x30] sm:$0xff] %vm1040_vm2, %v3130_v9  ;;  %3139 = vst.msk [vmem:[#allocation5 + $0x38] sm:$0xff] %vm1040_vm2, %v3131_v5  ;;  %v3206_v60 = vpop.permute.xlu0 %3205  ;;  %v3210_v0 = vpop.permute.xlu1 %3209  ;;  %v3183_v4 = vmul.f32 %v6311_v52, %v3143_v34  ;;  %v3182_v14 = vmul.f32 %v6307_v50, %v3142_v7 }
 0xac5   : > { %v3081_v40 = vld [vmem:[#allocation5 + $0x28] sm:$0xff]  ;;  %v3080_v57 = vld [vmem:[#allocation5 + $0x20] sm:$0xff] }
 0xac6   : > { %v3129_v39 = vmul.f32 %v6319_v19, %v3081_v40  ;;  %v3128_v18 = vmul.f32 %v6317_v36, %v3080_v57  ;;  %3191 = vst.msk [vmem:[#allocation5 + $0x18] sm:$0xff] %vm1992_vm9, %v3183_v4  ;;  %3190 = vst.msk [vmem:[#allocation5 + $0x10] sm:$0xff] %vm1992_vm9, %v3182_v14 }
 0xac7   : > { %v3140_v43 = vld [vmem:[#allocation5] sm:$0xff]  ;;  %v3141_v27 = vld [vmem:[#allocation5 + $0x8] sm:$0xff] }
 0xac8   : > { %3137 = vst.msk [vmem:[#allocation5 + $0x28] sm:$0xff] %vm1040_vm2, %v3129_v39  ;;  %3136 = vst.msk [vmem:[#allocation5 + $0x20] sm:$0xff] %vm1040_vm2, %v3128_v18  ;;  %v3180_v52 = vmul.f32 %v6309_v11, %v3140_v43  ;;  %v3181_v50 = vmul.f32 %v6313_v42, %v3141_v27  ;;  %v3218_v48 = vpop.permute.xlu0 %3217  ;;  %v3214_v17 = vpop.permute.xlu1 %3213 }
 0xaca   : > { %3188 = vst.msk [vmem:[#allocation5] sm:$0xff] %vm1992_vm9, %v3180_v52  ;;  %3189 = vst.msk [vmem:[#allocation5 + $0x8] sm:$0xff] %vm1992_vm9, %v3181_v50 }
 0xacb   : > { %v3146_v36 = vld [vmem:[#allocation5 + $0x30] sm:$0xff]  ;;  %v3147_v19 = vld [vmem:[#allocation5 + $0x38] sm:$0xff] }
 0xacc   : > { %v3186_v30 = vmul.f32 %v3174_v58, %v3146_v36  ;;  %v3187_v21 = vmul.f32 %v3178_v54, %v3147_v19  ;;  %v3226_v31 = vpop.permute.xlu0 %3225  ;;  %v3222_v22 = vpop.permute.xlu1 %3221  ;;  %v4563_v19 = vld [vmem:[%s6582_s10] sm:$0xff]  }
 0xacd   : > { %v3199_v37 = vld [vmem:[#allocation5 + $0x18] sm:$0xff]  ;;  %v3198_v3 = vld [vmem:[#allocation5 + $0x10] sm:$0xff] }
 0xace   : > { %3194 = vst.msk [vmem:[#allocation5 + $0x30] sm:$0xff] %vm1992_vm9, %v3186_v30  ;;  %3195 = vst.msk [vmem:[#allocation5 + $0x38] sm:$0xff] %vm1992_vm9, %v3187_v21  ;;  %v3239_v11 = vmul.f32 %v3218_v48, %v3199_v37  ;;  %v3238_v42 = vmul.f32 %v3214_v17, %v3198_v3  ;;  %v4565_v30 = vld [vmem:[%s5023_s30] sm:$0xff]   ;;  %v4566_v21 = vld [vmem:[%s5023_s30 + $0x8] sm:$0xff]  }
 0xacf   : > { %v3145_v33 = vld [vmem:[#allocation5 + $0x28] sm:$0xff]  ;;  %v3144_v47 = vld [vmem:[#allocation5 + $0x20] sm:$0xff] }
 0xad0   : > { %3247 = vst.msk [vmem:[#allocation5 + $0x18] sm:$0xff] %vm2516_vm10, %v3239_v11  ;;  %3246 = vst.msk [vmem:[#allocation5 + $0x10] sm:$0xff] %vm2516_vm10, %v3238_v42  ;;  %v3185_v15 = vmul.f32 %v6321_v61, %v3145_v33  ;;  %v3184_v49 = vmul.f32 %v6315_v38, %v3144_v47  ;;  %v3234_v35 = vpop.permute.xlu0 %3233  ;;  %v3230_v28 = vpop.permute.xlu1 %3229  ;;  %v4049_v42 = vld [vmem:[%s6581_s9] ss:$0 sm:$0xff] }
 0xad1   : > { %v3196_v6 = vld [vmem:[#allocation5] sm:$0xff]  ;;  %v3197_v32 = vld [vmem:[#allocation5 + $0x8] sm:$0xff] }
 0xad2   : > { %v3236_v53 = vmul.f32 %v3206_v60, %v3196_v6  ;;  %v3237_v2 = vmul.f32 %v3210_v0, %v3197_v32  ;;  %3193 = vst.msk [vmem:[#allocation5 + $0x28] sm:$0xff] %vm1992_vm9, %v3185_v15  ;;  %3192 = vst.msk [vmem:[#allocation5 + $0x20] sm:$0xff] %vm1992_vm9, %v3184_v49 }
 0xad4   : > { %3244 = vst.msk [vmem:[#allocation5] sm:$0xff] %vm2516_vm10, %v3236_v53  ;;  %3245 = vst.msk [vmem:[#allocation5 + $0x8] sm:$0xff] %vm2516_vm10, %v3237_v2 }
 0xad5   : > { %v3203_v41 = vld [vmem:[#allocation5 + $0x38] sm:$0xff]  ;;  %v3202_v1 = vld [vmem:[#allocation5 + $0x30] sm:$0xff]  ;;  %v3266_v8 = vpop.permute.xlu0 %3265  ;;  %v3262_v61 = vpop.permute.xlu1 %3261 }
 0xad6   : > { %v3243_v44 = vmul.f32 %v3234_v35, %v3203_v41  ;;  %v3242_v38 = vmul.f32 %v3230_v28, %v3202_v1 }
 0xad7   : > { %v3254_v23 = vld [vmem:[#allocation5 + $0x10] sm:$0xff]  ;;  %v3255_v56 = vld [vmem:[#allocation5 + $0x18] sm:$0xff] }
 0xad8   : > { %3251 = vst.msk [vmem:[#allocation5 + $0x38] sm:$0xff] %vm2516_vm10, %v3243_v44  ;;  %3250 = vst.msk [vmem:[#allocation5 + $0x30] sm:$0xff] %vm2516_vm10, %v3242_v38 }
 0xad9   : > { %v3201_v51 = vld [vmem:[#allocation5 + $0x28] sm:$0xff]  ;;  %v3200_v13 = vld [vmem:[#allocation5 + $0x20] sm:$0xff]  ;;  %v3278_v24 = vpop.permute.xlu0 %3277  ;;  %v3270_v62 = vpop.permute.xlu1 %3269 }
 0xada   : > { %v3241_v10 = vmul.f32 %v3226_v31, %v3201_v51  ;;  %v3240_v45 = vmul.f32 %v3222_v22, %v3200_v13  ;;  %v3294_v63 = vmul.f32 %v3270_v62, %v3254_v23  ;;  %v4567_v31 = vld [vmem:[%s5023_s30 + $0x10] sm:$0xff]   ;;  %v4568_v22 = vld [vmem:[%s5023_s30 + $0x18] sm:$0xff]   ;;  %s6404_s30 = sand.u32 1, %s4829_s19  }
 0xadb   : > { %v3253_v46 = vld [vmem:[#allocation5 + $0x8] sm:$0xff]  ;;  %v3252_v16 = vld [vmem:[#allocation5] sm:$0xff]  ;;  %s3959_s17 = sshll.u32 %s6404_s30, 5 }
 0xadc   : > { %3249 = vst.msk [vmem:[#allocation5 + $0x28] sm:$0xff] %vm2516_vm10, %v3241_v10  ;;  %3248 = vst.msk [vmem:[#allocation5 + $0x20] sm:$0xff] %vm2516_vm10, %v3240_v45  ;;  %v3293_v29 = vmul.f32 %v3266_v8, %v3253_v46  ;;  %v3292_v55 = vmul.f32 %v3262_v61, %v3252_v16  ;;  %v4072_v45 = vld [vmem:[%s6584_s12] ss:$0 sm:$0xff]  ;;  %s6410_s25 = scalar_lea.vmem [#allocation6], %s3959_s17  ;;  %s4859_s17 = smov [#allocation6]  }
 0xadd   : > { %3302 = vst.msk [vmem:[#allocation5 + $0x10] sm:$0xff] %vm3040_vm11, %v3294_v63  ;;  %v3274_v25 = vpop.permute.xlu1 %3273  ;;  %v3286_v58 = vpop.permute.xlu0 %3285  ;;  %s3771_s26 = sshll.u32 %s6410_s25, 4  ;;  %s4717_s22 = sshll.u32 %s4859_s17, 4  ;;  %s6435_s26 = int_to_ptr.vmem [resolvable:$true] %s3771_s26  ;;  %s4718_s22 = int_to_ptr.vmem [resolvable:$false] %s4717_s22 }
 0xade   : > { %3301 = vst.msk [vmem:[#allocation5 + $0x8] sm:$0xff] %vm3040_vm11, %v3293_v29  ;;  %3300 = vst.msk [vmem:[#allocation5] sm:$0xff] %vm3040_vm11, %v3292_v55  ;;  %v3295_v59 = vmul.f32 %v3274_v25, %v3255_v56  ;;  %s4713_s24 = scalar_lea.vmem %s6435_s26, 512  ;;  %s4719_s20 = scalar_lea.vmem %s4718_s22, 1024 }
 0xadf   : > { %v3258_v54 = vld [vmem:[#allocation5 + $0x30] sm:$0xff]  ;;  %v3259_v60 = vld [vmem:[#allocation5 + $0x38] sm:$0xff]  ;;  %p4714_p12 = scmp.ne.s32.totalorder %s6435_s26, %s4713_s24  ;;  %p4720_p1 = scmp.lt.s32.totalorder %s6435_s26, %s4718_s22 }
 0xae0   : > { %v3298_v26 = vmul.f32 %v3286_v58, %v3258_v54  ;;  %3303 = vst.msk [vmem:[#allocation5 + $0x18] sm:$0xff] %vm3040_vm11, %v3295_v59  ;;  %p4721_p2 = scmp.lt.s32.totalorder %s4719_s20, %s4713_s24 }
 0xae1   : > { %v3282_v12 = vpop.permute.xlu1 %3281  ;;  %p4715_p13 = pnand %p4714_p12, %p4986_p4 }
 0xae2   : > { %3306 = vst.msk [vmem:[#allocation5 + $0x30] sm:$0xff] %vm3040_vm11, %v3298_v26  ;;  %p4722_p3 = por %p4721_p2, %p4720_p1 }
 0xae3   : > { %v3256_v9 = vld [vmem:[#allocation5 + $0x20] sm:$0xff]  ;;  %v3257_v5 = vld [vmem:[#allocation5 + $0x28] sm:$0xff]  ;;  %p4716_p0 = pneg %p4715_p13 }
 0xae4   : > { %v3296_v34 = vmul.f32 %v3278_v24, %v3256_v9  ;;  %v3297_v7 = vmul.f32 %v3282_v12, %v3257_v5  ;;  %v3310_v39 = vld [vmem:[#allocation5 + $0x10] sm:$0xff] }
 0xae5   : > { %v3290_v0 = vpop.permute.xlu1 %3289  ;;  %v3308_v4 = vld [vmem:[#allocation5] sm:$0xff]  ;;  %v3309_v14 = vld [vmem:[#allocation5 + $0x8] sm:$0xff]  ;;  %p4723_p5 = pnand %p4722_p3, %p4716_p0 }
 0xae6   : > { %3304 = vst.msk [vmem:[#allocation5 + $0x20] sm:$0xff] %vm3040_vm11, %v3296_v34  ;;  %3305 = vst.msk [vmem:[#allocation5 + $0x28] sm:$0xff] %vm3040_vm11, %v3297_v7  ;;  %v3299_v40 = vmul.f32 %v3290_v0, %v3259_v60  ;;  %v3316_v57 = vpack.c.bf16 %v3309_v14, %v3308_v4 }
 0xae7   : > { %v3311_v18 = vld [vmem:[#allocation5 + $0x18] sm:$0xff] }
 0xae8   : > { %3307 = vst.msk [vmem:[#allocation5 + $0x38] sm:$0xff] %vm3040_vm11, %v3299_v40  ;;  %4375 = vmatprep.mubr.msk.bf16.mxu1 %vm643_vm0, %v3316_v57  ;;  %v3317_v43 = vpack.c.bf16 %v3311_v18, %v3310_v39 }
 0xae9   : > { %v3314_v48 = vld [vmem:[#allocation5 + $0x30] sm:$0xff] }
 0xaea   : > { %4376 = vmatmul.mubr.msk.bf16.vlgmr.msra.gmra.mxu1 %vm643_vm0, %v3317_v43 }
 0xaeb   : > { %4396 = vmatpush3.bf16.msra.mxu1 %v6304_v20  ;;  %v4564_v20 = vld [vmem:[%s6583_s11] sm:$0xff]  }
 0xaec   : > { %4397 = vmatprep.subr.bf16.mxu1 %v4563_v19  ;;  %4385 = vmatprep.subr.bf16.mxu0 %v4564_v20 }
 0xaed   : > { %v3312_v27 = vld [vmem:[#allocation5 + $0x20] sm:$0xff]  ;;  %v3313_v52 = vld [vmem:[#allocation5 + $0x28] sm:$0xff]  ;;  %4386 = vmatpush3.bf16.msra.mxu0 %v4564_v20 }
 0xaee   : > { %v3318_v50 = vpack.c.bf16 %v3313_v52, %v3312_v27 }
 0xaef   : > { %v3315_v17 = vld [vmem:[#allocation5 + $0x38] sm:$0xff]  ;;  %4398 = vmatpush3.bf16.msra.mxu1 %v4563_v19 }
 0xaf0   : > { %4379 = vmatprep.mubr.msk.bf16.mxu1 %vm643_vm0, %v3318_v50  ;;  %v3319_v36 = vpack.c.bf16 %v3315_v17, %v3314_v48 }
 0xaf2   : > { %4380 = vmatmul.mubr.msk.bf16.gmra.mxu1 %vm643_vm0, %v3319_v36 }
 0xaf3   : > { %4399 = vmatprep.mubr.msk.bf16.mxu1 %vm643_vm0, %v4565_v30 }
 0xafa   : > { %4400 = vmatmul.mubr.msk.bf16.vlgmr.msra.gmra.mxu1 %vm643_vm0, %v4566_v21 }
 0xafb   : > { %4403 = vmatprep.mubr.msk.bf16.mxu1 %vm643_vm0, %v4567_v31 }
 0xb02   : > { %4404 = vmatmul.mubr.msk.bf16.gmra.mxu1 %vm643_vm0, %v4568_v22 }
 0xbaa   : > { %v4377_v37 = vpop.f32.mrf.mxu1 }
 0xbab   : > { %v3398_v35 = vadd.f32 %v4377_v37, %v4049_v42 }
 0xbac   : > { %v3389_v3 = vpop.f32.mrf.mxu1 }
 0xbad   : > { %v3390_v15 = vadd.f32 %v4049_v42, %v3389_v3 }
 0xbae   : > { %v4378_v11 = vpop.f32.mrf.mxu1 }
 0xbaf   : > { %v3401_v33 = vadd.f32 %v4378_v11, %v4049_v42 }
 0xbb0   : > { %v3392_v47 = vpop.f32.mrf.mxu1 }
 0xbb1   : > { %v3393_v49 = vadd.f32 %v4049_v42, %v3392_v47  ;;  %v3433_v32 = vpack.c.bf16 %v3401_v33, %v3398_v35 }
 0xbb2   : > { %v4381_v28 = vpop.f32.mrf.mxu1 }
 0xbb3   : > { %v3432_v6 = vpack.c.bf16 %v3393_v49, %v3390_v15  ;;  %v3414_v44 = vadd.f32 %v4381_v28, %v4049_v42 }
 0xbb4   : > { %v3405_v53 = vpop.f32.mrf.mxu1 }
 0xbb5   : > { %4387 = vmatprep.mubr.msk.bf16.mxu0 %vm643_vm0, %v3432_v6  ;;  %v3406_v8 = vadd.f32 %v4049_v42, %v3405_v53 }
 0xbb6   : > { %v4382_v2 = vpop.f32.mrf.mxu1  ;;  %4388 = vmatmul.mubr.msk.bf16.vlgmr.msra.gmra.mxu0 %vm643_vm0, %v3433_v32 }
 0xbb7   : > { %v3417_v41 = vadd.f32 %v4382_v2, %v4049_v42 }
 0xbb8   : > { %v3408_v1 = vpop.f32.mrf.mxu1 }
 0xbb9   : > { %v3409_v61 = vadd.f32 %v4049_v42, %v3408_v1  ;;  %v3435_v51 = vpack.c.bf16 %v3417_v41, %v3414_v44 }
 0xbba   : > { %v4401_v13 = vpop.f32.mrf.mxu1 }
 0xbbb   : > { %v3434_v38 = vpack.c.bf16 %v3409_v61, %v3406_v8 }
 0xbbc   : > { %v3607_v24 = vpop.f32.mrf.mxu1 }
 0xbbd   : > { %4391 = vmatprep.mubr.msk.bf16.mxu0 %vm643_vm0, %v3434_v38 }
 0xbbe   : > { %4392 = vmatmul.mubr.msk.bf16.gmra.mxu0 %vm643_vm0, %v3435_v51  ;;  %v4402_v23 = vpop.f32.mrf.mxu1 }
 0xbc0   : > { %v3610_v62 = vpop.f32.mrf.mxu1 }
 0xbc2   : > { %v4405_v16 = vpop.f32.mrf.mxu1 }
 0xbc4   : > { %v3623_v54 = vpop.f32.mrf.mxu1 }
 0xbc6   : > { %v4406_v14 = vpop.f32.mrf.mxu1 }
 0xbc8   : > { %v3626_v31 = vpop.f32.mrf.mxu1 }
 0xc76   : > { %v4389_v10 = vpop.f32.mrf.mxu0 }
 0xc77   : > { %v3616_v63 = vadd.f32 %v4401_v13, %v4389_v10 }
 0xc78   : > { %v3498_v46 = vpop.f32.mrf.mxu0 }
 0xc79   : > { %v3647_v29 = vadd.f32 %v4072_v45, %v3616_v63  ;;  %v3608_v55 = vadd.f32 %v3607_v24, %v3498_v46 }
 0xc7a   : > { %v4390_v56 = vpop.f32.mrf.mxu0 }
 0xc7b   : > { %v4100_v25 = vpack.c.bf16 %v3647_v29, %v3647_v29  ;;  %v3645_v59 = vadd.f32 %v4072_v45, %v3608_v55  ;;  %v3619_v58 = vadd.f32 %v4402_v23, %v4390_v56  ;;  %v3719_v57 = vmul.f32 %v3647_v29, %v3647_v29 }
 0xc7c   : > { %v3501_v26 = vpop.f32.mrf.mxu0  ;;  %v3697_v17 = vsel %vm1146_vm4, %v3647_v29, 0.0 }
 0xc7d   : > { %v4098_v12 = vpack.c.bf16 %v3645_v59, %v3645_v59  ;;  %3688 = vst.msk [vmem:[%s6410_s25 + $0x8] sm:$0xf] %vm3685_vm12, %v4100_v25  ;;  %v3648_v9 = vadd.f32 %v4072_v45, %v3619_v58  ;;  %v3611_v5 = vadd.f32 %v3610_v62, %v3501_v26  ;;  %v3717_v7 = vmul.f32 %v3645_v59, %v3645_v59 }
 0xc7e   : > { %v4393_v34 = vpop.f32.mrf.mxu0  ;;  %v3694_v43 = vsel %vm1146_vm4, %v3645_v59, 0.0  ;;  %v3728_v11 = vsel %vm1146_vm4, %v3719_v57, 0.0 }
 0xc7f   : > { %v3632_v60 = vadd.f32 %v4405_v16, %v4393_v34  ;;  %3686 = vst.msk [vmem:[%s6410_s25] sm:$0xf] %vm3685_vm12, %v4098_v12  ;;  %v4101_v0 = vpack.c.bf16 %v3648_v9, %v3648_v9  ;;  %v3646_v4 = vadd.f32 %v4072_v45, %v3611_v5  ;;  %v3725_v36 = vsel %vm1146_vm4, %v3717_v7, 0.0 }
 0xc80   : > { %v3514_v40 = vpop.f32.mrf.mxu0  ;;  %v3720_v30 = vmul.f32 %v3648_v9, %v3648_v9  ;;  %v3699_v15 = vsel %vm1146_vm4, %v3648_v9, 0.0 }
 0xc81   : > { %v3651_v39 = vadd.f32 %v4072_v45, %v3632_v60  ;;  %v3624_v18 = vadd.f32 %v3623_v54, %v3514_v40  ;;  %v4099_v27 = vpack.c.bf16 %v3646_v4, %v3646_v4  ;;  %v3695_v52 = vsel %vm1146_vm4, %v3646_v4, 0.0  ;;  %3689 = vst.msk [vmem:[%s6410_s25 + $0xc] sm:$0xf] %vm3685_vm12, %v4101_v0 }
 0xc82   : > { %v3718_v50 = vmul.f32 %v3646_v4, %v3646_v4  ;;  %v4394_v48 = vpop.f32.mrf.mxu0  ;;  %v3696_v19 = vadd.f32 %v3695_v52, %v3694_v43  ;;  %v3730_v2 = vsel %vm1146_vm4, %v3720_v30, 0.0 }
 0xc83   : > { %v4104_v20 = vpack.c.bf16 %v3651_v39, %v3651_v39  ;;  %v3649_v22 = vadd.f32 %v4072_v45, %v3624_v18  ;;  %v3635_v37 = vadd.f32 %v4406_v14, %v4394_v48  ;;  %3687 = vst.msk [vmem:[%s6410_s25 + $0x4] sm:$0xf] %vm3685_vm12, %v4099_v27  ;;  %v3723_v51 = vmul.f32 %v3651_v39, %v3651_v39 }
 0xc84   : > { %v3726_v21 = vsel %vm1146_vm4, %v3718_v50, 0.0  ;;  %v3517_v3 = vpop.f32.mrf.mxu0  ;;  %v3698_v42 = vadd.f32 %v3697_v17, %v3696_v19  ;;  %v3705_v10 = vsel %vm1146_vm4, %v3651_v39, 0.0 }
 0xc85   : > { %v3727_v33 = vadd.f32 %v3726_v21, %v3725_v36  ;;  %v3627_v47 = vadd.f32 %v3626_v31, %v3517_v3  ;;  %3692 = vst.msk [vmem:[%s6410_s25 + $0x18] sm:$0xf] %vm3685_vm12, %v4104_v20  ;;  %v4102_v49 = vpack.c.bf16 %v3649_v22, %v3649_v22  ;;  %v3721_v35 = vmul.f32 %v3649_v22, %v3649_v22 }
 0xc86   : > { %v3652_v28 = vadd.f32 %v4072_v45, %v3635_v37  ;;  %v3700_v32 = vadd.f32 %v3699_v15, %v3698_v42  ;;  %v3701_v41 = vsel %vm1146_vm4, %v3649_v22, 0.0 }
 0xc87   : > { %v3729_v6 = vadd.f32 %v3728_v11, %v3727_v33  ;;  %v3650_v53 = vadd.f32 %v4072_v45, %v3627_v47  ;;  %3690 = vst.msk [vmem:[%s6410_s25 + $0x10] sm:$0xf] %vm3685_vm12, %v4102_v49  ;;  %v3732_v13 = vsel %vm1146_vm4, %v3721_v35, 0.0 }
 0xc88   : > { %v4105_v1 = vpack.c.bf16 %v3652_v28, %v3652_v28  ;;  %v3702_v8 = vadd.f32 %v3701_v41, %v3700_v32  ;;  %v3724_v45 = vmul.f32 %v3652_v28, %v3652_v28 }
 0xc89   : > { %v3731_v61 = vadd.f32 %v3730_v2, %v3729_v6  ;;  %v4103_v44 = vpack.c.bf16 %v3650_v53, %v3650_v53  ;;  %v3703_v38 = vsel %vm1146_vm4, %v3650_v53, 0.0  ;;  %v3722_v24 = vmul.f32 %v3650_v53, %v3650_v53 }
 0xc8a   : > { %3693 = vst.msk [vmem:[%s6410_s25 + $0x1c] sm:$0xf] %vm3685_vm12, %v4105_v1  ;;  %v3704_v62 = vadd.f32 %v3703_v38, %v3702_v8 }
 0xc8b   : > { %v3733_v23 = vadd.f32 %v3732_v13, %v3731_v61  ;;  %3691 = vst.msk [vmem:[%s6410_s25 + $0x14] sm:$0xf] %vm3685_vm12, %v4103_v44  ;;  %v3734_v63 = vsel %vm1146_vm4, %v3722_v24, 0.0 }
 0xc8c   : > { %4726 = shalt.err (!%p4723_p5)
}
 0xc8d   : > { %s4727_s25 = scalar_lea.hbm %s6441_s29, 512  ;;  %s4731_s17 = scalar_lea.hbm %s6585_s13, 1024 }
 0xc8e   : > { %p4728_p6 = scmp.ne.s32.totalorder %s6441_s29, %s4727_s25  ;;  %p4732_p10 = scmp.lt.s32.totalorder %s6441_s29, %s6585_s13 }
 0xc8f   : > { %p4733_p11 = scmp.lt.s32.totalorder %s4731_s17, %s4727_s25 }
 0xc90   : > { %p4729_p7 = pnand %p4728_p6, %p4986_p4 }
 0xc91   : > { %p4734_p12 = por %p4733_p11, %p4732_p10 }
 0xc92   : > { %p4730_p9 = pneg %p4729_p7 }
 0xc94   : > { %p4735_p13 = pnand %p4734_p12, %p4730_p9 }
 0xc96   : > { %4738 = shalt.err (!%p4735_p13)
}
 0xc97   : > { %s4860_s24 = smov 64   ;;  %s4861_s22 = smov 4   ;;  %v3706_v46 = vadd.f32 %v3705_v10, %v3704_v62  ;;  %v3735_v16 = vadd.f32 %v3734_v63, %v3733_v23  ;;  %v3736_v29 = vsel %vm1146_vm4, %v3723_v51, 0.0  ;;  %v3707_v55 = vsel %vm1146_vm4, %v3652_v28, 0.0 }
 0xc98   : > { %s6783_s20 = scalar_lea.sflag [#allocation7], %s6404_s30  ;;  %v3738_v59 = vsel %vm1146_vm4, %v3724_v45, 0.0  ;;  %s6784_s0 = sadd.s32 4294967295, %s4845_s23   ;;  %vm3715_vm13 = vcmask 516096  }
 0xc99   : > { %4423 = dma.vmem_to_hbm [thread:$0]  (%p4986_p4), %s6435_s26, 512, %s6441_s29, %s6783_s20, %s4860_s24, %s4860_s24, %s4861_s22   ;;  %v3708_v56 = vadd.f32 %v3707_v55, %v3706_v46  ;;  %v3737_v25 = vadd.f32 %v3736_v29, %v3735_v16 }
 0xc9a   : > { %s6478_s1 = sand.u32 1, %s6784_s0   ;;  %s4084_s26 = sshll.u32 %s4837_s21, 4 }
 0xc9b   : > { %v3739_v58 = vadd.f32 %v3738_v59, %v3737_v25  ;;  %v3709_v54 = vrot.slane %v3708_v56, 4  ;;  %s559_s29 = scalar_lea.vmem [#allocation8], %s6404_s30  ;;  %s6631_s25 = scalar_lea.vmem [#allocation10], %s6404_s30 }
 0xc9c   : > { %s3788_s27 = sshll.u32 %s559_s29, 4  ;;  %s3802_s16 = sshll.u32 %s6631_s25, 4  ;;  %s6490_s27 = int_to_ptr.vmem [resolvable:$true] %s3788_s27  ;;  %s6498_s16 = int_to_ptr.vmem [resolvable:$true] %s3802_s16 }
 0xc9d   : > { %v3740_v26 = vrot.slane %v3739_v58, 4  ;;  %v3710_v12 = vadd.f32 %v3709_v54, %v3708_v56  ;;  %s6488_s22 = scalar_lea.hbm %s6586_s14, %s4084_s26  ;;  %s6496_s0 = scalar_lea.hbm %s6587_s15, %s4084_s26 }
 0xc9e   : > { %s4739_s17 = scalar_lea.vmem %s6490_s27, 16  ;;  %s4862_s24 = smov [#allocation8]  }
 0xc9f   : > { %v3711_v9 = vrot.slane %v3710_v12, 2  ;;  %v3741_v5 = vadd.f32 %v3740_v26, %v3739_v58  ;;  %p4740_p0 = scmp.ne.s32.totalorder %s6490_s27, %s4739_s17  ;;  %s4743_s2 = sshll.u32 %s4862_s24, 4  ;;  %s4744_s2 = int_to_ptr.vmem [resolvable:$false] %s4743_s2 }
 0xca0   : > { %s4745_s3 = scalar_lea.vmem %s4744_s2, 32  ;;  %p4746_p3 = scmp.lt.s32.totalorder %s6490_s27, %s4744_s2 }
 0xca1   : > { %v3712_v34 = vadd.f32 %v3711_v9, %v3710_v12  ;;  %v3742_v7 = vrot.slane %v3741_v5, 2  ;;  %p4741_p1 = pnand %p4740_p0, %p4986_p4  ;;  %p4747_p5 = scmp.lt.s32.totalorder %s4745_s3, %s4739_s17 }
 0xca3   : > { %v3713_v60 = vrot.slane %v3712_v34, 1  ;;  %v3743_v0 = vadd.f32 %v3742_v7, %v3741_v5  ;;  %p4742_p2 = pneg %p4741_p1  ;;  %p4748_p6 = por %p4747_p5, %p4746_p3 }
 0xca5   : > { %v3714_v4 = vadd.f32 %v3713_v60, %v3712_v34  ;;  %v3744_v14 = vrot.slane %v3743_v0, 1  ;;  %p4749_p7 = pnand %p4748_p6, %p4742_p2 }
 0xca7   : > { %3716 = vst.msk [vmem:[%s559_s29] sm:$0x1] %vm3715_vm13, %v3714_v4  ;;  %v3745_v40 = vadd.f32 %v3744_v14, %v3743_v0 }
 0xca8   : > { %4752 = shalt.err (!%p4749_p7)
}
 0xca9   : > { %s4753_s26 = scalar_lea.hbm %s6488_s22, 16  ;;  %s4757_s20 = scalar_lea.hbm %s6586_s14, 32 }
 0xcaa   : > { %p4754_p9 = scmp.ne.s32.totalorder %s6488_s22, %s4753_s26  ;;  %p4758_p12 = scmp.lt.s32.totalorder %s6488_s22, %s6586_s14 }
 0xcab   : > { %p4759_p13 = scmp.lt.s32.totalorder %s4757_s20, %s4753_s26 }
 0xcac   : > { %p4755_p10 = pnand %p4754_p9, %p4986_p4 }
 0xcad   : > { %p4760_p0 = por %p4759_p13, %p4758_p12 }
 0xcae   : > { %p4756_p11 = pneg %p4755_p10 }
 0xcb0   : > { %p4761_p1 = pnand %p4760_p0, %p4756_p11 }
 0xcb2   : > { %4764 = shalt.err (!%p4761_p1)
}
 0xcb3   : > { %s6785_s2 = scalar_lea.sflag [#allocation9], %s6478_s1  ;;  %s6786_s3 = scalar_lea.vmem [#allocation10], %s6404_s30 }
 0xcb4   : > { %4424 = dma.vmem_to_hbm [thread:$0]  (%p4986_p4), %s6490_s27, 16, %s6488_s22, %s6785_s2   ;;  %3746 = vst.msk [vmem:[%s6786_s3] sm:$0x1] %vm3715_vm13, %v3745_v40 }
 0xcb5   : > { %s4765_s25 = scalar_lea.vmem %s6498_s16, 16  ;;  %s4863_s17 = smov [#allocation10]  }
 0xcb6   : > { %p4766_p2 = scmp.ne.s32.totalorder %s6498_s16, %s4765_s25  ;;  %s4769_s26 = sshll.u32 %s4863_s17, 4  ;;  %s4770_s26 = int_to_ptr.vmem [resolvable:$false] %s4769_s26 }
 0xcb7   : > { %s4771_s29 = scalar_lea.vmem %s4770_s26, 32  ;;  %p4772_p6 = scmp.lt.s32.totalorder %s6498_s16, %s4770_s26 }
 0xcb8   : > { %p4767_p3 = pnand %p4766_p2, %p4986_p4  ;;  %p4773_p7 = scmp.lt.s32.totalorder %s4771_s29, %s4765_s25 }
 0xcba   : > { %p4768_p5 = pneg %p4767_p3  ;;  %p4774_p9 = por %p4773_p7, %p4772_p6 }
 0xcbc   : > { %p4775_p10 = pnand %p4774_p9, %p4768_p5 }
 0xcbe   : > { %4778 = shalt.err (!%p4775_p10)
}
 0xcbf   : > { %s4779_s30 = scalar_lea.hbm %s6496_s0, 16  ;;  %s4783_s21 = scalar_lea.hbm %s6587_s15, 32 }
 0xcc0   : > { %p4780_p11 = scmp.ne.s32.totalorder %s6496_s0, %s4779_s30  ;;  %p4784_p0 = scmp.lt.s32.totalorder %s6496_s0, %s6587_s15 }
 0xcc1   : > { %p4785_p1 = scmp.lt.s32.totalorder %s4783_s21, %s4779_s30 }
 0xcc2   : > { %p4781_p12 = pnand %p4780_p11, %p4986_p4 }
 0xcc3   : > { %p4786_p2 = por %p4785_p1, %p4784_p0 }
 0xcc4   : > { %p4782_p13 = pneg %p4781_p12 }
 0xcc6   : > { %p4787_p3 = pnand %p4786_p2, %p4782_p13 }
 0xcc8   : > { %4790 = shalt.err (!%p4787_p3)
}
 0xcc9   : > { %4425 = dma.vmem_to_hbm [thread:$0]  (%p4986_p4), %s6498_s16, 16, %s6496_s0, %s6785_s2  }
 0xcca PF: > { %p4439_p5 = scmp.ge.s32.totalorder %s4845_s23, 2  ;;  %s3814_s25 = sand.u32 1, %s4825_s18  }
 0xccb   : > { %s3815_s17 = scalar_lea.sflag [#allocation7], %s3814_s25 }
 0xccc   : > { %p4430_p6 = pnand %p4439_p5, %p4995_p8 }
 0xcce   : > { %p4431_p7 = pneg %p4430_p6 }
 0xcd0   : > { %4816 = dma.done.wait (%p4431_p7), %s3815_s17, 512  }
 0xcd1   : > { %4818 = vsyncadd (%p4431_p7), %s3815_s17, 4294966784  ;;  %s6788_s26 = sadd.s32 4294967294, %s4845_s23  }
 0xcd2   : > { %s3823_s28 = sand.u32 1, %s6788_s26  }
 0xcd3   : > { %s3824_s29 = scalar_lea.sflag [#allocation9], %s3823_s28 }
 0xcd4   : > { %4820 = dma.done.wait (%p4431_p7), %s3824_s29, 32  }
 0xcd5   : > { %4822 = vsyncadd (%p4431_p7), %s3824_s29, 4294967264  ;;  %s32_s23 = sadd.s32 1, %s4845_s23   ;;  %s6789_s1 = sld [smem:[#allocation13_spill]] }
 0xcd6   : > { %p29_p4 = scmp.ge.s32.totalorder %s32_s23, 4   ;;  %s6790_s20 = sld [smem:[#allocation17_spill]] }
 0xcd7   : > { %s6791_s21 = sld [smem:[#allocation14_spill]]  ;;  %s6793_s18 = smov %s4829_s19 }
 0xcd8   : > { %s6792_s22 = sld [smem:[#allocation15_spill]]  ;;  %31 = sbr.rel (!%p29_p4) target bundleno = 11 (0xb), region = 150 }
 0xcdb   : > { %s6794_s19 = smov %s6789_s1 }
 0xcdd   :  { %3836 = vsyncpa [#allocation7], 1 }
 0xcde   :  { %3838 = vsyncpa [#allocation7 + $0x1], 1 }
 0xcdf   :  { %3839 = vsyncpa [#allocation9], 1 }
 0xce0   :  { %3841 = vsyncpa [#allocation9 + $0x1], 1 }

</bundles_post_ra>
